<compile_context>
chip_gen: v5e
topology: v5e:2x2
jax: 0.10.0
libtpu: 0.0.40
codegen_flags: <defaults>
</compile_context>

<pallas_src>
import functools

import jax
import jax.numpy as jnp
from jax.experimental import pallas as pl
from jax.experimental.pallas import tpu as pltpu


# ---------------------------------------------------------------------------
# In-kernel math helpers
# ---------------------------------------------------------------------------
def _erf_approx(z):
    # Abramowitz & Stegun 7.1.26 rational approximation, |err| ~ 1.5e-7 vs torch.erf.
    # Exact divide (review: approx reciprocal degraded the polynomial's accuracy).
    p = 0.3275911
    a1, a2, a3, a4, a5 = (0.254829592, -0.284496736, 1.421413741,
                          -1.453152027, 1.061405429)
    sgn = jnp.where(z < 0.0, -1.0, 1.0)
    za = jnp.abs(z)
    t = 1.0 / (1.0 + p * za)
    poly = ((((a5 * t + a4) * t + a3) * t + a2) * t + a1) * t
    return sgn * (1.0 - poly * jnp.exp(-za * za))


def _gelu_exact(h):
    # nn.GELU() default (erf-based), computed in f32.
    return 0.5 * h * (1.0 + _erf_approx(h * 0.7071067811865475))


# ---------------------------------------------------------------------------
# Kernel A: adaptive MLP (two 1x1 convs == per-pixel matmuls) + adapted freqs,
# computed directly in NCHW (channel-major) layout:
#   adapted[c, s] = freqs[c, s] * (1 + tanh(W2 gelu(W1 x[:, s] + b1) + b2)[c])
# (the original clamp(-1, 1) after tanh is a no-op since tanh is already bounded)
# ---------------------------------------------------------------------------
def _adaptive_mlp_kernel(x_ref, f_ref, w1_ref, b1_ref, w2_ref, b2_ref, out_ref):
    xb = x_ref[...].astype(jnp.bfloat16)                               # (C, ts) bf16
    # bf16 operands into the MXU, f32 accumulation; biases broadcast along lanes.
    h = jnp.dot(w1_ref[...], xb, preferred_element_type=jnp.float32) + b1_ref[...]   # (H, ts)
    h = _gelu_exact(h)                                                 # GELU (erf), f32
    a = jnp.tanh(jnp.dot(w2_ref[...], h.astype(jnp.bfloat16),
                         preferred_element_type=jnp.float32) + b2_ref[...])           # (C, ts)
    out_ref[...] = f_ref[...] * (1.0 + a)                              # adapted freqs, f32


def adaptive_mlp_freqs(x_cm, f_cm, w1_bf16, b1, w2_bf16, b2,
                       *, batch, channels, spatial, tile_s, vmem_limit):
    """x_cm: (B*C, S) NCHW-ordered; f_cm: (C, S) base freqs * base_scale (no batch bcast).
    Output: (B*C, S) adapted freqs in NCHW order (exactly what Kernel B's freq stream needs)."""
    hid = w1_bf16.shape[0]
    n_sp_tiles = pl.cdiv(spatial, tile_s)
    x_spec = pl.BlockSpec((channels, tile_s), lambda j, b: (b, j))
    f_spec = pl.BlockSpec((channels, tile_s), lambda j, b: (0, j))   # batch-invariant -> resident
    return pl.pallas_call(
        _adaptive_mlp_kernel,
        out_shape=jax.ShapeDtypeStruct((batch * channels, spatial), jnp.float32),
        grid_spec=pltpu.PrefetchScalarGridSpec(
            num_scalar_prefetch=0,
            grid=(n_sp_tiles, batch),            # batch innermost: freq tile not re-DMA'd per batch
            in_specs=[
                x_spec,                                               # x block (C, ts)
                f_spec,                                               # base freqs block (C, ts)
                pl.BlockSpec((hid, channels), lambda j, b: (0, 0)),   # W1 (bf16, resident)
                pl.BlockSpec((hid, 1), lambda j, b: (0, 0)),          # b1 (f32)
                pl.BlockSpec((channels, hid), lambda j, b: (0, 0)),   # W2 (bf16, resident)
                pl.BlockSpec((channels, 1), lambda j, b: (0, 0)),     # b2 (f32)
            ],
            out_specs=x_spec,
        ),
        compiler_params=pltpu.CompilerParams(
            dimension_semantics=("parallel", "parallel"),
            vmem_limit_bytes=vmem_limit),
    )(x_cm, f_cm, w1_bf16, b1, w2_bf16, b2)


# ---------------------------------------------------------------------------
# Kernel B: rotary rotation on lane-dense flat streams.
#   flat pair (2m, 2m+1): x_c = x[2m] + i x[2m+1],  f_c = f[2m] + i f[2m+1]
#   out_c = x_c * exp(i f_c) = exp(-f_im) * (x_re + i x_im)(cos f_re + i sin f_re)
# x rows follow NHWC flat order, freq rows follow the module's quirky NCHW flat order;
# pairing is elementwise on matching flat indices (exactly reproducing apply_rotary_emb).
# With an even lane width, pairs never straddle rows; pairing is resolved with an
# even-lane mask + pltpu.roll (XLU slot), so loads and stores stay dense.
# ---------------------------------------------------------------------------
def _rotary_kernel(x_ref, f_ref, out_ref):
    x = x_ref[...]                                                    # (tr, W) f32
    f = f_ref[...]
    w = x.shape[-1]
    lane = jax.lax.broadcasted_iota(jnp.int32, x.shape, 1)
    is_even = (lane & 1) == 0
    # Partner-lane values within each (2m, 2m+1) pair (rolls wrap, but wrapped lanes
    # are always masked out by is_even / ~is_even below).
    f_prev = pltpu.roll(f, shift=1, axis=1)          # f[l-1]
    f_next = pltpu.roll(f, shift=w - 1, axis=1)      # f[l+1]
    x_prev = pltpu.roll(x, shift=1, axis=1)
    x_next = pltpu.roll(x, shift=w - 1, axis=1)
    f_re = jnp.where(is_even, f, f_prev)             # f[2m]  broadcast over the pair
    f_im = jnp.where(is_even, f_next, f)             # f[2m+1] broadcast over the pair
    # NOTE: cos/sin/exp are evaluated on both lanes of each pair (2x the strictly
    # necessary EUP work). Halving it needs an XLU de/re-interleave; per the review
    # this is deferred until a bundle dump shows the EUP slot saturating (the kernel
    # is HBM-bound at these block sizes).
    scale = jnp.exp(-f_im)
    cosr = jnp.cos(f_re)
    sinr = jnp.sin(f_re)
    # even lanes: x_re*cos - x_im*sin ; odd lanes: x_re*sin + x_im*cos
    rot = jnp.where(is_even, x * cosr - x_next * sinr, x_prev * sinr + x * cosr)
    out_ref[...] = scale * rot + 1e-8


def rotary_rotate(x_flat, f_flat, *, tile_r, vmem_limit):
    n, w = x_flat.shape
    spec = pl.BlockSpec((tile_r, w), lambda i: (i, 0))
    return pl.pallas_call(
        _rotary_kernel,
        out_shape=jax.ShapeDtypeStruct((n, w), jnp.float32),
        grid_spec=pltpu.PrefetchScalarGridSpec(
            num_scalar_prefetch=0,
            grid=(pl.cdiv(n, tile_r),),
            in_specs=[spec, spec],
            out_specs=spec,
        ),
        compiler_params=pltpu.CompilerParams(
            dimension_semantics=("parallel",),
            vmem_limit_bytes=vmem_limit),
    )(x_flat, f_flat)


# ---------------------------------------------------------------------------
# Tiling / VMEM helpers (generation-aware)
# ---------------------------------------------------------------------------
def _tpu_vmem_capacity():
    try:
        return int(pltpu.get_tpu_info().vmem_capacity_bytes)
    except Exception:
        return 64 << 20   # conservative (v7x-sized) default


def _pick_tile(extent, unit_bytes, target_bytes, granule, min_tiles=1):
    """Tile length along one blocked axis: a multiple of `granule` (the (8,128) layout
    granule for that axis) or the full `extent`.  Sized so one stream block stays under
    ~target_bytes; prefers exact divisors; if none exists the grid uses pl.cdiv and
    Pallas masks the ragged final block (no more 'best = spatial' fallback)."""
    if extent <= granule:
        return extent
    cap = max(granule, int(target_bytes // max(unit_bytes, 1)))
    if min_tiles > 1:
        cap = min(cap, max(granule, extent // min_tiles))   # guarantee >= min_tiles steps
    cap = min(cap, extent)
    cap -= cap % granule
    cap = max(cap, granule)
    for t in range(cap, granule - 1, -granule):
        if extent % t == 0:
            return t
    return cap


def _vmem_limit(stream_block_bytes, resident_bytes, vmem_cap):
    """vmem_limit_bytes from actual need (double-buffered streams + resident weights +
    headroom), with generation-aware ceilings: ~96 MiB on 128-MiB parts (v5e/v6e),
    ~40 MiB on v7x (64 MiB physical).  No artificial 32-MiB floor."""
    need = 2 * sum(stream_block_bytes) + resident_bytes + (2 << 20)
    ceiling = (96 << 20) if vmem_cap >= (100 << 20) else (40 << 20)
    return int(min(ceiling, max(2 * need, 16 << 20)))


# ---------------------------------------------------------------------------
# DARPE forward (glue + kernels)
# ---------------------------------------------------------------------------
@functools.partial(jax.jit, static_argnames=("dim", "max_freq"))
def darpe_forward(x, params, *, dim, max_freq=10000):
    B, C, F_dim, T_dim = x.shape
    assert C == dim and dim % 2 == 0
    half = dim // 2
    S = F_dim * T_dim

    vmem_cap = _tpu_vmem_capacity()
    target_bytes = (6 << 20) if vmem_cap >= (100 << 20) else (2 << 20)

    # ---- get_freqs (cheap trace-time setup; glue) ----
    dim_t = max_freq ** (-2.0 * jnp.arange(half, dtype=jnp.float32) / half)      # (half,)
    freqs_h = (jnp.arange(F_dim, dtype=jnp.float32)[:, None] / F_dim) * dim_t    # (F, half)
    freqs_t = (jnp.arange(T_dim, dtype=jnp.float32)[:, None] / T_dim) * dim_t    # (T, half)
    # interleave: channel 2k <- freqs_h, channel 2k+1 <- freqs_t
    freqs_ftc = jnp.stack(
        [jnp.broadcast_to(freqs_h[:, None, :], (F_dim, T_dim, half)),
         jnp.broadcast_to(freqs_t[None, :, :], (F_dim, T_dim, half))],
        axis=-1).reshape(F_dim, T_dim, dim)
    # channel-major (C, S), scaled by base_scale, NOT broadcast over batch in HBM.
    f_cm = (jnp.transpose(freqs_ftc, (2, 0, 1)).reshape(dim, S)
            * params["base_scale"].astype(jnp.float32))

    # ---- Kernel A: adapted = freqs * (1 + tanh(W2 gelu(W1 x + b1) + b2)), NCHW layout ----
    x_cm = x.reshape(B * C, S)                       # pure dim-merge of the NCHW tensor
    hid = params["w1"].shape[0]
    tile_s = _pick_tile(S, C * 4, target_bytes, granule=128,
                        min_tiles=2 if B == 1 else 1)
    blk_a = tile_s * C * 4
    resident_a = 2 * C * hid * 2 + 8 * (C + hid)     # bf16 weights + f32 biases
    vmem_a = _vmem_limit([blk_a, blk_a, blk_a], resident_a, vmem_cap)
    adapted_cm = adaptive_mlp_freqs(
        x_cm, f_cm,
        params["w1"].astype(jnp.bfloat16),           # (hid, C)
        params["b1"].astype(jnp.float32)[:, None],   # (hid, 1)
        params["w2"].astype(jnp.bfloat16),           # (C, hid)
        params["b2"].astype(jnp.float32)[:, None],   # (C, 1)
        batch=B, channels=C, spatial=S, tile_s=tile_s, vmem_limit=vmem_a)

    # ---- Kernel B inputs: element-matched flat streams (reproduces apply_rotary_emb
    # EXACTLY): x rows are the NHWC (pixel-major) flat order, freq rows are the raw
    # NCHW flat order (the original reshapes (B,C,F,T) directly to (-1, C)). ----
    n_flat = B * S * C
    width = 128 if (n_flat % 128 == 0) else C        # lane-dense whenever possible
    rows = n_flat // width
    x_flat = jnp.transpose(x, (0, 2, 3, 1)).reshape(rows, width)   # NHWC flat stream
    f_flat = adapted_cm.reshape(rows, width)                       # NCHW flat stream (no transpose)

    tile_r = _pick_tile(rows, width * 4, target_bytes, granule=8, min_tiles=2)
    blk_b = tile_r * width * 4
    vmem_b = _vmem_limit([blk_b, blk_b, blk_b], 0, vmem_cap)
    out_flat = rotary_rotate(x_flat, f_flat, tile_r=tile_r, vmem_limit=vmem_b)

    # back to NCHW (the one remaining XLA layout pass; see TODO at top of file)
    out = out_flat.reshape(B, F_dim, T_dim, C).transpose(0, 3, 1, 2)
    return out


# ---------------------------------------------------------------------------
# Demo
# ---------------------------------------------------------------------------
if __name__ == "__main__":
    B, DIM, F_DIM, T_DIM = 2, 32, 16, 16
    MLP_HIDDEN = 32

    key = jax.random.PRNGKey(0)
    k_x, k_w1, k_b1, k_w2, k_b2 = jax.random.split(key, 5)

    params = {
        "base_scale": jnp.float32(1.0),                                       # init_scale
        "w1": jax.random.normal(k_w1, (MLP_HIDDEN, DIM), jnp.float32) * 0.1,  # Conv2d(dim, hid, 1).weight[:, :, 0, 0]
        "b1": jax.random.normal(k_b1, (MLP_HIDDEN,), jnp.float32) * 0.1,
        "w2": jax.random.normal(k_w2, (DIM, MLP_HIDDEN), jnp.float32) * 0.1,  # Conv2d(hid, dim, 1).weight[:, :, 0, 0]
        "b2": jax.random.normal(k_b2, (DIM,), jnp.float32) * 0.1,
    }

    x = jax.random.normal(k_x, (B, DIM, F_DIM, T_DIM), jnp.float32)

    out = darpe_forward(x, params, dim=DIM)
    jax.block_until_ready(out)
    assert out.shape == (B, DIM, F_DIM, T_DIM) and out.dtype == jnp.float32
    print("KERNEL_OK")
</pallas_src>

<mosaic_0001>
module attributes {stable_mosaic.version = 11 : i64} {
  func.func @_adaptive_mlp_kernel(%arg0: i32, %arg1: i32, %arg2: memref<32x256xf32, #tpu.memory_space<vmem>>, %arg3: memref<32x256xf32, #tpu.memory_space<vmem>>, %arg4: memref<32x32xbf16, #tpu.memory_space<vmem>>, %arg5: memref<32x1xf32, #tpu.memory_space<vmem>>, %arg6: memref<32x32xbf16, #tpu.memory_space<vmem>>, %arg7: memref<32x1xf32, #tpu.memory_space<vmem>>, %arg8: memref<32x256xf32, #tpu.memory_space<vmem>>) attributes {dimension_semantics = [#tpu.dimension_semantics<parallel>, #tpu.dimension_semantics<parallel>], iteration_bounds = array<i64: 1, 2>, scalar_prefetch = 0 : i64, scratch_operands = 0 : i64, tpu.core_type = #tpu.core_type<tc>, window_params = [{transform_indices = @transform_0, window_bounds = array<i64: 32, 256>}, {transform_indices = @transform_1, window_bounds = array<i64: 32, 256>}, {pipeline_mode = #tpu.pipeline_mode<synchronous>, transform_indices = @transform_2, window_bounds = array<i64: 32, 32>}, {pipeline_mode = #tpu.pipeline_mode<synchronous>, transform_indices = @transform_3, window_bounds = array<i64: 32, 1>}, {pipeline_mode = #tpu.pipeline_mode<synchronous>, transform_indices = @transform_4, window_bounds = array<i64: 32, 32>}, {pipeline_mode = #tpu.pipeline_mode<synchronous>, transform_indices = @transform_5, window_bounds = array<i64: 32, 1>}, {transform_indices = @transform_6, window_bounds = array<i64: 32, 256>}]} {
    %c0 = arith.constant 0 : index
    %c0_0 = arith.constant 0 : index
    %0 = vector.load %arg2[%c0, %c0_0] : memref<32x256xf32, #tpu.memory_space<vmem>>, vector<32x256xf32>
    %1 = arith.truncf %0 : vector<32x256xf32> to vector<32x256xbf16>
    %c0_1 = arith.constant 0 : index
    %c0_2 = arith.constant 0 : index
    %2 = vector.load %arg4[%c0_1, %c0_2] : memref<32x32xbf16, #tpu.memory_space<vmem>>, vector<32x32xbf16>
    %cst = arith.constant dense<0.000000e+00> : vector<32x256xf32>
    %3 = tpu.matmul %2, %1, %cst {dimension_numbers = #tpu.dot_dimension_numbers<[1], [0], [0], [1], [0, 0, 1, 1], [], []>} : vector<32x32xbf16>, vector<32x256xbf16>, vector<32x256xf32> -> vector<32x256xf32>
    %c0_3 = arith.constant 0 : index
    %c0_4 = arith.constant 0 : index
    %4 = vector.load %arg5[%c0_3, %c0_4] : memref<32x1xf32, #tpu.memory_space<vmem>>, vector<32x1xf32>
    %5 = vector.broadcast %4 : vector<32x1xf32> to vector<32x256xf32>
    %6 = arith.addf %3, %5 : vector<32x256xf32>
    %cst_5 = arith.constant 5.000000e-01 : f32
    %7 = vector.broadcast %cst_5 : f32 to vector<32x256xf32>
    %8 = arith.mulf %7, %6 : vector<32x256xf32>
    %cst_6 = arith.constant 0.707106769 : f32
    %9 = vector.broadcast %cst_6 : f32 to vector<32x256xf32>
    %10 = arith.mulf %6, %9 : vector<32x256xf32>
    %cst_7 = arith.constant 0.000000e+00 : f32
    %11 = vector.broadcast %cst_7 : f32 to vector<32x256xf32>
    %12 = arith.cmpf olt, %10, %11 : vector<32x256xf32>
    %cst_8 = arith.constant -1.000000e+00 : f32
    %cst_9 = arith.constant 1.000000e+00 : f32
    %13 = vector.broadcast %cst_8 : f32 to vector<32x256xf32>
    %14 = vector.broadcast %cst_9 : f32 to vector<32x256xf32>
    %15 = arith.select %12, %13, %14 : vector<32x256xi1>, vector<32x256xf32>
    %16 = math.absf %10 : vector<32x256xf32>
    %cst_10 = arith.constant 0.327591091 : f32
    %17 = vector.broadcast %cst_10 : f32 to vector<32x256xf32>
    %18 = arith.mulf %17, %16 : vector<32x256xf32>
    %cst_11 = arith.constant 1.000000e+00 : f32
    %19 = vector.broadcast %cst_11 : f32 to vector<32x256xf32>
    %20 = arith.addf %19, %18 : vector<32x256xf32>
    %cst_12 = arith.constant 1.000000e+00 : f32
    %21 = vector.broadcast %cst_12 : f32 to vector<32x256xf32>
    %22 = arith.divf %21, %20 : vector<32x256xf32>
    %cst_13 = arith.constant 1.06140542 : f32
    %23 = vector.broadcast %cst_13 : f32 to vector<32x256xf32>
    %24 = arith.mulf %23, %22 : vector<32x256xf32>
    %cst_14 = arith.constant -1.45315206 : f32
    %25 = vector.broadcast %cst_14 : f32 to vector<32x256xf32>
    %26 = arith.addf %24, %25 : vector<32x256xf32>
    %27 = arith.mulf %26, %22 : vector<32x256xf32>
    %cst_15 = arith.constant 1.42141378 : f32
    %28 = vector.broadcast %cst_15 : f32 to vector<32x256xf32>
    %29 = arith.addf %27, %28 : vector<32x256xf32>
    %30 = arith.mulf %29, %22 : vector<32x256xf32>
    %cst_16 = arith.constant -0.284496725 : f32
    %31 = vector.broadcast %cst_16 : f32 to vector<32x256xf32>
    %32 = arith.addf %30, %31 : vector<32x256xf32>
    %33 = arith.mulf %32, %22 : vector<32x256xf32>
    %cst_17 = arith.constant 0.254829586 : f32
    %34 = vector.broadcast %cst_17 : f32 to vector<32x256xf32>
    %35 = arith.addf %33, %34 : vector<32x256xf32>
    %36 = arith.mulf %35, %22 : vector<32x256xf32>
    %cst_18 = arith.constant 0.000000e+00 : f32
    %37 = vector.broadcast %cst_18 : f32 to vector<32x256xf32>
    %38 = arith.subf %37, %16 : vector<32x256xf32>
    %39 = arith.mulf %38, %16 : vector<32x256xf32>
    %40 = math.exp %39 : vector<32x256xf32>
    %41 = arith.mulf %36, %40 : vector<32x256xf32>
    %cst_19 = arith.constant 1.000000e+00 : f32
    %42 = vector.broadcast %cst_19 : f32 to vector<32x256xf32>
    %43 = arith.subf %42, %41 : vector<32x256xf32>
    %44 = arith.mulf %15, %43 : vector<32x256xf32>
    %cst_20 = arith.constant 1.000000e+00 : f32
    %45 = vector.broadcast %cst_20 : f32 to vector<32x256xf32>
    %46 = arith.addf %45, %44 : vector<32x256xf32>
    %47 = arith.mulf %8, %46 : vector<32x256xf32>
    %c0_21 = arith.constant 0 : index
    %c0_22 = arith.constant 0 : index
    %48 = vector.load %arg6[%c0_21, %c0_22] : memref<32x32xbf16, #tpu.memory_space<vmem>>, vector<32x32xbf16>
    %49 = arith.truncf %47 : vector<32x256xf32> to vector<32x256xbf16>
    %cst_23 = arith.constant dense<0.000000e+00> : vector<32x256xf32>
    %50 = tpu.matmul %48, %49, %cst_23 {dimension_numbers = #tpu.dot_dimension_numbers<[1], [0], [0], [1], [0, 0, 1, 1], [], []>} : vector<32x32xbf16>, vector<32x256xbf16>, vector<32x256xf32> -> vector<32x256xf32>
    %c0_24 = arith.constant 0 : index
    %c0_25 = arith.constant 0 : index
    %51 = vector.load %arg7[%c0_24, %c0_25] : memref<32x1xf32, #tpu.memory_space<vmem>>, vector<32x1xf32>
    %52 = vector.broadcast %51 : vector<32x1xf32> to vector<32x256xf32>
    %53 = arith.addf %50, %52 : vector<32x256xf32>
    %54 = math.tanh %53 : vector<32x256xf32>
    %c0_26 = arith.constant 0 : index
    %c0_27 = arith.constant 0 : index
    %55 = vector.load %arg3[%c0_26, %c0_27] : memref<32x256xf32, #tpu.memory_space<vmem>>, vector<32x256xf32>
    %cst_28 = arith.constant 1.000000e+00 : f32
    %56 = vector.broadcast %cst_28 : f32 to vector<32x256xf32>
    %57 = arith.addf %56, %54 : vector<32x256xf32>
    %58 = arith.mulf %55, %57 : vector<32x256xf32>
    %c0_29 = arith.constant 0 : index
    %c0_30 = arith.constant 0 : index
    %59 = vector.load %arg8[%c0_29, %c0_30] : memref<32x256xf32, #tpu.memory_space<vmem>>, vector<32x256xf32>
    tpu.vector_store %arg8[%c0_29, %c0_30], %58 {strides = array<i32>} : memref<32x256xf32, #tpu.memory_space<vmem>>, vector<32x256xf32>,
    return
  }
  func.func @transform_0(%arg0: i32, %arg1: i32) -> (i32, i32) {
    %c0_i32 = arith.constant 0 : i32
    return %arg1, %arg0 : i32, i32
  }
  func.func @transform_1(%arg0: i32, %arg1: i32) -> (i32, i32) {
    %c0_i32 = arith.constant 0 : i32
    %c0_i32_0 = arith.constant 0 : i32
    return %c0_i32, %arg0 : i32, i32
  }
  func.func @transform_2(%arg0: i32, %arg1: i32) -> (i32, i32) {
    %c0_i32 = arith.constant 0 : i32
    %c0_i32_0 = arith.constant 0 : i32
    %c0_i32_1 = arith.constant 0 : i32
    return %c0_i32, %c0_i32_0 : i32, i32
  }
  func.func @transform_3(%arg0: i32, %arg1: i32) -> (i32, i32) {
    %c0_i32 = arith.constant 0 : i32
    %c0_i32_0 = arith.constant 0 : i32
    %c0_i32_1 = arith.constant 0 : i32
    return %c0_i32, %c0_i32_0 : i32, i32
  }
  func.func @transform_4(%arg0: i32, %arg1: i32) -> (i32, i32) {
    %c0_i32 = arith.constant 0 : i32
    %c0_i32_0 = arith.constant 0 : i32
    %c0_i32_1 = arith.constant 0 : i32
    return %c0_i32, %c0_i32_0 : i32, i32
  }
  func.func @transform_5(%arg0: i32, %arg1: i32) -> (i32, i32) {
    %c0_i32 = arith.constant 0 : i32
    %c0_i32_0 = arith.constant 0 : i32
    %c0_i32_1 = arith.constant 0 : i32
    return %c0_i32, %c0_i32_0 : i32, i32
  }
  func.func @transform_6(%arg0: i32, %arg1: i32) -> (i32, i32) {
    %c0_i32 = arith.constant 0 : i32
    return %arg1, %arg0 : i32, i32
  }
}

module attributes {stable_mosaic.version = 11 : i64} {
  func.func @_rotary_kernel(%arg0: i32, %arg1: memref<64x128xf32, #tpu.memory_space<vmem>>, %arg2: memref<64x128xf32, #tpu.memory_space<vmem>>, %arg3: memref<64x128xf32, #tpu.memory_space<vmem>>) attributes {dimension_semantics = [#tpu.dimension_semantics<parallel>], iteration_bounds = array<i64: 2>, scalar_prefetch = 0 : i64, scratch_operands = 0 : i64, tpu.core_type = #tpu.core_type<tc>, window_params = [{transform_indices = @transform_0, window_bounds = array<i64: 64, 128>}, {transform_indices = @transform_1, window_bounds = array<i64: 64, 128>}, {transform_indices = @transform_2, window_bounds = array<i64: 64, 128>}]} {
    %c0 = arith.constant 0 : index
    %c0_0 = arith.constant 0 : index
    %0 = vector.load %arg1[%c0, %c0_0] : memref<64x128xf32, #tpu.memory_space<vmem>>, vector<64x128xf32>
    %c0_1 = arith.constant 0 : index
    %c0_2 = arith.constant 0 : index
    %1 = vector.load %arg2[%c0_1, %c0_2] : memref<64x128xf32, #tpu.memory_space<vmem>>, vector<64x128xf32>
    %2 = tpu.iota {dimensions = array<i32: 1>} : vector<64x128xi32>
    %c1_i32 = arith.constant 1 : i32
    %3 = vector.broadcast %c1_i32 : i32 to vector<64x128xi32>
    %4 = arith.andi %2, %3 : vector<64x128xi32>
    %c0_i32 = arith.constant 0 : i32
    %5 = vector.broadcast %c0_i32 : i32 to vector<64x128xi32>
    %6 = arith.cmpi eq, %4, %5 : vector<64x128xi32>
    %c1_i32_3 = arith.constant 1 : i32
    %7 = tpu.dynamic_rotate %1 by %c1_i32_3 dim 1 : vector<64x128xf32>, i32 -> vector<64x128xf32>
    %c127_i32 = arith.constant 127 : i32
    %8 = tpu.dynamic_rotate %1 by %c127_i32 dim 1 : vector<64x128xf32>, i32 -> vector<64x128xf32>
    %c1_i32_4 = arith.constant 1 : i32
    %9 = tpu.dynamic_rotate %0 by %c1_i32_4 dim 1 : vector<64x128xf32>, i32 -> vector<64x128xf32>
    %c127_i32_5 = arith.constant 127 : i32
    %10 = tpu.dynamic_rotate %0 by %c127_i32_5 dim 1 : vector<64x128xf32>, i32 -> vector<64x128xf32>
    %11 = arith.select %6, %1, %7 : vector<64x128xi1>, vector<64x128xf32>
    %12 = arith.select %6, %8, %1 : vector<64x128xi1>, vector<64x128xf32>
    %cst = arith.constant 0.000000e+00 : f32
    %13 = vector.broadcast %cst : f32 to vector<64x128xf32>
    %14 = arith.subf %13, %12 : vector<64x128xf32>
    %15 = math.exp %14 : vector<64x128xf32>
    %16 = math.cos %11 : vector<64x128xf32>
    %17 = math.sin %11 : vector<64x128xf32>
    %18 = arith.mulf %0, %16 : vector<64x128xf32>
    %19 = arith.mulf %10, %17 : vector<64x128xf32>
    %20 = arith.subf %18, %19 : vector<64x128xf32>
    %21 = arith.mulf %9, %17 : vector<64x128xf32>
    %22 = arith.mulf %0, %16 : vector<64x128xf32>
    %23 = arith.addf %21, %22 : vector<64x128xf32>
    %24 = arith.select %6, %20, %23 : vector<64x128xi1>, vector<64x128xf32>
    %25 = arith.mulf %15, %24 : vector<64x128xf32>
    %cst_6 = arith.constant 9.99999993E-9 : f32
    %26 = vector.broadcast %cst_6 : f32 to vector<64x128xf32>
    %27 = arith.addf %25, %26 : vector<64x128xf32>
    %c0_7 = arith.constant 0 : index
    %c0_8 = arith.constant 0 : index
    %28 = vector.load %arg3[%c0_7, %c0_8] : memref<64x128xf32, #tpu.memory_space<vmem>>, vector<64x128xf32>
    tpu.vector_store %arg3[%c0_7, %c0_8], %27 {strides = array<i32>} : memref<64x128xf32, #tpu.memory_space<vmem>>, vector<64x128xf32>,
    return
  }
  func.func @transform_0(%arg0: i32) -> (i32, i32) {
    %c0_i32 = arith.constant 0 : i32
    %c0_i32_0 = arith.constant 0 : i32
    return %arg0, %c0_i32 : i32, i32
  }
  func.func @transform_1(%arg0: i32) -> (i32, i32) {
    %c0_i32 = arith.constant 0 : i32
    %c0_i32_0 = arith.constant 0 : i32
    return %arg0, %c0_i32 : i32, i32
  }
  func.func @transform_2(%arg0: i32) -> (i32, i32) {
    %c0_i32 = arith.constant 0 : i32
    %c0_i32_0 = arith.constant 0 : i32
    return %arg0, %c0_i32 : i32, i32
  }
}

</mosaic_0001>

<bundles_post_ra>
// kernel: darpe_forward.3
= control target key start
LH: loop header
LB: loop body
LE: loop exit
PB: predicated region body
PF: predicated region fallthrough
CT: control target
= control target key end

     0   :  { %s3049_s9 = smov 0   ;;  %s4297_s0 = inlined_call_operand.vmem [shape: f32[128,128], index: 0, kind: input, shape index: {}]   ;;  %s4298_s1 = inlined_call_operand.vmem [shape: f32[128,128], index: 1, kind: input, shape index: {}]   ;;  %s4299_s2 = inlined_call_operand.vmem [shape: f32[128,128], index: 2, kind: output, shape index: {}]  }
   0x1 LB: > { %s2905_s10 = sadd.s32 4294967295, %s3023_s9   ;;  %p2909_p0 = scmp.ge.s32.totalorder %s3023_s9, 1  ;;  %s3023_s9 = sphi %s3049_s9, %s12_s9  }
   0x2   : > { %p124_p1 = scmp.lt.s32.totalorder %s3023_s9, 3 }
   0x4   : > { %p125_p2 = pnand %p2909_p0, %p124_p1 }
   0x6   : > { %128 = sbr.rel (%p125_p2) target bundleno = 467 (0x1d3), region = 28 }
   0xb   : > { %s2910_s11 = sshll.u32 %s2905_s10, 3  ;;  %s3025_s16 = smov 1   ;;  %v185_v16 = vlaneseq  ;;  %v4312_v39 = vmov 683565275   ;;  %v4310_v41 = vmov 2475754826  }
   0xc   : > { %p152_p3 = scmp.lt.s32.totalorder %s2910_s11, 15  ;;  %s3026_s17 = smov 127   ;;  %v4308_v43 = vmov 2131351028   ;;  %v4306_v45 = vmov 2102212464  }
   0xd   : > { %v186_v17 = vand.u32 127, %v185_v16  ;;  %v4304_v47 = vmov 920167782   ;;  %v4302_v57 = vmov 1326507024  }
   0xe   : > { %s4385_s11 = smov (!%p152_p3, %s2910_s11), 15 }
   0xf   : > { %s3057_s12 = sshll.u32 %s4385_s11, 3  ;;  %v187_v18 = vand.u32 1, %v186_v17 }
  0x10   : > { %s3063_s15 = scalar_lea.vmem %s4298_s1, %s3057_s12  ;;  %s3104_s20 = scalar_lea.vmem %s4297_s0, %s3057_s12 }
  0x11   : > { %v181_v0 = vld [vmem:[%s3063_s15 + $0x20] sm:$0xff]  ;;  %v3067_v1 = vld [vmem:[%s3063_s15 + $0x10] sm:$0xff]  ;;  %v182_v3 = vld [vmem:[%s3063_s15 + $0x28] sm:$0xff]  ;;  %vm3131_vm0 = vcmp.eq.s32.totalorder %v187_v18, 0  ;;  %s4194_s23 = scalar_lea.vmem %s4299_s2, %s3057_s12 }
  0x12   : > { %v3070_v2 = vld [vmem:[%s3063_s15] sm:$0xff]  ;;  %197 = vrot.lane.b32.xlu2 %v181_v0, %s3025_s16  ;;  %193 = vrot.lane.b32.xlu1 %v3067_v1, %s3025_s16  ;;  %v3079_v4 = vld [vmem:[%s3063_s15 + $0x18] sm:$0xff] }
  0x13   : > { %189 = vrot.lane.b32.xlu0 %v3070_v2, %s3025_s16  ;;  %v178_v5 = vld [vmem:[%s3063_s15 + $0x8] sm:$0xff]  ;;  %v184_v6 = vld [vmem:[%s3063_s15 + $0x38] sm:$0xff]  ;;  %v183_v7 = vld [vmem:[%s3063_s15 + $0x30] sm:$0xff] }
  0x14   : > { %v169_v8 = vld [vmem:[%s3104_s20] sm:$0xff]  ;;  %v170_v9 = vld [vmem:[%s3104_s20 + $0x8] sm:$0xff]  ;;  %v172_v10 = vld [vmem:[%s3104_s20 + $0x18] sm:$0xff] }
  0x15   : > { %v171_v11 = vld [vmem:[%s3104_s20 + $0x10] sm:$0xff]  ;;  %v173_v12 = vld [vmem:[%s3104_s20 + $0x20] sm:$0xff]  ;;  %v176_v14 = vld [vmem:[%s3104_s20 + $0x38] sm:$0xff] }
  0x16   : > { %v175_v13 = vld [vmem:[%s3104_s20 + $0x30] sm:$0xff]  ;;  %v174_v15 = vld [vmem:[%s3104_s20 + $0x28] sm:$0xff] }
  0x1a   : > { %199 = vrot.lane.b32.xlu2 %v182_v3, %s3025_s16  ;;  %195 = vrot.lane.b32.xlu1 %v3079_v4, %s3025_s16 }
  0x1b   : > { %191 = vrot.lane.b32.xlu0 %v178_v5, %s3025_s16 }
  0x22   : > { %203 = vrot.lane.b32.xlu1 %v184_v6, %s3025_s16  ;;  %205 = vrot.lane.b32.xlu2 %v3070_v2, %s3026_s17 }
  0x23   : > { %201 = vrot.lane.b32.xlu0 %v183_v7, %s3025_s16 }
  0x2a   : > { %209 = vrot.lane.b32.xlu1 %v3067_v1, %s3026_s17  ;;  %211 = vrot.lane.b32.xlu2 %v3079_v4, %s3026_s17 }
  0x2b   : > { %207 = vrot.lane.b32.xlu0 %v178_v5, %s3026_s17 }
  0x32   : > { %215 = vrot.lane.b32.xlu1 %v182_v3, %s3026_s17  ;;  %217 = vrot.lane.b32.xlu2 %v183_v7, %s3026_s17 }
  0x33   : > { %213 = vrot.lane.b32.xlu0 %v181_v0, %s3026_s17 }
  0x3a   : > { %221 = vrot.lane.b32.xlu1 %v169_v8, %s3025_s16  ;;  %223 = vrot.lane.b32.xlu2 %v170_v9, %s3025_s16 }
  0x3b   : > { %219 = vrot.lane.b32.xlu0 %v184_v6, %s3026_s17 }
  0x42   : > { %227 = vrot.lane.b32.xlu1 %v172_v10, %s3025_s16  ;;  %229 = vrot.lane.b32.xlu2 %v173_v12, %s3025_s16 }
  0x43   : > { %225 = vrot.lane.b32.xlu0 %v171_v11, %s3025_s16 }
  0x4a   : > { %233 = vrot.lane.b32.xlu1 %v175_v13, %s3025_s16  ;;  %235 = vrot.lane.b32.xlu2 %v176_v14, %s3025_s16 }
  0x4b   : > { %231 = vrot.lane.b32.xlu0 %v174_v15, %s3025_s16 }
  0x52   : > { %239 = vrot.lane.b32.xlu1 %v170_v9, %s3026_s17  ;;  %241 = vrot.lane.b32.xlu2 %v171_v11, %s3026_s17 }
  0x53   : > { %237 = vrot.lane.b32.xlu0 %v169_v8, %s3026_s17 }
  0x5a   : > { %245 = vrot.lane.b32.xlu1 %v173_v12, %s3026_s17  ;;  %247 = vrot.lane.b32.xlu2 %v174_v15, %s3026_s17 }
  0x5b   : > { %243 = vrot.lane.b32.xlu0 %v172_v10, %s3026_s17 }
  0x62   : > { %251 = vrot.lane.b32.xlu1 %v176_v14, %s3026_s17 }
  0x63   : > { %249 = vrot.lane.b32.xlu0 %v175_v13, %s3026_s17 }
  0x6c   : > { %v198_v20 = vpop.permute.xlu2 %197 }
  0x6d   : > { %v3137_v21 = vsel %vm3131_vm0, %v181_v0, %v198_v20 }
  0x6e   : > { %v909_v22 = vand.u32 2147483647, %v3137_v21  ;;  %v912_v23 = vand.u32 2139095040, %v3137_v21 }
  0x70   : > { %v913_v24 = vshrl.u32 %v912_v23, 23  ;;  %v916_v25 = vand.u32 8388607, %v909_v22 }
  0x72   : > { %v2928_v26 = vadd.s32 4294967169, %v913_v24  ;;  %v917_v27 = vor.u32 8388608, %v916_v25 }
  0x74   : > { %v919_v28 = vadd.s32 1, %v2928_v26  ;;  %v200_v29 = vpop.permute.xlu2 %199  ;;  %v3143_v30 = vshll.u32 %v917_v27, 8 }
  0x75   : > { %v3147_v31 = vsel %vm3131_vm0, %v182_v3, %v200_v29 }
  0x76   : > { %4331 = vst [vmem:[#allocation2_spill] sm:$0xff] %v3147_v31  ;;  %vm920_vm1 = vcmp.gt.s32.totalorder %v919_v28, 0  ;;  %v1066_v33 = vand.u32 2139095040, %v3147_v31  ;;  %v1063_v35 = vand.u32 2147483647, %v3147_v31  ;;  %v958_v37 = vand.u32 65535, %v3143_v30 }
  0x77   : > { %v921_v32 = vsel %vm920_vm1, %v919_v28, 0  ;;  %v959_v49 = vshrl.u32 %v3143_v30, 16 }
  0x78   : > { %v923_v34 = vand.u32 31, %v921_v32  ;;  %v922_v36 = vshrl.u32 %v921_v32, 5  ;;  %v1067_v50 = vshrl.u32 %v1066_v33, 23  ;;  %v1070_v54 = vand.u32 8388607, %v1063_v35 }
  0x7a   : > { %v924_v38 = vsub.s32 32, %v923_v34  ;;  %v926_v40 = vshll.u32 %v4312_v39, %v923_v34  ;;  %v929_v42 = vshll.u32 %v4310_v41, %v923_v34  ;;  %v932_v44 = vshll.u32 %v4308_v43, %v923_v34 }
  0x7b   : > { %v935_v46 = vshll.u32 %v4306_v45, %v923_v34  ;;  %v938_v48 = vshll.u32 %v4304_v47, %v923_v34  ;;  %vm941_vm2 = vcmp.lt.s32.totalorder %v922_v36, 1  ;;  %vm944_vm3 = vcmp.lt.s32.totalorder %v922_v36, 4 }
  0x7c   : > { %v927_v51 = vshrl.u32 %v4310_v41, %v924_v38  ;;  %v930_v52 = vshrl.u32 %v4308_v43, %v924_v38  ;;  %v933_v53 = vshrl.u32 %v4306_v45, %v924_v38  ;;  %v925_v55 = vshrl.u32 %v4312_v39, %v924_v38 }
  0x7d   : > { %v936_v56 = vshrl.u32 %v4304_v47, %v924_v38  ;;  %v939_v58 = vshrl.u32 %v4302_v57, %v924_v38  ;;  %vm943_vm4 = vcmp.lt.s32.totalorder %v922_v36, 3  ;;  %v2931_v0 = vadd.s32 4294967169, %v1067_v50 }
  0x7e   : > { %v928_v59 = vor.u32 %v927_v51, %v926_v40  ;;  %v931_v60 = vor.u32 %v930_v52, %v929_v42  ;;  %v934_v61 = vor.u32 %v933_v53, %v932_v44  ;;  %vm942_vm5 = vcmp.lt.s32.totalorder %v922_v36, 2 }
  0x7f   : > { %v937_v62 = vor.u32 %v936_v56, %v935_v46  ;;  %v940_v63 = vor.u32 %v939_v58, %v938_v48  ;;  %v1071_v9 = vor.u32 8388608, %v1070_v54  ;;  %v1073_v10 = vadd.s32 1, %v2931_v0 }
  0x80   : > { %v946_v3 = vsel %vm944_vm3, %v934_v61, 2102212464  ;;  %v949_v5 = vsel %vm941_vm2, %v928_v59, %v931_v60  ;;  %v953_v6 = vsel %vm941_vm2, %v931_v60, %v934_v61  ;;  %v945_v11 = vsel %vm941_vm2, %v925_v55, %v928_v59 }
  0x81   : > { %v950_v7 = vsel %vm944_vm3, %v937_v62, 920167782  ;;  %v954_v8 = vsel %vm944_vm3, %v940_v63, 1326507024  ;;  %v947_v12 = vsel %vm943_vm4, %v931_v60, %v946_v3  ;;  %vm1074_vm6 = vcmp.gt.s32.totalorder %v1073_v10, 0 }
  0x82   : > { %v951_v13 = vsel %vm943_vm4, %v934_v61, %v950_v7  ;;  %v955_v14 = vsel %vm943_vm4, %v937_v62, %v954_v8  ;;  %v3172_v24 = vsel %vm942_vm5, %v945_v11, %v947_v12  ;;  %v3174_v28 = vshll.u32 %v1071_v9, 8 }
  0x83   : > { %v952_v15 = vsel %vm942_vm5, %v949_v5, %v951_v13  ;;  %v956_v16 = vsel %vm942_vm5, %v953_v6, %v955_v14  ;;  %v1075_v34 = vsel %vm1074_vm6, %v1073_v10, 0  ;;  %v4314_v54 = vmov 0  }
  0x84   : > { %v960_v17 = vand.u32 65535, %v956_v16  ;;  %v961_v18 = vshrl.u32 %v956_v16, 16  ;;  %v982_v20 = vand.u32 65535, %v952_v15  ;;  %v983_v23 = vshrl.u32 %v952_v15, 16 }
  0x85   : > { %v1077_v53 = vand.u32 31, %v1075_v34  ;;  %v3179_v62 = vshrl.u32 %v1075_v34, 5 }
  0x86   : > { %v962_v25 = vmul.u32 %v960_v17, %v958_v37  ;;  %v963_v26 = vmul.u32 %v961_v18, %v958_v37  ;;  %v964_v27 = vmul.u32 %v960_v17, %v959_v49  ;;  %v984_v29 = vmul.u32 %v982_v20, %v958_v37 }
  0x87   : > { %v985_v32 = vmul.u32 %v983_v23, %v958_v37  ;;  %v986_v33 = vmul.u32 %v982_v20, %v959_v49  ;;  %v965_v38 = vmul.u32 %v961_v18, %v959_v49  ;;  %v987_v44 = vmul.u32 %v983_v23, %v959_v49 }
  0x88   : > { %v966_v40 = vshll.u32 %v963_v26, 16  ;;  %v968_v42 = vshll.u32 %v964_v27, 16  ;;  %v967_v46 = vshrl.u32 %v963_v26, 16  ;;  %v969_v48 = vshrl.u32 %v964_v27, 16 }
  0x89   : > { %v988_v50 = vshll.u32 %v985_v32, 16  ;;  %v990_v51 = vshll.u32 %v986_v33, 16  ;;  %v989_v52 = vshrl.u32 %v985_v32, 16  ;;  %v991_v56 = vshrl.u32 %v986_v33, 16 }
  0x8a   : > { %vm970_vm7 = vc.u32 %v962_v25, %v966_v40  ;;  %v972_v36 = vadd.s32 %v966_v40, %v962_v25  ;;  %v1078_v60 = vsub.s32 32, %v1077_v53  ;;  %v1080_v5 = vshll.u32 %v4312_v39, %v1077_v53 }
  0x8b   : > { %v971_v55 = vsel %vm970_vm7, 1, %v4314_v54  ;;  %vm992_vm8 = vc.u32 %v984_v29, %v988_v50  ;;  %v994_v37 = vadd.s32 %v988_v50, %v984_v29  ;;  %v1083_v8 = vshll.u32 %v4310_v41, %v1077_v53 }
  0x8c   : > { %v973_v58 = vadd.s32 %v971_v55, %v965_v38  ;;  %vm974_vm9 = vc.u32 %v972_v36, %v968_v42  ;;  %v993_v59 = vsel %vm992_vm8, 1, %v4314_v54  ;;  %v1081_v7 = vshrl.u32 %v4310_v41, %v1078_v60  ;;  %v194_v38 = vpop.permute.xlu1 %193 }
  0x8d   : > { %v975_v49 = vsel %vm974_vm9, 1, %v4314_v54  ;;  %v995_v61 = vadd.s32 %v993_v59, %v987_v44  ;;  %vm996_vm10 = vc.u32 %v994_v37, %v990_v51  ;;  %v3182_v3 = vadd.s32 %v994_v37, %v990_v51 }
  0x8e   : > { %v977_v63 = vadd.s32 %v975_v49, %v973_v58  ;;  %v997_v0 = vsel %vm996_vm10, 1, %v4314_v54  ;;  %v1084_v9 = vshrl.u32 %v4308_v43, %v1078_v60  ;;  %v1086_v11 = vshll.u32 %v4308_v43, %v1077_v53 }
  0x8f   : > { %v999_v6 = vadd.s32 %v997_v0, %v995_v61  ;;  %v1087_v12 = vshrl.u32 %v4306_v45, %v1078_v60  ;;  %v1089_v13 = vshll.u32 %v4306_v45, %v1077_v53  ;;  %v1082_v15 = vor.u32 %v1081_v7, %v1080_v5 }
  0x90   : > { %v978_v10 = vadd.s32 %v977_v63, %v967_v46  ;;  %v3191_v16 = vor.u32 %v1084_v9, %v1083_v8  ;;  %v1090_v17 = vshrl.u32 %v4304_v47, %v1078_v60  ;;  %v1092_v23 = vshll.u32 %v4304_v47, %v1077_v53 }
  0x91   : > { %v1000_v14 = vadd.s32 %v999_v6, %v989_v52  ;;  %v1088_v20 = vor.u32 %v1087_v12, %v1086_v11  ;;  %v1093_v25 = vshrl.u32 %v4302_v57, %v1078_v60  ;;  %vm1095_vm11 = vcmp.lt.s32.totalorder %v3179_v62, 1 }
  0x92   : > { %v3194_v18 = vadd.s32 %v978_v10, %v969_v48  ;;  %v1091_v27 = vor.u32 %v1090_v17, %v1089_v13  ;;  %v1002_v29 = vmul.u32 %v3143_v30, %v3172_v24  ;;  %vm1097_vm13 = vcmp.lt.s32.totalorder %v3179_v62, 3 }
  0x93   : > { %v1001_v26 = vadd.s32 %v1000_v14, %v991_v56  ;;  %v1094_v32 = vor.u32 %v1093_v25, %v1092_v23  ;;  %vm1096_vm14 = vcmp.lt.s32.totalorder %v3179_v62, 2  ;;  %vm1098_vm15 = vcmp.lt.s32.totalorder %v3179_v62, 4 }
  0x94   : > { %vm1004_vm12 = vc.u32 %v3194_v18, %v3182_v3  ;;  %v1103_v34 = vsel %vm1095_vm11, %v1082_v15, %v3191_v16  ;;  %v1104_v40 = vsel %vm1098_vm15, %v1091_v27, 920167782  ;;  %v1107_v30 = vsel %vm1095_vm11, %v3191_v16, %v1088_v20 }
  0x95   : > { %v1005_v33 = vadd.s32 1, %v1001_v26  ;;  %v1108_v24 = vsel %vm1098_vm15, %v1094_v32, 1326507024  ;;  %v1112_v42 = vand.u32 65535, %v3174_v28  ;;  %v1105_v46 = vsel %vm1097_vm13, %v1088_v20, %v1104_v40 }
  0x96   : > { %v1109_v48 = vsel %vm1097_vm13, %v1091_v27, %v1108_v24  ;;  %v1113_v50 = vshrl.u32 %v3174_v28, 16  ;;  %v1106_v36 = vsel %vm1096_vm14, %v1103_v34, %v1105_v46  ;;  %v3229_v53 = vsel %vm3131_vm0, %v3067_v1, %v194_v38 }
  0x97   : > { %v1006_v44 = vsel %vm1004_vm12, %v1005_v33, %v1001_v26  ;;  %v1110_v52 = vsel %vm1096_vm14, %v1107_v30, %v1109_v48  ;;  %4332 = vst [vmem:[#allocation3_spill] sm:$0xff] %v3229_v53  ;;  %v1136_v37 = vand.u32 65535, %v1106_v36  ;;  %v1137_v58 = vshrl.u32 %v1106_v36, 16 }
  0x98   : > { %v1007_v51 = vadd.s32 %v1006_v44, %v1002_v29  ;;  %v1114_v55 = vand.u32 65535, %v1110_v52  ;;  %v1115_v56 = vshrl.u32 %v1110_v52, 16  ;;  %v1079_v49 = vshrl.u32 %v4312_v39, %v1078_v60 }
  0x99   : > { %v1139_v6 = vmul.u32 %v1137_v58, %v1112_v42  ;;  %v1140_v7 = vmul.u32 %v1136_v37, %v1113_v50  ;;  %v601_v8 = vand.u32 2147483647, %v3229_v53  ;;  %v1138_v11 = vmul.u32 %v1136_v37, %v1112_v42 }
  0x9a   : > { %v1008_v59 = vadd.s32 536870912, %v1007_v51  ;;  %v1116_v61 = vmul.u32 %v1114_v55, %v1112_v42  ;;  %v1117_v63 = vmul.u32 %v1115_v56, %v1112_v42  ;;  %v1118_v0 = vmul.u32 %v1114_v55, %v1113_v50 }
  0x9b   : > { %v1119_v9 = vmul.u32 %v1115_v56, %v1113_v50  ;;  %v1099_v13 = vsel %vm1095_vm11, %v1079_v49, %v1082_v15  ;;  %v1100_v60 = vsel %vm1098_vm15, %v1088_v20, 2102212464  ;;  %v1142_v14 = vshll.u32 %v1139_v6, 16 }
  0x9c   : > { %v3232_v5 = vshrl.u32 %v1008_v59, 30  ;;  %v1120_v10 = vshll.u32 %v1117_v63, 16  ;;  %v1122_v1 = vshll.u32 %v1118_v0, 16  ;;  %v1141_v23 = vmul.u32 %v1137_v58, %v1113_v50 }
  0x9d   : > { %v1144_v25 = vshll.u32 %v1140_v7, 16  ;;  %v1121_v27 = vshrl.u32 %v1117_v63, 16  ;;  %v1123_v29 = vshrl.u32 %v1118_v0, 16  ;;  %vm1146_vm3 = vc.u32 %v1138_v11, %v1142_v14 }
  0x9e   : > { %v1010_v12 = vshll.u32 %v3232_v5, 30  ;;  %vm1124_vm1 = vc.u32 %v1116_v61, %v1120_v10  ;;  %v1126_v17 = vadd.s32 %v1120_v10, %v1116_v61  ;;  %v1148_v34 = vadd.s32 %v1142_v14, %v1138_v11 }
  0x9f   : > { %v1125_v32 = vsel %vm1124_vm1, 1, %v4314_v54  ;;  %v1147_v20 = vsel %vm1146_vm3, 1, %v4314_v54  ;;  %v1143_v30 = vshrl.u32 %v1139_v6, 16  ;;  %v1101_v44 = vsel %vm1097_vm13, %v3191_v16, %v1100_v60 }
  0xa0   : > { %v1011_v26 = vsub.s32 %v1007_v51, %v1010_v12  ;;  %v1127_v33 = vadd.s32 %v1125_v32, %v1119_v9  ;;  %vm1128_vm2 = vc.u32 %v1126_v17, %v1122_v1  ;;  %v1149_v24 = vadd.s32 %v1147_v20, %v1141_v23  ;;  %v190_v17 = vpop.permute.xlu0 %189 }
  0xa1   : > { %v1129_v15 = vsel %vm1128_vm2, 1, %v4314_v54  ;;  %vm1150_vm5 = vc.u32 %v1148_v34, %v1144_v25  ;;  %v604_v48 = vand.u32 2139095040, %v3229_v53  ;;  %v1145_v36 = vshrl.u32 %v1140_v7, 16 }
  0xa2   : > { %vm1012_vm4 = vcmp.lt.s32.totalorder %v1011_v26, 0  ;;  %v1013_v38 = vsub.s32 0, %v1011_v26  ;;  %v1131_v40 = vadd.s32 %v1129_v15, %v1127_v33  ;;  %v1151_v46 = vsel %vm1150_vm5, 1, %v4314_v54 }
  0xa3   : > { %v1153_v52 = vadd.s32 %v1151_v46, %v1149_v24  ;;  %v3248_v55 = vadd.s32 %v1148_v34, %v1144_v25  ;;  %v605_v56 = vshrl.u32 %v604_v48, 23  ;;  %v1102_v58 = vsel %vm1096_vm14, %v1099_v13, %v1101_v44 }
  0xa4   : > { %v1014_v42 = vsel %vm1012_vm4, %v1013_v38, %v1011_v26  ;;  %v1132_v51 = vadd.s32 %v1131_v40, %v1121_v27  ;;  %v608_v16 = vand.u32 8388607, %v601_v8  ;;  %v1156_v6 = vmul.u32 %v3174_v28, %v1102_v58 }
  0xa5   : > { %v1015_v50 = vclz %v1014_v42  ;;  %v1154_v49 = vadd.s32 %v1153_v52, %v1143_v30  ;;  %v2922_v61 = vadd.s32 4294967169, %v605_v56  ;;  %v1003_v62 = vadd.s32 %v3182_v3, %v3194_v18 }
  0xa6   : > { %v3252_v59 = vadd.s32 %v1132_v51, %v1123_v29  ;;  %v609_v11 = vor.u32 8388608, %v608_v16  ;;  %v3264_v3 = vsel %vm3131_vm0, %v3070_v2, %v190_v17  ;;  %vm911_vm9 = vcmp.lt.s32.totalorder %v3137_v21, 0 }
  0xa7   : > { %v2929_v37 = vadd.s32 4294967294, %v1015_v50  ;;  %v1155_v63 = vadd.s32 %v1154_v49, %v1145_v36  ;;  %v611_v7 = vadd.s32 1, %v2922_v61  ;;  %v296_v51 = vand.u32 2139095040, %v3264_v3 }
  0xa8   : > { %vm1158_vm7 = vc.u32 %v3252_v59, %v3248_v55  ;;  %v3269_v15 = vshll.u32 %v609_v11, 8  ;;  %vm3313_vm1 = vcmp.le.f32.partialorder %v909_v22, 0.7853982  ;;  %vm1065_vm4 = vcmp.lt.s32.totalorder %v3147_v31, 0 }
  0xa9   : > { %vm2930_vm6 = vcmp.lt.s32.totalorder %v2929_v37, 0  ;;  %v1159_v1 = vadd.s32 1, %v1155_v63  ;;  %vm612_vm8 = vcmp.gt.s32.totalorder %v611_v7, 0 }
  0xaa   : > { %v1018_v0 = vsel %vm2930_vm6, 0, %v2929_v37  ;;  %v613_v14 = vsel %vm612_vm8, %v611_v7, 0  ;;  %v651_v17 = vshrl.u32 %v3269_v15, 16  ;;  %vm3343_vm8 = vcmp.le.f32.partialorder %v1063_v35, 0.7853982 }
  0xab   : > { %v1019_v9 = vsub.s32 32, %v1018_v0  ;;  %v1023_v10 = vsub.s32 4294967266, %v1018_v0  ;;  %v1160_v60 = vsel %vm1158_vm7, %v1159_v1, %v1155_v63  ;;  %v1020_v23 = vshll.u32 %v1011_v26, %v1018_v0 }
  0xac   : > { %v1161_v25 = vadd.s32 %v1160_v60, %v1156_v6  ;;  %v615_v28 = vand.u32 31, %v613_v14  ;;  %v3266_v34 = vshrl.u32 %v613_v14, 5  ;;  %v650_v63 = vand.u32 65535, %v3269_v15 }
  0xad   : > { %v1021_v12 = vshrl.u32 %v1003_v62, %v1019_v9  ;;  %v1024_v13 = vadd.s32 127, %v1023_v10  ;;  %v293_v0 = vand.u32 2147483647, %v3264_v3  ;;  %v297_v10 = vshrl.u32 %v296_v51, 23 }
  0xae   : > { %v1162_v32 = vadd.s32 536870912, %v1161_v25  ;;  %v616_v33 = vsub.s32 32, %v615_v28  ;;  %v618_v38 = vshll.u32 %v4312_v39, %v615_v28  ;;  %v621_v40 = vshll.u32 %v4310_v41, %v615_v28 }
  0xaf   : > { %v1025_v27 = vshll.u32 %v1024_v13, 23  ;;  %v1022_v29 = vor.u32 %v1021_v12, %v1020_v23  ;;  %v627_v2 = vshll.u32 %v4306_v45, %v615_v28  ;;  %v624_v50 = vshll.u32 %v4308_v43, %v615_v28 }
  0xb0   : > { %v3271_v20 = vshrl.u32 %v1162_v32, 30  ;;  %v619_v26 = vshrl.u32 %v4310_v41, %v616_v33  ;;  %v622_v30 = vshrl.u32 %v4308_v43, %v616_v33  ;;  %v625_v42 = vshrl.u32 %v4306_v45, %v616_v33 }
  0xb1   : > { %v1026_v18 = vor.u32 4788187, %v1025_v27  ;;  %v628_v44 = vshrl.u32 %v4304_v47, %v616_v33  ;;  %v1029_v46 = vcvt.s32.f32 %v1022_v29  ;;  %v631_v37 = vshrl.u32 %v4302_v57, %v616_v33 }
  0xb2   : > { %v1164_v48 = vshll.u32 %v3271_v20, 30  ;;  %v620_v36 = vor.u32 %v619_v26, %v618_v38  ;;  %v623_v52 = vor.u32 %v622_v30, %v621_v40  ;;  %v626_v61 = vor.u32 %v625_v42, %v624_v50 }
  0xb3   : > { %v1027_v24 = vand.u32 2147483647, %v1026_v18  ;;  %v629_v56 = vor.u32 %v628_v44, %v627_v2  ;;  %v630_v16 = vshll.u32 %v4304_v47, %v615_v28  ;;  %vm633_vm10 = vcmp.lt.s32.totalorder %v3266_v34, 1 }
  0xb4   : > { %v1165_v49 = vsub.s32 %v1161_v25, %v1164_v48  ;;  %vm636_vm12 = vcmp.lt.s32.totalorder %v3266_v34, 4  ;;  %vm635_vm13 = vcmp.lt.s32.totalorder %v3266_v34, 3  ;;  %v641_v62 = vsel %vm633_vm10, %v620_v36, %v623_v52 }
  0xb5   : > { %v1030_v58 = vmul.f32 %v1029_v46, %v1027_v24  ;;  %v632_v7 = vor.u32 %v631_v37, %v630_v16  ;;  %v642_v9 = vsel %vm636_vm12, %v629_v56, 920167782  ;;  %vm634_vm14 = vcmp.lt.s32.totalorder %v3266_v34, 2 }
  0xb6   : > { %vm1166_vm11 = vcmp.lt.s32.totalorder %v1165_v49, 0  ;;  %v1167_v6 = vsub.s32 0, %v1165_v49  ;;  %v643_v12 = vsel %vm635_vm13, %v626_v61, %v642_v9  ;;  %v645_v14 = vsel %vm633_vm10, %v623_v52, %v626_v61 }
  0xb7   : > { %v1031_v1 = vxor.u32 2147483648, %v1030_v58  ;;  %v644_v60 = vsel %vm634_vm14, %v641_v62, %v643_v12  ;;  %v617_v23 = vshrl.u32 %v4312_v39, %v616_v33  ;;  %v638_v25 = vsel %vm636_vm12, %v626_v61, 2102212464 }
  0xb8   : > { %v1168_v11 = vsel %vm1166_vm11, %v1167_v6, %v1165_v49  ;;  %v646_v28 = vsel %vm636_vm12, %v632_v7, 1326507024  ;;  %v675_v27 = vshrl.u32 %v644_v60, 16  ;;  %v674_v18 = vand.u32 65535, %v644_v60 }
  0xb9   : > { %v1169_v13 = vclz %v1168_v11  ;;  %v647_v32 = vsel %vm635_vm13, %v629_v56, %v646_v28  ;;  %v2916_v38 = vadd.s32 4294967169, %v297_v10  ;;  %v1032_v26 = vsel %vm911_vm9, %v1031_v1, %v1030_v58 }
  0xba   : > { %v637_v40 = vsel %vm633_vm10, %v617_v23, %v620_v36  ;;  %v648_v30 = vsel %vm634_vm14, %v645_v14, %v647_v32  ;;  %v677_v24 = vmul.u32 %v675_v27, %v650_v63  ;;  %v639_v33 = vsel %vm635_vm13, %v623_v52, %v638_v25 }
  0xbb   : > { %v2932_v29 = vadd.s32 4294967294, %v1169_v13  ;;  %v652_v42 = vand.u32 65535, %v648_v30  ;;  %v653_v2 = vshrl.u32 %v648_v30, 16  ;;  %v1157_v46 = vadd.s32 %v3248_v55, %v3252_v59 }
  0xbc   : > { %v3321_v50 = vand.u32 8388607, %v293_v0  ;;  %v3326_v51 = vsel %vm3313_vm1, %v3137_v21, %v1032_v26  ;;  %v678_v56 = vmul.u32 %v674_v18, %v651_v17  ;;  %v3330_v22 = vsel %vm634_vm14, %v637_v40, %v639_v33 }
  0xbd   : > { %vm2933_vm15 = vcmp.lt.s32.totalorder %v2932_v29, 0  ;;  %v655_v37 = vmul.u32 %v653_v2, %v650_v63  ;;  %v656_v58 = vmul.u32 %v652_v42, %v651_v17  ;;  %v680_v55 = vshll.u32 %v677_v24, 16 }
  0xbe   : > { %v1172_v48 = vsel %vm2933_vm15, 0, %v2932_v29  ;;  %v303_v6 = vadd.s32 1, %v2916_v38  ;;  %v654_v7 = vmul.u32 %v652_v42, %v650_v63  ;;  %v657_v62 = vmul.u32 %v653_v2, %v651_v17 }
  0xbf   : > { %v1173_v36 = vsub.s32 32, %v1172_v48  ;;  %v1177_v52 = vsub.s32 4294967266, %v1172_v48  ;;  %v1174_v59 = vshll.u32 %v1165_v49, %v1172_v48  ;;  %v658_v9 = vshll.u32 %v655_v37, 16 }
  0xc0   : > { %v676_v10 = vmul.u32 %v674_v18, %v650_v63  ;;  %v660_v12 = vshll.u32 %v656_v58, 16  ;;  %v682_v13 = vshll.u32 %v678_v56, 16  ;;  %v3334_v14 = vmul.f32 %v3326_v51, %v3326_v51 }
  0xc1   : > { %v1175_v61 = vshrl.u32 %v1157_v46, %v1173_v36  ;;  %v1178_v16 = vadd.s32 127, %v1177_v52  ;;  %vm662_vm2 = vc.u32 %v654_v7, %v658_v9  ;;  %v664_v60 = vadd.s32 %v658_v9, %v654_v7 }
  0xc2   : > { %vm684_vm3 = vc.u32 %v676_v10, %v680_v55  ;;  %v686_v34 = vadd.s32 %v680_v55, %v676_v10  ;;  %v663_v23 = vsel %vm662_vm2, 1, %v4314_v54  ;;  %v679_v25 = vmul.u32 %v675_v27, %v651_v17 }
  0xc3   : > { %v1176_v1 = vor.u32 %v1175_v61, %v1174_v59  ;;  %v1179_v11 = vshll.u32 %v1178_v16, 23  ;;  %v665_v28 = vadd.s32 %v663_v23, %v657_v62  ;;  %vm666_vm5 = vc.u32 %v664_v60, %v660_v12 }
  0xc4   : > { %v685_v63 = vsel %vm684_vm3, 1, %v4314_v54  ;;  %vm688_vm6 = vc.u32 %v686_v34, %v682_v13  ;;  %v667_v18 = vsel %vm666_vm5, 1, %v4314_v54  ;;  %v659_v26 = vshrl.u32 %v655_v37, 16 }
  0xc5   : > { %v1180_v49 = vor.u32 4788187, %v1179_v11  ;;  %v1183_v32 = vcvt.s32.f32 %v1176_v1  ;;  %v687_v38 = vadd.s32 %v685_v63, %v679_v25  ;;  %v669_v40 = vadd.s32 %v667_v18, %v665_v28 }
  0xc6   : > { %v689_v30 = vsel %vm688_vm6, 1, %v4314_v54  ;;  %vm304_vm7 = vcmp.gt.s32.totalorder %v303_v6, 0  ;;  %v681_v42 = vshrl.u32 %v677_v24, 16  ;;  %v4335_v17 = vmov 0 }
  0xc7   : > { %v1181_v29 = vand.u32 2147483647, %v1180_v49  ;;  %v691_v2 = vadd.s32 %v689_v30, %v687_v38  ;;  %v305_v46 = vsel %vm304_vm7, %v303_v6, 0  ;;  %v4336_v17 = vsel %vm3343_vm8, 4294967295, %v4335_v17 }
  0xc8   : > { %4337 = vst [vmem:[#allocation4_spill] sm:$0xff] %v4336_v17  ;;  %v661_v27 = vshrl.u32 %v656_v58, 16  ;;  %v670_v48 = vadd.s32 %v669_v40, %v659_v26  ;;  %v307_v36 = vand.u32 31, %v305_v46  ;;  %v683_v55 = vshrl.u32 %v678_v56, 16 }
  0xc9   : > { %v1184_v33 = vmul.f32 %v1183_v32, %v1181_v29  ;;  %v692_v37 = vadd.s32 %v691_v2, %v681_v42  ;;  %v301_v59 = vor.u32 8388608, %v3321_v50  ;;  %v690_v16 = vadd.s32 %v686_v34, %v682_v13 }
  0xca   : > { %v3348_v61 = vadd.s32 %v670_v48, %v661_v27  ;;  %v694_v24 = vmul.u32 %v3269_v15, %v3330_v22  ;;  %v3352_v6 = vsub.s32 32, %v307_v36  ;;  %v1045_v35 = vmul.f32 -0.00019511016, %v3334_v14 }
  0xcb   : > { %v1185_v52 = vxor.u32 2147483648, %v1184_v33  ;;  %v693_v7 = vadd.s32 %v692_v37, %v683_v55  ;;  %v3355_v62 = vshrl.u32 %v305_v46, 5  ;;  %v310_v58 = vshll.u32 %v4312_v39, %v307_v36 }
  0xcc   : > { %vm696_vm10 = vc.u32 %v3348_v61, %v690_v16  ;;  %v313_v50 = vshll.u32 %v4310_v41, %v307_v36  ;;  %v316_v9 = vshll.u32 %v4308_v43, %v307_v36  ;;  %v311_v15 = vshrl.u32 %v4310_v41, %v3352_v6 }
  0xcd   : > { %v1186_v56 = vsel %vm1065_vm4, %v1185_v52, %v1184_v33  ;;  %v697_v10 = vadd.s32 1, %v693_v7  ;;  %v314_v22 = vshrl.u32 %v4308_v43, %v3352_v6  ;;  %v319_v1 = vshll.u32 %v4306_v45, %v307_v36 }
  0xce   : > { %v317_v11 = vshrl.u32 %v4306_v45, %v3352_v6  ;;  %v320_v12 = vshrl.u32 %v4304_v47, %v3352_v6  ;;  %v322_v13 = vshll.u32 %v4304_v47, %v307_v36  ;;  %v323_v60 = vshrl.u32 %v4302_v57, %v3352_v6 }
  0xcf   : > { %v3378_v34 = vsel %vm3343_vm8, %v3147_v31, %v1186_v56  ;;  %v698_v49 = vsel %vm696_vm10, %v697_v10, %v693_v7  ;;  %v3380_v23 = vor.u32 %v311_v15, %v310_v58  ;;  %v3382_v25 = vor.u32 %v314_v22, %v313_v50  ;;  %v196_v7 = vpop.permute.xlu1 %195 }
  0xd0   : > { %v699_v28 = vadd.s32 %v698_v49, %v694_v24  ;;  %v3384_v63 = vor.u32 %v317_v11, %v316_v9  ;;  %v321_v29 = vor.u32 %v320_v12, %v319_v1  ;;  %v324_v32 = vor.u32 %v323_v60, %v322_v13 }
  0xd1   : > { %v1046_v18 = vadd.f32 0.008332121, %v1045_v35  ;;  %vm325_vm11 = vcmp.lt.s32.totalorder %v3355_v62, 1  ;;  %v3387_v38 = vshll.u32 %v301_v59, 8  ;;  %v3391_v26 = vmul.f32 %v3378_v34, %v3378_v34 }
  0xd2   : > { %v700_v40 = vadd.s32 536870912, %v699_v28  ;;  %vm328_vm12 = vcmp.lt.s32.totalorder %v3355_v62, 4  ;;  %v333_v30 = vsel %vm325_vm11, %v3380_v23, %v3382_v25  ;;  %vm327_vm13 = vcmp.lt.s32.totalorder %v3355_v62, 3 }
  0xd3   : > { %4338 = vst [vmem:[#allocation5_spill] sm:$0xff] %v3391_v26  ;;  %v334_v33 = vsel %vm328_vm12, %v321_v29, 920167782  ;;  %v337_v42 = vsel %vm325_vm11, %v3382_v25, %v3384_v63  ;;  %vm326_vm14 = vcmp.lt.s32.totalorder %v3355_v62, 2  ;;  %v338_v27 = vsel %vm328_vm12, %v324_v32, 1326507024 }
  0xd4   : > { %v3405_v2 = vshrl.u32 %v700_v40, 30  ;;  %v335_v46 = vsel %vm327_vm13, %v3384_v63, %v334_v33  ;;  %v1047_v48 = vmul.f32 %v1046_v18, %v3334_v14  ;;  %v339_v52 = vsel %vm327_vm13, %v321_v29, %v338_v27 }
  0xd5   : > { %v336_v36 = vsel %vm326_vm14, %v333_v30, %v335_v46  ;;  %v342_v55 = vand.u32 65535, %v3387_v38  ;;  %v1199_v37 = vmul.f32 -0.00019511016, %v3391_v26  ;;  %v340_v24 = vsel %vm326_vm14, %v337_v42, %v339_v52 }
  0xd6   : > { %v702_v59 = vshll.u32 %v3405_v2, 30  ;;  %v343_v35 = vshrl.u32 %v3387_v38, 16  ;;  %v344_v58 = vand.u32 65535, %v340_v24  ;;  %v345_v56 = vshrl.u32 %v340_v24, 16 }
  0xd7   : > { %v366_v50 = vand.u32 65535, %v336_v36  ;;  %v367_v9 = vshrl.u32 %v336_v36, 16  ;;  %v1033_v10 = vsub.s32 4, %v3232_v5  ;;  %v1187_v15 = vsub.s32 4, %v3271_v20 }
  0xd8   : > { %v703_v22 = vsub.s32 %v699_v28, %v702_v59  ;;  %v1048_v1 = vadd.f32 -0.16666654, %v1047_v48  ;;  %v347_v11 = vmul.u32 %v345_v56, %v342_v55  ;;  %v348_v12 = vmul.u32 %v344_v58, %v343_v35 }
  0xd9   : > { %v3429_v13 = vsel %vm3131_vm0, %v3079_v4, %v196_v7  ;;  %v695_v60 = vadd.s32 %v690_v16, %v3348_v61  ;;  %v369_v29 = vmul.u32 %v367_v9, %v342_v55  ;;  %v1200_v32 = vadd.f32 0.008332121, %v1199_v37 }
  0xda   : > { %vm704_vm15 = vcmp.lt.s32.totalorder %v703_v22, 0  ;;  %v705_v49 = vsub.s32 0, %v703_v22  ;;  %v346_v18 = vmul.u32 %v344_v58, %v342_v55  ;;  %v350_v40 = vshll.u32 %v347_v11, 16 }
  0xdb   : > { %v368_v30 = vmul.u32 %v366_v50, %v342_v55  ;;  %v349_v42 = vmul.u32 %v345_v56, %v343_v35  ;;  %v370_v28 = vmul.u32 %v366_v50, %v343_v35  ;;  %v372_v46 = vshll.u32 %v369_v29, 16 }
  0xdc   : > { %v706_v33 = vsel %vm704_vm15, %v705_v49, %v703_v22  ;;  %v352_v48 = vshll.u32 %v348_v12, 16  ;;  %vm354_vm2 = vc.u32 %v346_v18, %v350_v40  ;;  %v356_v36 = vadd.s32 %v350_v40, %v346_v18 }
  0xdd   : > { %v707_v27 = vclz %v706_v33  ;;  %v309_v4 = vshrl.u32 %v4312_v39, %v3352_v6  ;;  %v355_v61 = vsel %vm354_vm2, 1, %v4314_v54  ;;  %v371_v16 = vmul.u32 %v367_v9, %v343_v35 }
  0xde   : > { %vm376_vm3 = vc.u32 %v368_v30, %v372_v46  ;;  %v357_v37 = vadd.s32 %v355_v61, %v349_v42  ;;  %vm358_vm5 = vc.u32 %v356_v36, %v352_v48  ;;  %v1201_v59 = vmul.f32 %v1200_v32, %v3391_v26 }
  0xdf   : > { %v2923_v52 = vadd.s32 4294967294, %v707_v27  ;;  %v377_v55 = vsel %vm376_vm3, 1, %v4314_v54  ;;  %v359_v24 = vsel %vm358_vm5, 1, %v4314_v54  ;;  %v374_v7 = vshll.u32 %v370_v28, 16 }
  0xe0   : > { %v378_v58 = vadd.s32 %v372_v46, %v368_v30  ;;  %v351_v56 = vshrl.u32 %v347_v11, 16  ;;  %v361_v50 = vadd.s32 %v359_v24, %v357_v37  ;;  %v379_v49 = vadd.s32 %v377_v55, %v371_v16 }
  0xe1   : > { %vm2924_vm6 = vcmp.lt.s32.totalorder %v2923_v52, 0  ;;  %v330_v35 = vsel %vm328_vm12, %v3384_v63, 2102212464  ;;  %v758_v9 = vand.u32 2139095040, %v3429_v13  ;;  %v353_v33 = vshrl.u32 %v348_v12, 16 }
  0xe2   : > { %v710_v6 = vsel %vm2924_vm6, 0, %v2923_v52  ;;  %vm380_vm7 = vc.u32 %v378_v58, %v374_v7  ;;  %v362_v32 = vadd.s32 %v361_v50, %v351_v56  ;;  %v373_v42 = vshrl.u32 %v369_v29, 16 }
  0xe3   : > { %v711_v18 = vsub.s32 32, %v710_v6  ;;  %v715_v40 = vsub.s32 4294967266, %v710_v6  ;;  %v381_v27 = vsel %vm380_vm7, 1, %v4314_v54  ;;  %v4300_v30 = vand.u32 2147483647, %v3429_v13 }
  0xe4   : > { %v759_v11 = vshrl.u32 %v758_v9, 23  ;;  %v712_v46 = vshll.u32 %v703_v22, %v710_v6  ;;  %v383_v61 = vadd.s32 %v381_v27, %v379_v49  ;;  %v329_v63 = vsel %vm325_vm11, %v309_v4, %v3380_v23 }
  0xe5   : > { %v713_v48 = vshrl.u32 %v695_v60, %v711_v18  ;;  %v716_v36 = vadd.s32 127, %v715_v40  ;;  %v331_v16 = vsel %vm327_vm13, %v3382_v25, %v330_v35  ;;  %v3450_v12 = vadd.s32 %v362_v32, %v353_v33 }
  0xe6   : > { %v2925_v29 = vadd.s32 4294967169, %v759_v11  ;;  %v375_v55 = vshrl.u32 %v370_v28, 16  ;;  %v384_v24 = vadd.s32 %v383_v61, %v373_v42  ;;  %v1049_v22 = vmul.f32 %v1048_v1, %v3334_v14  ;;  %v2999_v11 = vld [vmem:[%s3063_s15 + $0x8] sm:$0xff] }
  0xe7   : > { %v714_v52 = vor.u32 %v713_v48, %v712_v46  ;;  %v717_v37 = vshll.u32 %v716_v36, 23  ;;  %v1202_v60 = vadd.f32 -0.16666654, %v1201_v59  ;;  %v3453_v56 = vadd.s32 %v378_v58, %v374_v7  ;;  %v192_v58 = vpop.permute.xlu0 %191 }
  0xe8   : > { %v765_v50 = vadd.s32 1, %v2925_v29  ;;  %vm3457_vm10 = vcmp.le.f32.partialorder %v601_v8, 0.7853982  ;;  %v4339_v23 = vmov 0  ;;  %v332_v4 = vsel %vm326_vm14, %v329_v63, %v331_v16 }
  0xe9   : > { %v4340_v23 = vsel %vm3457_vm10, 4294967295, %v4339_v23  ;;  %v718_v25 = vor.u32 4788187, %v717_v37  ;;  %v385_v49 = vadd.s32 %v384_v24, %v375_v55  ;;  %v762_v28 = vand.u32 8388607, %v4300_v30 }
  0xea   : > { %4341 = vst [vmem:[#allocation6_spill] sm:$0xff] %v4340_v23  ;;  %v3470_v1 = vsel %vm911_vm9, %v1033_v10, %v3232_v5  ;;  %vm603_vm11 = vcmp.lt.s32.totalorder %v3229_v53, 0  ;;  %vm388_vm12 = vc.u32 %v3450_v12, %v3453_v56  ;;  %vm766_vm13 = vcmp.gt.s32.totalorder %v765_v50, 0 }
  0xeb   : > { %v719_v8 = vand.u32 2147483647, %v718_v25  ;;  %v721_v62 = vcvt.s32.f32 %v714_v52  ;;  %v389_v59 = vadd.s32 1, %v385_v49  ;;  %v767_v7 = vsel %vm766_vm13, %v765_v50, 0 }
  0xec   : > { %v3475_v6 = vadd.f32 1.0, %v1049_v22  ;;  %v3482_v5 = vsel %vm1065_vm4, %v1187_v15, %v3271_v20  ;;  %v386_v10 = vmul.u32 %v3387_v38, %v332_v4  ;;  %v769_v35 = vand.u32 31, %v767_v7 }
  0xed   : > { %4342 = vst [vmem:[#allocation7_spill] sm:$0xff] %v3482_v5  ;;  %v1203_v9 = vmul.f32 %v1202_v60, %v3391_v26  ;;  %v722_v18 = vmul.f32 %v721_v62, %v719_v8  ;;  %v390_v40 = vsel %vm388_vm12, %v389_v59, %v385_v49  ;;  %v763_v33 = vor.u32 8388608, %v762_v28 }
  0xee   : > { %v391_v32 = vadd.s32 %v390_v40, %v386_v10  ;;  %v3486_v42 = vshrl.u32 %v767_v7, 5  ;;  %v770_v27 = vsub.s32 32, %v769_v35  ;;  %v3491_v46 = vsel %vm3131_vm0, %v2999_v11, %v192_v58 }
  0xef   : > { %v723_v48 = vxor.u32 2147483648, %v722_v18  ;;  %v772_v20 = vshll.u32 %v4312_v39, %v769_v35  ;;  %v775_v38 = vshll.u32 %v4310_v41, %v769_v35  ;;  %v778_v15 = vshll.u32 %v4308_v43, %v769_v35 }
  0xf0   : > { %v392_v36 = vadd.s32 536870912, %v391_v32  ;;  %v773_v61 = vshrl.u32 %v4310_v41, %v770_v27  ;;  %v776_v63 = vshrl.u32 %v4308_v43, %v770_v27  ;;  %v781_v16 = vshll.u32 %v4306_v45, %v769_v35 }
  0xf1   : > { %v724_v29 = vsel %vm603_vm11, %v723_v48, %v722_v18  ;;  %v779_v52 = vshrl.u32 %v4306_v45, %v770_v27  ;;  %v782_v37 = vshrl.u32 %v4304_v47, %v770_v27  ;;  %v785_v55 = vshrl.u32 %v4302_v57, %v770_v27 }
  0xf2   : > { %v3507_v24 = vsel %vm3457_vm10, %v3229_v53, %v724_v29  ;;  %v3509_v22 = vshrl.u32 %v392_v36, 30  ;;  %v774_v60 = vor.u32 %v773_v61, %v772_v20  ;;  %v777_v50 = vor.u32 %v776_v63, %v775_v38 }
  0xf3   : > { %v3513_v25 = vmul.f32 %v3507_v24, %v3507_v24  ;;  %v783_v4 = vor.u32 %v782_v37, %v781_v16  ;;  %v784_v49 = vshll.u32 %v4304_v47, %v769_v35  ;;  %v3516_v28 = vshll.u32 %v763_v33, 8 }
  0xf4   : > { %v3518_v8 = vadd.f32 1.0, %v1203_v9  ;;  %v725_v62 = vsub.s32 4, %v3405_v2  ;;  %v394_v59 = vshll.u32 %v3509_v22, 30  ;;  %v780_v7 = vor.u32 %v779_v52, %v778_v15 }
  0xf5   : > { %4343 = vst [vmem:[#allocation8_spill] sm:$0xff] %v3513_v25  ;;  %v786_v58 = vor.u32 %v785_v55, %v784_v49  ;;  %vm787_vm9 = vcmp.lt.s32.totalorder %v3486_v42, 1  ;;  %v4301_v10 = vand.u32 2147483647, %v3491_v46  ;;  %v450_v18 = vand.u32 2139095040, %v3491_v46 }
  0xf6   : > { %v737_v40 = vmul.f32 -0.00019511016, %v3513_v25  ;;  %v395_v11 = vsub.s32 %v391_v32, %v394_v59  ;;  %vm790_vm4 = vcmp.lt.s32.totalorder %v3486_v42, 4  ;;  %v795_v35 = vsel %vm787_vm9, %v774_v60, %v777_v50 }
  0xf7   : > { %vm788_vm14 = vcmp.lt.s32.totalorder %v3486_v42, 2  ;;  %vm789_vm15 = vcmp.lt.s32.totalorder %v3486_v42, 3  ;;  %v796_v9 = vsel %vm790_vm4, %v783_v4, 920167782  ;;  %v804_v33 = vand.u32 65535, %v3516_v28 }
  0xf8   : > { %vm396_vm2 = vcmp.lt.s32.totalorder %v395_v11, 0  ;;  %v397_v48 = vsub.s32 0, %v395_v11  ;;  %v797_v20 = vsel %vm789_vm15, %v780_v7, %v796_v9  ;;  %v799_v32 = vsel %vm787_vm9, %v777_v50, %v780_v7 }
  0xf9   : > { %v771_v38 = vshrl.u32 %v4312_v39, %v770_v27  ;;  %v798_v15 = vsel %vm788_vm14, %v795_v35, %v797_v20  ;;  %v800_v36 = vsel %vm790_vm4, %v786_v58, 1326507024  ;;  %v451_v61 = vshrl.u32 %v450_v18, 23 }
  0xfa   : > { %v738_v63 = vadd.f32 0.008332121, %v737_v40  ;;  %v398_v16 = vsel %vm396_vm2, %v397_v48, %v395_v11  ;;  %v801_v29 = vsel %vm789_vm15, %v783_v4, %v800_v36  ;;  %v829_v52 = vshrl.u32 %v798_v15, 16 }
  0xfb   : > { %v399_v37 = vclz %v398_v16  ;;  %v792_v55 = vsel %vm790_vm4, %v780_v7, 2102212464  ;;  %v802_v27 = vsel %vm788_vm14, %v799_v32, %v801_v29  ;;  %v828_v49 = vand.u32 65535, %v798_v15 }
  0xfc   : > { %v805_v59 = vshrl.u32 %v3516_v28, 16  ;;  %v806_v35 = vand.u32 65535, %v802_v27  ;;  %v807_v9 = vshrl.u32 %v802_v27, 16  ;;  %v831_v58 = vmul.u32 %v829_v52, %v804_v33 }
  0xfd   : > { %v387_v18 = vadd.s32 %v3453_v56, %v3450_v12  ;;  %v2917_v40 = vadd.s32 4294967294, %v399_v37  ;;  %v791_v4 = vsel %vm787_vm9, %v771_v38, %v774_v60  ;;  %v3556_v48 = vand.u32 8388607, %v4301_v10 }
  0xfe   : > { %v739_v7 = vmul.f32 %v738_v63, %v3513_v25  ;;  %v793_v20 = vsel %vm789_vm15, %v777_v50, %v792_v55  ;;  %v809_v32 = vmul.u32 %v807_v9, %v804_v33  ;;  %v810_v15 = vmul.u32 %v806_v35, %v805_v59 }
  0xff   : > { %vm2918_vm3 = vcmp.lt.s32.totalorder %v2917_v40, 0  ;;  %v830_v36 = vmul.u32 %v828_v49, %v804_v33  ;;  %v832_v16 = vmul.u32 %v828_v49, %v805_v59  ;;  %v2919_v29 = vadd.s32 4294967169, %v451_v61 }
 0x100   : > { %v402_v12 = vsel %vm2918_vm3, 0, %v2917_v40  ;;  %v808_v56 = vmul.u32 %v806_v35, %v804_v33  ;;  %v812_v37 = vshll.u32 %v809_v32, 16  ;;  %v834_v27 = vshll.u32 %v831_v58, 16 }
 0x101   : > { %v403_v60 = vsub.s32 32, %v402_v12  ;;  %v407_v38 = vsub.s32 4294967266, %v402_v12  ;;  %v811_v30 = vmul.u32 %v807_v9, %v805_v59  ;;  %v833_v10 = vmul.u32 %v829_v52, %v805_v59 }
 0x102   : > { %v404_v57 = vshll.u32 %v395_v11, %v402_v12  ;;  %v814_v47 = vshll.u32 %v810_v15, 16  ;;  %vm816_vm5 = vc.u32 %v808_v56, %v812_v37  ;;  %v818_v63 = vadd.s32 %v812_v37, %v808_v56 }
 0x103   : > { %v405_v45 = vshrl.u32 %v387_v18, %v403_v60  ;;  %v408_v50 = vadd.s32 127, %v407_v38  ;;  %v817_v55 = vsel %vm816_vm5, 1, %v4314_v54  ;;  %v836_v43 = vshll.u32 %v832_v16, 16 }
 0x104   : > { %v819_v41 = vadd.s32 %v817_v55, %v811_v30  ;;  %vm820_vm6 = vc.u32 %v818_v63, %v814_v47  ;;  %vm838_vm7 = vc.u32 %v830_v36, %v834_v27  ;;  %v840_v61 = vadd.s32 %v834_v27, %v830_v36  ;;  %v3000_v63 = vld [vmem:[%s3063_s15 + $0x38] sm:$0xff] }
 0x105   : > { %v406_v33 = vor.u32 %v405_v45, %v404_v57  ;;  %v409_v49 = vshll.u32 %v408_v50, 23  ;;  %v821_v35 = vsel %vm820_vm6, 1, %v4314_v54  ;;  %v839_v9 = vsel %vm838_vm7, 1, %v4314_v54 }
 0x106   : > { %vm295_vm12 = vcmp.lt.s32.totalorder %v3264_v3, 0  ;;  %v813_v11 = vshrl.u32 %v809_v32, 16  ;;  %v823_v52 = vadd.s32 %v821_v35, %v819_v41  ;;  %v841_v59 = vadd.s32 %v839_v9, %v833_v10 }
 0x107   : > { %vm842_vm13 = vc.u32 %v840_v61, %v836_v43  ;;  %vm3567_vm9 = vcmp.le.f32.partialorder %v293_v0, 0.7853982  ;;  %v410_v47 = vor.u32 4788187, %v409_v49  ;;  %v794_v45 = vsel %vm788_vm14, %v791_v4, %v793_v20 }
 0x108   : > { %v835_v57 = vshrl.u32 %v831_v58, 16  ;;  %v843_v30 = vsel %vm842_vm13, 1, %v4314_v54  ;;  %v815_v40 = vshrl.u32 %v810_v15, 16  ;;  %v824_v36 = vadd.s32 %v823_v52, %v813_v11  ;;  %v204_v15 = vpop.permute.xlu1 %203 }
 0x109   : > { %v845_v12 = vadd.s32 %v843_v30, %v841_v59  ;;  %v457_v32 = vadd.s32 1, %v2919_v29  ;;  %v740_v41 = vadd.f32 -0.16666654, %v739_v7  ;;  %v411_v10 = vand.u32 2147483647, %v410_v47 }
 0x10a   : > { %v413_v56 = vcvt.s32.f32 %v406_v33  ;;  %v837_v37 = vshrl.u32 %v832_v16, 16  ;;  %v3574_v27 = vadd.s32 %v824_v36, %v815_v40  ;;  %v455_v60 = vor.u32 8388608, %v3556_v48 }
 0x10b   : > { %v846_v0 = vadd.s32 %v845_v12, %v835_v57  ;;  %vm458_vm4 = vcmp.gt.s32.totalorder %v457_v32, 0  ;;  %v3579_v42 = vmul.f32 %v3475_v6, %v3326_v51  ;;  %v3581_v4 = vadd.s32 %v840_v61, %v836_v43 }
 0x10c   : > { %v414_v58 = vmul.f32 %v413_v56, %v411_v10  ;;  %v459_v20 = vsel %vm458_vm4, %v457_v32, 0  ;;  %v3585_v7 = vmul.f32 %v3518_v8, %v3378_v34  ;;  %v3592_v48 = vsel %vm603_vm11, %v725_v62, %v3405_v2 }
 0x10d   : > { %4346 = vst [vmem:[#allocation9_spill] sm:$0xff] %v3579_v42  ;;  %v847_v6 = vadd.s32 %v846_v0, %v837_v37  ;;  %v848_v43 = vmul.u32 %v3516_v28, %v794_v45  ;;  %vm850_vm14 = vc.u32 %v3574_v27, %v3581_v4  ;;  %v461_v29 = vand.u32 31, %v459_v20 }
 0x10e   : > { %4347 = vst [vmem:[#allocation10_spill] sm:$0xff] %v3585_v7  ;;  %v415_v16 = vxor.u32 2147483648, %v414_v58  ;;  %v741_v34 = vmul.f32 %v740_v41, %v3513_v25  ;;  %v3599_v38 = vshll.u32 %v455_v60, 8  ;;  %v3604_v2 = vsel %vm3131_vm0, %v3000_v63, %v204_v15 }
 0x10f   : > { %4348 = vst [vmem:[#allocation11_spill] sm:$0xff] %v3592_v48  ;;  %v851_v8 = vadd.s32 1, %v847_v6  ;;  %v3608_v50 = vshrl.u32 %v459_v20, 5  ;;  %v462_v28 = vsub.s32 32, %v461_v29  ;;  %v464_v55 = vshll.u32 %v4312_v39, %v461_v29 }
 0x110   : > { %v416_v62 = vsel %vm295_vm12, %v415_v16, %v414_v58  ;;  %v4349_v49 = vmov 2475754826   ;;  %v4350_v9 = vmov 2131351028   ;;  %v4351_v45 = vmov 2102212464  }
 0x111   : > { %v3614_v61 = vsel %vm3567_vm9, %v3264_v3, %v416_v62  ;;  %v852_v33 = vsel %vm850_vm14, %v851_v8, %v847_v6  ;;  %v467_v35 = vshll.u32 %v4349_v49, %v461_v29  ;;  %v470_v11 = vshll.u32 %v4350_v9, %v461_v29 }
 0x112   : > { %v3620_v52 = vmul.f32 %v3614_v61, %v3614_v61  ;;  %v853_v59 = vadd.s32 %v852_v33, %v848_v43  ;;  %v465_v47 = vshrl.u32 %v4349_v49, %v462_v28  ;;  %v473_v57 = vshll.u32 %v4351_v45, %v461_v29 }
 0x113   : > { %v468_v30 = vshrl.u32 %v4350_v9, %v462_v28  ;;  %v471_v40 = vshrl.u32 %v4351_v45, %v462_v28  ;;  %v4352_v36 = vmov 920167782   ;;  %v4353_v37 = vmov 1326507024  }
 0x114   : > { %v474_v12 = vshrl.u32 %v4352_v36, %v462_v28  ;;  %v476_v32 = vshll.u32 %v4352_v36, %v461_v29  ;;  %v429_v41 = vmul.f32 -0.00019511016, %v3620_v52  ;;  %v854_v10 = vadd.s32 536870912, %v853_v59 }
 0x115   : > { %v466_v56 = vor.u32 %v465_v47, %v464_v55  ;;  %v477_v0 = vshrl.u32 %v4353_v37, %v462_v28  ;;  %v469_v60 = vor.u32 %v468_v30, %v467_v35  ;;  %v472_v58 = vor.u32 %v471_v40, %v470_v11 }
 0x116   : > { %v475_v20 = vor.u32 %v474_v12, %v473_v57  ;;  %v1374_v15 = vand.u32 2139095040, %v3604_v2  ;;  %v3631_v6 = vshrl.u32 %v854_v10, 30  ;;  %vm479_vm11 = vcmp.lt.s32.totalorder %v3608_v50, 1 }
 0x117   : > { %v478_v16 = vor.u32 %v477_v0, %v476_v32  ;;  %vm482_vm15 = vcmp.lt.s32.totalorder %v3608_v50, 4  ;;  %v3635_v43 = vadd.f32 1.0, %v741_v34  ;;  %v487_v29 = vsel %vm479_vm11, %v466_v56, %v469_v60 }
 0x118   : > { %v488_v8 = vsel %vm482_vm15, %v475_v20, 920167782  ;;  %v496_v63 = vand.u32 65535, %v3599_v38  ;;  %v430_v62 = vadd.f32 0.008332121, %v429_v41  ;;  %v856_v55 = vshll.u32 %v3631_v6, 30 }
 0x119   : > { %vm481_vm2 = vcmp.lt.s32.totalorder %v3608_v50, 3  ;;  %v497_v33 = vshrl.u32 %v3599_v38, 16  ;;  %vm480_vm3 = vcmp.lt.s32.totalorder %v3608_v50, 2  ;;  %v491_v35 = vsel %vm479_vm11, %v469_v60, %v472_v58 }
 0x11a   : > { %v489_v34 = vsel %vm481_vm2, %v472_v58, %v488_v8  ;;  %v492_v11 = vsel %vm482_vm15, %v478_v16, 1326507024  ;;  %v857_v47 = vsub.s32 %v853_v59, %v856_v55  ;;  %v463_v57 = vshrl.u32 %v4312_v39, %v462_v28 }
 0x11b   : > { %v490_v30 = vsel %vm480_vm3, %v487_v29, %v489_v34  ;;  %v1375_v40 = vshrl.u32 %v1374_v15, 23  ;;  %v484_v12 = vsel %vm482_vm15, %v472_v58, 2102212464  ;;  %v493_v32 = vsel %vm481_vm2, %v475_v20, %v492_v11 }
 0x11c   : > { %v520_v41 = vand.u32 65535, %v490_v30  ;;  %v521_v10 = vshrl.u32 %v490_v30, 16  ;;  %v431_v0 = vmul.f32 %v430_v62, %v3620_v52  ;;  %vm858_vm5 = vcmp.lt.s32.totalorder %v857_v47, 0 }
 0x11d   : > { %v859_v8 = vsub.s32 0, %v857_v47  ;;  %v494_v59 = vsel %vm480_vm3, %v491_v35, %v493_v32  ;;  %v849_v58 = vadd.s32 %v3581_v4, %v3574_v27  ;;  %v483_v20 = vsel %vm479_vm11, %v463_v57, %v466_v56 }
 0x11e   : > { %v498_v28 = vand.u32 65535, %v494_v59  ;;  %v499_v16 = vshrl.u32 %v494_v59, 16  ;;  %v523_v55 = vmul.u32 %v521_v10, %v496_v63  ;;  %v524_v34 = vmul.u32 %v520_v41, %v497_v33 }
 0x11f   : > { %v860_v29 = vsel %vm858_vm5, %v859_v8, %v857_v47  ;;  %v485_v62 = vsel %vm481_vm2, %v469_v60, %v484_v12  ;;  %v432_v35 = vadd.f32 -0.16666654, %v431_v0  ;;  %v522_v32 = vmul.u32 %v520_v41, %v496_v63 }
 0x120   : > { %v861_v11 = vclz %v860_v29  ;;  %v501_v30 = vmul.u32 %v499_v16, %v496_v63  ;;  %v502_v39 = vmul.u32 %v498_v28, %v497_v33  ;;  %v526_v59 = vshll.u32 %v523_v55, 16 }
 0x121   : > { %v2937_v51 = vadd.s32 4294967169, %v1375_v40  ;;  %v500_v15 = vmul.u32 %v498_v28, %v496_v63  ;;  %v525_v31 = vmul.u32 %v521_v10, %v497_v33  ;;  %v503_v27 = vmul.u32 %v499_v16, %v497_v33 }
 0x122   : > { %v2926_v54 = vadd.s32 4294967294, %v861_v11  ;;  %v504_v7 = vshll.u32 %v501_v30, 16  ;;  %v506_v4 = vshll.u32 %v502_v39, 16  ;;  %v528_v8 = vshll.u32 %v524_v34, 16 }
 0x123   : > { %vm530_vm6 = vc.u32 %v522_v32, %v526_v59  ;;  %v4354_v57 = vmov 0   ;;  %v532_v0 = vadd.s32 %v526_v59, %v522_v32  ;;  %v527_v63 = vshrl.u32 %v523_v55, 16 }
 0x124   : > { %vm2927_vm7 = vcmp.lt.s32.totalorder %v2926_v54, 0  ;;  %vm508_vm13 = vc.u32 %v500_v15, %v504_v7  ;;  %v510_v56 = vadd.s32 %v504_v7, %v500_v15  ;;  %v531_v29 = vsel %vm530_vm6, 1, %v4354_v57 }
 0x125   : > { %v864_v60 = vsel %vm2927_vm7, 0, %v2926_v54  ;;  %v509_v12 = vsel %vm508_vm13, 1, %v4354_v57  ;;  %v533_v41 = vadd.s32 %v531_v29, %v525_v31  ;;  %vm534_vm14 = vc.u32 %v532_v0, %v528_v8 }
 0x126   : > { %v865_v26 = vsub.s32 32, %v864_v60  ;;  %v869_v40 = vsub.s32 4294967266, %v864_v60  ;;  %v511_v11 = vadd.s32 %v509_v12, %v503_v27  ;;  %v866_v28 = vshll.u32 %v857_v47, %v864_v60 }
 0x127   : > { %vm512_vm4 = vc.u32 %v510_v56, %v506_v4  ;;  %v4355_v33 = vand.u32 2147483647, %v3604_v2  ;;  %v535_v54 = vsel %vm534_vm14, 1, %v4354_v57  ;;  %v505_v15 = vshrl.u32 %v501_v30, 16 }
 0x128   : > { %v867_v16 = vshrl.u32 %v849_v58, %v865_v26  ;;  %v870_v17 = vadd.s32 127, %v869_v40  ;;  %v513_v7 = vsel %vm512_vm4, 1, %v4354_v57  ;;  %v537_v32 = vadd.s32 %v535_v54, %v533_v41 }
 0x129   : > { %v1378_v10 = vand.u32 8388607, %v4355_v33  ;;  %v515_v5 = vadd.s32 %v513_v7, %v511_v11  ;;  %v1381_v31 = vadd.s32 1, %v2937_v51  ;;  %v486_v47 = vsel %vm480_vm3, %v483_v20, %v485_v62 }
 0x12a   : > { %v868_v59 = vor.u32 %v867_v16, %v866_v28  ;;  %v871_v29 = vshll.u32 %v870_v17, 23  ;;  %v507_v55 = vshrl.u32 %v502_v39, 16  ;;  %vm757_vm11 = vcmp.lt.s32.totalorder %v3429_v13, 0 }
 0x12b   : > { %v516_v27 = vadd.s32 %v515_v5, %v505_v15  ;;  %v529_v4 = vshrl.u32 %v524_v34, 16  ;;  %v538_v26 = vadd.s32 %v537_v32, %v527_v63  ;;  %vm1382_vm15 = vcmp.gt.s32.totalorder %v1381_v31, 0 }
 0x12c   : > { %v433_v58 = vmul.f32 %v432_v35, %v3620_v52  ;;  %v4356_v56 = vand.u32 2147483647, %v3429_v13  ;;  %v872_v51 = vor.u32 4788187, %v871_v29  ;;  %v1379_v17 = vor.u32 8388608, %v1378_v10 }
 0x12d   : > { %v1383_v60 = vsel %vm1382_vm15, %v1381_v31, 0  ;;  %v3685_v50 = vadd.s32 %v516_v27, %v507_v55  ;;  %v3687_v39 = vadd.s32 %v532_v0, %v528_v8  ;;  %v539_v20 = vadd.s32 %v538_v26, %v529_v4  ;;  %v202_v26 = vpop.permute.xlu0 %201 }
 0x12e   : > { %vm3681_vm2 = vcmp.le.f32.partialorder %v4356_v56, 0.7853982  ;;  %v1385_v5 = vand.u32 31, %v1383_v60  ;;  %v3691_v34 = vmul.f32 %v3635_v43, %v3507_v24  ;;  %v4360_v62 = vsub.s32 4, %v3509_v22 }
 0x12f   : > { %v873_v12 = vand.u32 2147483647, %v872_v51  ;;  %v875_v41 = vcvt.s32.f32 %v868_v59  ;;  %v879_v40 = vsub.s32 4, %v3631_v6  ;;  %vm542_vm3 = vc.u32 %v3685_v50, %v3687_v39 }
 0x130   : > { %4359 = vst [vmem:[#allocation12_spill] sm:$0xff] %v3691_v34  ;;  %v3698_v35 = vsel %vm295_vm12, %v4360_v62, %v3509_v22  ;;  %v543_v8 = vadd.s32 1, %v539_v20  ;;  %v1386_v0 = vsub.s32 32, %v1385_v5  ;;  %v434_v11 = vadd.f32 1.0, %v433_v58 }
 0x131   : > { %v876_v63 = vmul.f32 %v875_v41, %v873_v12  ;;  %v540_v24 = vmul.u32 %v3599_v38, %v486_v47  ;;  %v3704_v43 = vshll.u32 %v1379_v17, 8  ;;  %v3706_v33 = vshrl.u32 %v1383_v60, 5 }
 0x132   : > { %v544_v28 = vsel %vm542_vm3, %v543_v8, %v539_v20  ;;  %v1389_v22 = vshrl.u32 %v4349_v49, %v1386_v0  ;;  %v1392_v10 = vshrl.u32 %v4350_v9, %v1386_v0  ;;  %v4361_v54 = vmov 683565275  }
 0x133   : > { %v877_v16 = vxor.u32 2147483648, %v876_v63  ;;  %v545_v7 = vadd.s32 %v544_v28, %v540_v24  ;;  %v1388_v15 = vshll.u32 %v4361_v54, %v1385_v5  ;;  %v1395_v32 = vshrl.u32 %v4351_v45, %v1386_v0 }
 0x134   : > { %v1391_v31 = vshll.u32 %v4349_v49, %v1385_v5  ;;  %v1394_v59 = vshll.u32 %v4350_v9, %v1385_v5  ;;  %v1397_v38 = vshll.u32 %v4351_v45, %v1385_v5  ;;  %v1398_v29 = vshrl.u32 %v4352_v36, %v1386_v0 }
 0x135   : > { %v878_v47 = vsel %vm757_vm11, %v877_v16, %v876_v63  ;;  %v546_v55 = vadd.s32 536870912, %v545_v7  ;;  %v1400_v27 = vshll.u32 %v4352_v36, %v1385_v5  ;;  %v1401_v4 = vshrl.u32 %v4353_v37, %v1386_v0  ;;  %v3741_v63 = vld [vmem:[%s3063_s15 + $0x30] sm:$0xff] }
 0x136   : > { %v3723_v58 = vsel %vm3681_vm2, %v3429_v13, %v878_v47  ;;  %v1390_v56 = vor.u32 %v1389_v22, %v1388_v15  ;;  %v1393_v51 = vor.u32 %v1392_v10, %v1391_v31  ;;  %v1399_v17 = vor.u32 %v1398_v29, %v1397_v38 }
 0x137   : > { %v3727_v60 = vmul.f32 %v3723_v58, %v3723_v58  ;;  %v3729_v20 = vshrl.u32 %v546_v55, 30  ;;  %v1396_v62 = vor.u32 %v1395_v32, %v1394_v59  ;;  %v1402_v12 = vor.u32 %v1401_v4, %v1400_v27 }
 0x138   : > { %v3732_v5 = vmul.f32 %v434_v11, %v3614_v61  ;;  %v3737_v41 = vsel %vm757_vm11, %v879_v40, %v3631_v6  ;;  %v1420_v8 = vand.u32 65535, %v3704_v43  ;;  %v3746_v24 = vsel %vm3131_vm0, %v3741_v63, %v202_v26 }
 0x139   : > { %v891_v28 = vmul.f32 -0.00019511016, %v3727_v60  ;;  %v548_v22 = vshll.u32 %v3729_v20, 30  ;;  %vm1403_vm12 = vcmp.lt.s32.totalorder %v3706_v33, 1  ;;  %vm1406_vm5 = vcmp.lt.s32.totalorder %v3706_v33, 4 }
 0x13a   : > { %v1411_v61 = vsel %vm1403_vm12, %v1390_v56, %v1393_v51  ;;  %v1412_v6 = vsel %vm1406_vm5, %v1399_v17, 920167782  ;;  %v1416_v40 = vsel %vm1406_vm5, %v1402_v12, 1326507024  ;;  %v1421_v11 = vshrl.u32 %v3704_v43, 16 }
 0x13b   : > { %v892_v10 = vadd.f32 0.008332121, %v891_v28  ;;  %v549_v16 = vsub.s32 %v545_v7, %v548_v22  ;;  %vm1405_vm6 = vcmp.lt.s32.totalorder %v3706_v33, 3  ;;  %v1415_v15 = vsel %vm1403_vm12, %v1393_v51, %v1396_v62 }
 0x13c   : > { %vm1404_vm7 = vcmp.lt.s32.totalorder %v3706_v33, 2  ;;  %v1408_v32 = vsel %vm1406_vm5, %v1396_v62, 2102212464  ;;  %v1413_v31 = vsel %vm1405_vm6, %v1396_v62, %v1412_v6  ;;  %v1417_v59 = vsel %vm1405_vm6, %v1399_v17, %v1416_v40 }
 0x13d   : > { %vm550_vm13 = vcmp.lt.s32.totalorder %v549_v16, 0  ;;  %v551_v38 = vsub.s32 0, %v549_v16  ;;  %v1414_v29 = vsel %vm1404_vm7, %v1411_v61, %v1413_v31  ;;  %v1220_v7 = vand.u32 2139095040, %v3746_v24 }
 0x13e   : > { %v893_v47 = vmul.f32 %v892_v10, %v3727_v60  ;;  %v1418_v55 = vsel %vm1404_vm7, %v1415_v15, %v1417_v59  ;;  %v1444_v27 = vand.u32 65535, %v1414_v29  ;;  %v1445_v4 = vshrl.u32 %v1414_v29, 16 }
 0x13f   : > { %v552_v26 = vsel %vm550_vm13, %v551_v38, %v549_v16  ;;  %v1387_v62 = vshrl.u32 %v4361_v54, %v1386_v0  ;;  %v1422_v12 = vand.u32 65535, %v1418_v55  ;;  %v1423_v28 = vshrl.u32 %v1418_v55, 16 }
 0x140   : > { %v541_v17 = vadd.s32 %v3687_v39, %v3685_v50  ;;  %v553_v22 = vclz %v552_v26  ;;  %v3772_v6 = vmul.u32 %v1445_v4, %v1420_v8  ;;  %v1409_v10 = vsel %vm1405_vm6, %v1393_v51, %v1408_v32 }
 0x141   : > { %v1407_v40 = vsel %vm1403_vm12, %v1387_v62, %v1390_v56  ;;  %v1425_v15 = vmul.u32 %v1423_v28, %v1420_v8  ;;  %v1426_v31 = vmul.u32 %v1422_v12, %v1421_v11  ;;  %v894_v59 = vadd.f32 -0.16666654, %v893_v47 }
 0x142   : > { %v2920_v0 = vadd.s32 4294967294, %v553_v22  ;;  %v1448_v38 = vmul.u32 %v1444_v27, %v1421_v11  ;;  %v1221_v29 = vshrl.u32 %v1220_v7, 23  ;;  %v1424_v55 = vmul.u32 %v1422_v12, %v1420_v8 }
 0x143   : > { %v1428_v34 = vshll.u32 %v1425_v15, 16  ;;  %v1446_v50 = vmul.u32 %v1444_v27, %v1420_v8  ;;  %v1450_v39 = vshll.u32 %v3772_v6, 16  ;;  %v1427_v26 = vmul.u32 %v1423_v28, %v1421_v11 }
 0x144   : > { %vm2921_vm4 = vcmp.lt.s32.totalorder %v2920_v0, 0  ;;  %v1429_v61 = vshrl.u32 %v1425_v15, 16  ;;  %v1449_v53 = vmul.u32 %v1445_v4, %v1421_v11  ;;  %v1430_v56 = vshll.u32 %v1426_v31, 16 }
 0x145   : > { %v556_v23 = vsel %vm2921_vm4, 0, %v2920_v0  ;;  %vm1432_vm14 = vc.u32 %v1424_v55, %v1428_v34  ;;  %v1434_v62 = vadd.s32 %v1428_v34, %v1424_v55  ;;  %vm449_vm11 = vcmp.lt.s32.totalorder %v3491_v46, 0 }
 0x146   : > { %v557_v51 = vsub.s32 32, %v556_v23  ;;  %v561_v32 = vsub.s32 4294967266, %v556_v23  ;;  %v1433_v47 = vsel %vm1432_vm14, 1, %v4354_v57  ;;  %v1452_v7 = vshll.u32 %v1448_v38, 16 }
 0x147   : > { %v558_v12 = vshll.u32 %v549_v16, %v556_v23  ;;  %v1435_v22 = vadd.s32 %v1433_v47, %v1427_v26  ;;  %vm1436_vm15 = vc.u32 %v1434_v62, %v1430_v56  ;;  %vm1454_vm3 = vc.u32 %v1446_v50, %v1450_v39 }
 0x148   : > { %v559_v8 = vshrl.u32 %v541_v17, %v557_v51  ;;  %v562_v27 = vadd.s32 127, %v561_v32  ;;  %v1437_v28 = vsel %vm1436_vm15, 1, %v4354_v57  ;;  %v1455_v11 = vsel %vm1454_vm3, 1, %v4354_v57 }
 0x149   : > { %v1439_v4 = vadd.s32 %v1437_v28, %v1435_v22  ;;  %v1456_v15 = vadd.s32 %v1450_v39, %v1446_v50  ;;  %v1457_v34 = vadd.s32 %v1455_v11, %v1449_v53  ;;  %v2934_v0 = vadd.s32 4294967169, %v1221_v29 }
 0x14a   : > { %v560_v55 = vor.u32 %v559_v8, %v558_v12  ;;  %v563_v48 = vshll.u32 %v562_v27, 23  ;;  %v571_v25 = vsub.s32 4, %v3729_v20  ;;  %v4362_v42 = vand.u32 2147483647, %v3746_v24 }
 0x14b   : > { %v1410_v16 = vsel %vm1404_vm7, %v1407_v40, %v1409_v10  ;;  %v1440_v17 = vadd.s32 %v1439_v4, %v1429_v61  ;;  %vm1458_vm12 = vc.u32 %v1456_v15, %v1452_v7  ;;  %v1227_v26 = vadd.s32 1, %v2934_v0 }
 0x14c   : > { %v1224_v23 = vand.u32 8388607, %v4362_v42  ;;  %v895_v56 = vmul.f32 %v894_v59, %v3727_v60  ;;  %v4363_v62 = vand.u32 2147483647, %v3491_v46  ;;  %v564_v29 = vor.u32 4788187, %v563_v48 }
 0x14d   : > { %v1431_v50 = vshrl.u32 %v1426_v31, 16  ;;  %v1459_v39 = vsel %vm1458_vm12, 1, %v4354_v57  ;;  %v1451_v42 = vshrl.u32 %v3772_v6, 16  ;;  %vm1228_vm6 = vcmp.gt.s32.totalorder %v1227_v26, 0 }
 0x14e   : > { %vm3792_vm5 = vcmp.le.f32.partialorder %v4363_v62, 0.7853982  ;;  %v1461_v51 = vadd.s32 %v1459_v39, %v1457_v34  ;;  %v1225_v33 = vor.u32 8388608, %v1224_v23  ;;  %v565_v61 = vand.u32 2147483647, %v564_v29 }
 0x14f   : > { %v567_v40 = vcvt.s32.f32 %v560_v55  ;;  %v3798_v10 = vadd.s32 %v1440_v17, %v1431_v50  ;;  %v1229_v59 = vsel %vm1228_vm6, %v1227_v26, 0  ;;  %v3803_v32 = vsel %vm449_vm11, %v571_v25, %v3729_v20 }
 0x150   : > { %v1453_v47 = vshrl.u32 %v1448_v38, 16  ;;  %v1462_v48 = vadd.s32 %v1461_v51, %v1451_v42  ;;  %v3805_v31 = vshrl.u32 %v1229_v59, 5  ;;  %v1460_v22 = vadd.s32 %v1456_v15, %v1452_v7 }
 0x151   : > { %v568_v12 = vmul.f32 %v567_v40, %v565_v61  ;;  %v1464_v6 = vmul.u32 %v3704_v43, %v1410_v16  ;;  %v1231_v8 = vand.u32 31, %v1229_v59  ;;  %v896_v27 = vadd.f32 1.0, %v895_v56  ;;  %v3846_v40 = vpop.permute.xlu2 %205 }
 0x152   : > { %v1463_v28 = vadd.s32 %v1462_v48, %v1453_v47  ;;  %v3808_v11 = vshll.u32 %v1225_v33, 8  ;;  %v3813_v4 = vsel %vm3567_vm9, 0, %v3698_v35  ;;  %vm1466_vm7 = vc.u32 %v3798_v10, %v1460_v22 }
 0x153   : > { %v569_v25 = vxor.u32 2147483648, %v568_v12  ;;  %v1232_v20 = vsub.s32 32, %v1231_v8  ;;  %vm1249_vm13 = vcmp.lt.s32.totalorder %v3805_v31, 1  ;;  %v1234_v7 = vshll.u32 %v4361_v54, %v1231_v8 }
 0x154   : > { %v1467_v38 = vadd.s32 1, %v1463_v28  ;;  %v1237_v43 = vshll.u32 %v4349_v49, %v1231_v8  ;;  %v1240_v15 = vshll.u32 %v4350_v9, %v1231_v8  ;;  %v1243_v0 = vshll.u32 %v4351_v45, %v1231_v8 }
 0x155   : > { %v570_v34 = vsel %vm449_vm11, %v569_v25, %v568_v12  ;;  %v1235_v18 = vshrl.u32 %v4349_v49, %v1232_v20  ;;  %v1238_v35 = vshrl.u32 %v4350_v9, %v1232_v20  ;;  %v1241_v16 = vshrl.u32 %v4351_v45, %v1232_v20 }
 0x156   : > { %v3828_v55 = vsel %vm3792_vm5, %v3491_v46, %v570_v34  ;;  %v1468_v23 = vsel %vm1466_vm7, %v1467_v38, %v1463_v28  ;;  %v1244_v17 = vshrl.u32 %v4352_v36, %v1232_v20  ;;  %v1246_v50 = vshll.u32 %v4352_v36, %v1231_v8 }
 0x157   : > { %v3834_v26 = vmul.f32 %v3828_v55, %v3828_v55  ;;  %v1469_v56 = vadd.s32 %v1468_v23, %v1464_v6  ;;  %v1236_v49 = vor.u32 %v1235_v18, %v1234_v7  ;;  %v1239_v62 = vor.u32 %v1238_v35, %v1237_v43 }
 0x158   : > { %v1242_v9 = vor.u32 %v1241_v16, %v1240_v15  ;;  %v1245_v29 = vor.u32 %v1244_v17, %v1243_v0  ;;  %v1247_v39 = vshrl.u32 %v4353_v37, %v1232_v20  ;;  %vm1252_vm9 = vcmp.lt.s32.totalorder %v3805_v31, 4  ;;  %v210_v17 = vpop.permute.xlu1 %209 }
 0x159   : > { %v583_v42 = vmul.f32 -0.00019511016, %v3834_v26  ;;  %v1470_v51 = vadd.s32 536870912, %v1469_v56  ;;  %v1257_v45 = vsel %vm1249_vm13, %v1236_v49, %v1239_v62  ;;  %vm1250_vm4 = vcmp.lt.s32.totalorder %v3805_v31, 2 }
 0x15a   : > { %v1248_v33 = vor.u32 %v1247_v39, %v1246_v50  ;;  %vm1251_vm14 = vcmp.lt.s32.totalorder %v3805_v31, 3  ;;  %v1258_v61 = vsel %vm1252_vm9, %v1245_v29, 920167782  ;;  %v1261_v47 = vsel %vm1249_vm13, %v1239_v62, %v1242_v9 }
 0x15b   : > { %v584_v36 = vadd.f32 0.008332121, %v583_v42  ;;  %v3848_v37 = vshrl.u32 %v1470_v51, 30  ;;  %v1259_v59 = vsel %vm1251_vm14, %v1242_v9, %v1258_v61  ;;  %v3855_v48 = vmul.f32 %v896_v27, %v3723_v58 }
 0x15c   : > { %v1260_v12 = vsel %vm1250_vm4, %v1257_v45, %v1259_v59  ;;  %v1262_v6 = vsel %vm1252_vm9, %v1248_v33, 1326507024  ;;  %v3862_v8 = vand.u32 3, %v3813_v4  ;;  %v1233_v25 = vshrl.u32 %v4361_v54, %v1232_v20 }
 0x15d   : > { %v1472_v28 = vshll.u32 %v3848_v37, 30  ;;  %v1263_v38 = vsel %vm1251_vm14, %v1245_v29, %v1262_v6  ;;  %v1266_v7 = vand.u32 65535, %v3808_v11  ;;  %v585_v58 = vmul.f32 %v584_v36, %v3834_v26 }
 0x15e   : > { %v1254_v27 = vsel %vm1252_vm9, %v1242_v9, 2102212464  ;;  %v1264_v43 = vsel %vm1250_vm4, %v1261_v47, %v1263_v38  ;;  %v1291_v15 = vshrl.u32 %v1260_v12, 16  ;;  %v1465_v34 = vadd.s32 %v1460_v22, %v3798_v10  ;;  %v3002_v22 = vld [vmem:[%s3063_s15 + $0x10] sm:$0xff]  ;;  %v212_v47 = vpop.permute.xlu2 %211 }
 0x15f   : > { %v3875_v18 = vsub.s32 %v1469_v56, %v1472_v28  ;;  %v1268_v54 = vand.u32 65535, %v1264_v43  ;;  %v1290_v20 = vand.u32 65535, %v1260_v12  ;;  %v3879_v35 = vsel %vm1249_vm13, %v1233_v25, %v1236_v49 }
 0x160   : > { %v1267_v0 = vshrl.u32 %v3808_v11, 16  ;;  %v1269_v23 = vshrl.u32 %v1264_v43, 16  ;;  %v3882_v16 = vmul.u32 %v1291_v15, %v1266_v7  ;;  %v3888_v10 = vsel %vm1251_vm14, %v1239_v62, %v1254_v27 }
 0x161   : > { %vm1474_vm11 = vcmp.lt.s32.totalorder %v3875_v18, 0  ;;  %v1475_v9 = vsub.s32 0, %v3875_v18  ;;  %v263_v56 = vsel %vm3131_vm0, %v210_v17, %v3002_v22  ;;  %v586_v49 = vadd.f32 -0.16666654, %v585_v58 }
 0x162   : > { %v1271_v50 = vmul.u32 %v1269_v23, %v1266_v7  ;;  %v1272_v39 = vmul.u32 %v1268_v54, %v1267_v0  ;;  %v1292_v51 = vmul.u32 %v1290_v20, %v1266_v7  ;;  %v1294_v45 = vmul.u32 %v1290_v20, %v1267_v0 }
 0x163   : > { %v1476_v42 = vsel %vm1474_vm11, %v1475_v9, %v3875_v18  ;;  %v1296_v33 = vshll.u32 %v3882_v16, 16  ;;  %v1270_v36 = vmul.u32 %v1268_v54, %v1266_v7  ;;  %v1273_v59 = vmul.u32 %v1269_v23, %v1267_v0 }
 0x164   : > { %v1477_v61 = vclz %v1476_v42  ;;  %v1274_v62 = vshll.u32 %v1271_v50, 16  ;;  %v1275_v12 = vshrl.u32 %v1271_v50, 16  ;;  %v1276_v6 = vshll.u32 %v1272_v39, 16  ;;  %v216_v42 = vpop.permute.xlu1 %215 }
 0x165   : > { %v1295_v28 = vmul.u32 %v1291_v15, %v1267_v0  ;;  %v1297_v25 = vshrl.u32 %v3882_v16, 16  ;;  %vm1300_vm3 = vc.u32 %v1292_v51, %v1296_v33  ;;  %v1298_v43 = vshll.u32 %v1294_v45, 16 }
 0x166   : > { %v2938_v38 = vadd.s32 4294967294, %v1477_v61  ;;  %vm1278_vm15 = vc.u32 %v1270_v36, %v1274_v62  ;;  %v1280_v58 = vadd.s32 %v1274_v62, %v1270_v36  ;;  %v1301_v20 = vsel %vm1300_vm3, 1, %v4354_v57  ;;  %v3003_v61 = vld [vmem:[%s3063_s15] sm:$0xff]  ;;  %v3004_v36 = vld [vmem:[%s3063_s15 + $0x28] sm:$0xff] }
 0x167   : > { %v1279_v27 = vsel %vm1278_vm15, 1, %v4354_v57  ;;  %v1302_v17 = vadd.s32 %v1296_v33, %v1292_v51  ;;  %v1303_v54 = vadd.s32 %v1301_v20, %v1295_v28  ;;  %v1277_v15 = vshrl.u32 %v1272_v39, 16  ;;  %v3005_v20 = vld [vmem:[%s3063_s15 + $0x18] sm:$0xff] }
 0x168   : > { %vm2939_vm12 = vcmp.lt.s32.totalorder %v2938_v38, 0  ;;  %v1281_v7 = vadd.s32 %v1279_v27, %v1273_v59  ;;  %vm1282_vm6 = vc.u32 %v1280_v58, %v1276_v6  ;;  %vm1373_vm13 = vcmp.lt.s32.totalorder %v3604_v2, 0 }
 0x169   : > { %v1480_v23 = vsel %vm2939_vm12, 0, %v2938_v38  ;;  %v1283_v0 = vsel %vm1282_vm6, 1, %v4354_v57  ;;  %vm1304_vm7 = vc.u32 %v1302_v17, %v1298_v43  ;;  %v271_v50 = vsub.f32 0.0, %v263_v56 }
 0x16a   : > { %v1481_v16 = vsub.s32 32, %v1480_v23  ;;  %v1485_v9 = vsub.s32 4294967266, %v1480_v23  ;;  %v1285_v22 = vadd.s32 %v1283_v0, %v1281_v7  ;;  %v1482_v51 = vshll.u32 %v3875_v18, %v1480_v23 }
 0x16b   : > { %v1305_v33 = vsel %vm1304_vm7, 1, %v4354_v57  ;;  %v261_v39 = vsel %vm3131_vm0, %v3846_v40, %v3003_v61  ;;  %v266_v59 = vsel %vm3131_vm0, %v216_v42, %v3004_v36  ;;  %v1299_v58 = vshrl.u32 %v1294_v45, 16  ;;  %v218_v40 = vpop.permute.xlu2 %217 }
 0x16c   : > { %v1483_v62 = vshrl.u32 %v1465_v34, %v1481_v16  ;;  %v1486_v6 = vadd.s32 127, %v1485_v9  ;;  %v1286_v28 = vadd.s32 %v1285_v22, %v1275_v12  ;;  %v1307_v38 = vadd.s32 %v1305_v33, %v1303_v54 }
 0x16d   : > { %v269_v56 = vsub.f32 0.0, %v261_v39  ;;  %v274_v27 = vsub.f32 0.0, %v266_v59  ;;  %v264_v57 = vsel %vm3131_vm0, %v212_v47, %v3005_v20  ;;  %v587_v61 = vmul.f32 %v586_v49, %v3834_v26  ;;  %v208_v59 = vpop.permute.xlu0 %207 }
 0x16e   : > { %v1484_v18 = vor.u32 %v1483_v62, %v1482_v51  ;;  %v1487_v7 = vshll.u32 %v1486_v6, 23  ;;  %v1287_v23 = vadd.s32 %v1286_v28, %v1277_v15  ;;  %v1308_v0 = vadd.s32 %v1307_v38, %v1297_v25  ;;  %v3006_v28 = vld [vmem:[%s3063_s15 + $0x8] sm:$0xff] }
 0x16f   : > { %v1306_v29 = vadd.s32 %v1302_v17, %v1298_v43  ;;  %v272_v42 = vsub.f32 0.0, %v264_v57  ;;  %v267_v34 = vsel %vm3131_vm0, %v218_v40, %v3741_v63  ;;  %v4366_v45 = vand.u32 2147483647, %v3604_v2 }
 0x170   : > { %v1488_v47 = vor.u32 4788187, %v1487_v7  ;;  %v1256_v25 = vsel %vm1250_vm4, %v3879_v35, %v3888_v10  ;;  %v1309_v54 = vadd.s32 %v1308_v0, %v1299_v58  ;;  %v281_v49 = vmul.f32 1.442695, %v271_v50 }
 0x171   : > { %vm3919_vm9 = vcmp.le.f32.partialorder %v4366_v45, 0.7853982  ;;  %v1491_v43 = vcvt.s32.f32 %v1484_v18  ;;  %vm1312_vm14 = vc.u32 %v1287_v23, %v1306_v29  ;;  %v277_v17 = vmul.f32 1.442695, %v269_v56 }
 0x172   : > { %v287_v15 = vmul.f32 1.442695, %v274_v27  ;;  %v1489_v16 = vand.u32 2147483647, %v1488_v47  ;;  %v1313_v63 = vadd.s32 1, %v1309_v54  ;;  %v275_v9 = vsub.f32 0.0, %v267_v34 }
 0x173   : > { %v422_v22 = vmul.f32 -0.001358992, %v3620_v52  ;;  %v588_v51 = vadd.f32 1.0, %v587_v61  ;;  %v4369_v33 = vsub.s32 4, %v3848_v37  ;;  %v1310_v35 = vmul.u32 %v3808_v11, %v1256_v25 }
 0x174   : > { %v283_v10 = vmul.f32 1.442695, %v272_v42  ;;  %v1492_v50 = vmul.f32 %v1491_v43, %v1489_v16  ;;  %v1314_v39 = vsel %vm1312_vm14, %v1313_v63, %v1309_v54  ;;  %2983 = vpow2.f32 %v281_v49 }
 0x175   : > { %v3933_v31 = vsel %vm1373_vm13, %v4369_v33, %v3848_v37  ;;  %v423_v36 = vadd.f32 0.041655596, %v422_v22  ;;  %v1315_v62 = vadd.s32 %v1314_v39, %v1310_v35  ;;  %2985 = vpow2.f32 %v277_v17 }
 0x176   : > { %v1669_v6 = vadd.s32 3, %v3813_v4  ;;  %v262_v38 = vsel %vm3131_vm0, %v208_v59, %v3006_v28  ;;  %v1493_v58 = vxor.u32 2147483648, %v1492_v50  ;;  %2987 = vpow2.f32 %v287_v15 }
 0x177   : > { %v289_v37 = vmul.f32 1.442695, %v275_v9  ;;  %v424_v56 = vmul.f32 %v423_v36, %v3620_v52  ;;  %v3942_v11 = vmul.f32 %v588_v51, %v3828_v55  ;;  %v3944_v27 = vadd.s32 %v1306_v29, %v1287_v23 }
 0x178   : > { %v1316_v20 = vadd.s32 536870912, %v1315_v62  ;;  %2989 = vpow2.f32 %v283_v10  ;;  %v1494_v57 = vsel %vm1373_vm13, %v1493_v58, %v1492_v50  ;;  %v270_v18 = vsub.f32 0.0, %v262_v38 }
 0x179   : > { %v425_v4 = vadd.f32 -0.4999988, %v424_v56  ;;  %v574_v7 = vsel %vm3792_vm5, 0, %v3803_v32  ;;  %v3954_v0 = vsel %vm3919_vm9, %v3604_v2, %v1494_v57  ;;  %vm438_vm4 = vcmp.lt.s32.totalorder %v3862_v8, 2 }
 0x17a   : > { %v3956_v55 = vshrl.u32 %v1316_v20, 30  ;;  %vm439_vm11 = vcmp.eq.s32.totalorder %v3862_v8, 0  ;;  %v1670_v29 = vand.u32 3, %v1669_v6  ;;  %v3960_v23 = vpop.eup %2983  ;;  %v3964_v40 = vmul.f32 %v3954_v0, %v3954_v0 }
 0x17b   : > { %2991 = vpow2.f32 %v289_v37  ;;  %v426_v53 = vmul.f32 %v425_v4, %v3620_v52  ;;  %vm442_vm5 = vcmp.eq.s32.totalorder %v3862_v8, 2  ;;  %v3968_v32 = vpop.eup %2985  ;;  %v440_v42 = vxor.u32 2147483648, %v3732_v5 }
 0x17c   : > { %v1318_v61 = vshll.u32 %v3956_v55, 30  ;;  %v576_v34 = vmul.f32 -0.001358992, %v3834_v26  ;;  %v3973_v45 = vand.u32 3, %v574_v7  ;;  %v3975_v47 = vpop.eup %2987  ;;  %v1507_v25 = vmul.f32 -0.00019511016, %v3964_v40 }
 0x17d   : > { %v427_v54 = vadd.f32 1.0, %v426_v53  ;;  %vm436_vm15 = vweird.f32 %v3264_v3  ;;  %v279_v52 = vmul.f32 1.442695, %v270_v18  ;;  %v1824_v49 = vadd.s32 3, %v574_v7 }
 0x17e   : > { %v3979_v43 = vpop.eup %2989  ;;  %v3981_v17 = vsub.s32 %v1315_v62, %v1318_v61  ;;  %vm1671_vm3 = vcmp.lt.s32.totalorder %v1670_v29, 2  ;;  %v577_v15 = vadd.f32 0.041655596, %v576_v34  ;;  %v3986_v16 = vsel %vm3681_vm2, 0, %v3737_v41 }
 0x17f   : > { %v1508_v63 = vadd.f32 0.008332121, %v1507_v25  ;;  %v443_v9 = vxor.u32 2147483648, %v427_v54  ;;  %vm1672_vm12 = vcmp.eq.s32.totalorder %v1670_v29, 0  ;;  %vm1675_vm6 = vcmp.eq.s32.totalorder %v1670_v29, 2  ;;  %v222_v29 = vpop.permute.xlu1 %221 }
 0x180   : > { %vm1320_vm7 = vcmp.lt.s32.totalorder %v3981_v17, 0  ;;  %v1321_v22 = vsub.s32 0, %v3981_v17  ;;  %v441_v51 = vsel %vm439_vm11, %v427_v54, %v440_v42  ;;  %v578_v33 = vmul.f32 %v577_v15, %v3834_v26 }
 0x181   : > { %v3993_v35 = vpop.eup %2991  ;;  %v1509_v10 = vmul.f32 %v1508_v63, %v3964_v40  ;;  %v1674_v30 = vsel %vm1672_vm12, %v427_v54, %v440_v42  ;;  %v1825_v41 = vand.u32 3, %v1824_v49  ;;  %v884_v50 = vmul.f32 -0.001358992, %v3727_v60  ;;  %v214_v54 = vpop.permute.xlu0 %213 }
 0x182   : > { %v1322_v39 = vsel %vm1320_vm7, %v1321_v22, %v3981_v17  ;;  %v444_v36 = vsel %vm442_vm5, %v443_v9, %v3732_v5  ;;  %v1677_v59 = vsel %vm1675_vm6, %v443_v9, %v3732_v5  ;;  %v579_v62 = vadd.f32 -0.4999988, %v578_v33 }
 0x183   : > { %vm1219_vm2 = vcmp.lt.s32.totalorder %v3746_v24, 0  ;;  %v1323_v6 = vclz %v1322_v39  ;;  %v1341_v28 = vsub.s32 4, %v3956_v55  ;;  %v445_v38 = vsel %vm438_vm4, %v441_v51, %v444_v36 }
 0x184   : > { %v1678_v58 = vsel %vm1671_vm3, %v1674_v30, %v1677_v59  ;;  %vm590_vm13 = vweird.f32 %v3491_v46  ;;  %v1510_v37 = vadd.f32 -0.16666654, %v1509_v10  ;;  %2993 = vpow2.f32 %v279_v52  ;;  %v3007_v30 = vld [vmem:[%s3104_s20] sm:$0xff] }
 0x185   : > { %v580_v56 = vmul.f32 %v579_v62, %v3834_v26  ;;  %vm592_vm14 = vcmp.lt.s32.totalorder %v3973_v45, 2  ;;  %v2935_v5 = vadd.s32 4294967294, %v1323_v6  ;;  %vm593_vm11 = vcmp.eq.s32.totalorder %v3973_v45, 0 }
 0x186   : > { %vm596_vm5 = vcmp.eq.s32.totalorder %v3973_v45, 2  ;;  %vm1826_vm12 = vcmp.lt.s32.totalorder %v1825_v41, 2  ;;  %v446_v8 = vsel %vm436_vm15, nan, %v445_v38  ;;  %v4016_v20 = vsel %vm436_vm15, nan, %v1678_v58  ;;  %v224_v58 = vpop.permute.xlu2 %223 }
 0x187   : > { %v581_v57 = vadd.f32 1.0, %v580_v56  ;;  %v885_v4 = vadd.f32 0.041655596, %v884_v50  ;;  %vm2936_vm4 = vcmp.lt.s32.totalorder %v2935_v5, 0  ;;  %v594_v26 = vxor.u32 2147483648, %v3942_v11 }
 0x188   : > { %vm1827_vm3 = vcmp.eq.s32.totalorder %v1825_v41, 0  ;;  %vm1830_vm6 = vcmp.eq.s32.totalorder %v1825_v41, 2  ;;  %v1511_v18 = vmul.f32 %v1510_v37, %v3964_v40  ;;  %v1326_v7 = vsel %vm2936_vm4, 0, %v2935_v5  ;;  %v3008_v37 = vld [vmem:[%s3104_s20 + $0x8] sm:$0xff] }
 0x189   : > { %v597_v53 = vxor.u32 2147483648, %v581_v57  ;;  %v886_v61 = vmul.f32 %v885_v4, %v3727_v60  ;;  %v1327_v42 = vsub.s32 32, %v1326_v7  ;;  %v1328_v3 = vshll.u32 %v3981_v17, %v1326_v7 }
 0x18a   : > { %v1331_v34 = vsub.s32 4294967266, %v1326_v7  ;;  %v899_v25 = vand.u32 3, %v3986_v16  ;;  %v4023_v52 = vpop.eup %2993  ;;  %v595_v49 = vsel %vm593_vm11, %v581_v57, %v594_v26  ;;  %v1829_v63 = vsel %vm1827_vm3, %v581_v57, %v594_v26  ;;  %v3009_v57 = vld [vmem:[%s3063_s15 + $0x20] sm:$0xff] }
 0x18b   : > { %v598_v15 = vsel %vm596_vm5, %v597_v53, %v3942_v11  ;;  %v1832_v9 = vsel %vm1830_vm6, %v597_v53, %v3942_v11  ;;  %v1329_v22 = vshrl.u32 %v3944_v27, %v1327_v42  ;;  %v4038_v10 = vsel %vm1219_vm2, %v1341_v28, %v3956_v55  ;;  %v228_v53 = vpop.permute.xlu1 %227 }
 0x18c   : > { %v1332_v51 = vadd.s32 127, %v1331_v34  ;;  %v599_v17 = vsel %vm592_vm14, %v595_v49, %v598_v15  ;;  %v1833_v33 = vsel %vm1826_vm12, %v1829_v63, %v1832_v9  ;;  %v4041_v50 = vmul.f32 %v3007_v30, %v446_v8 }
 0x18d   : > { %v600_v11 = vsel %vm590_vm13, nan, %v599_v17  ;;  %v887_v39 = vadd.f32 -0.4999988, %v886_v61  ;;  %v1330_v27 = vor.u32 %v1329_v22, %v1328_v3  ;;  %v2789_v45 = vmul.f32 %v4016_v20, %v222_v29 }
 0x18e   : > { %v1333_v36 = vshll.u32 %v1332_v51, 23  ;;  %v4048_v41 = vsel %vm590_vm13, nan, %v1833_v33  ;;  %v1512_v59 = vadd.f32 1.0, %v1511_v18  ;;  %vm898_vm15 = vweird.f32 %v3429_v13 }
 0x18f   : > { %v888_v55 = vmul.f32 %v887_v39, %v3727_v60  ;;  %v902_v62 = vxor.u32 2147483648, %v3855_v48  ;;  %v1036_v6 = vsel %vm3313_vm1, 0, %v3470_v1  ;;  %v4370_v28 = vand.u32 2147483647, %v3746_v24 }
 0x190   : > { %v1334_v46 = vor.u32 4788187, %v1333_v36  ;;  %v4063_v56 = vmul.f32 %v3008_v37, %v600_v11  ;;  %vm900_vm13 = vcmp.lt.s32.totalorder %v899_v25, 2  ;;  %v2134_v60 = vadd.s32 3, %v3986_v16  ;;  %v220_v16 = vpop.permute.xlu0 %219 }
 0x191   : > { %vm4058_vm7 = vcmp.le.f32.partialorder %v4370_v28, 0.7853982  ;;  %v2790_v5 = vmul.f32 %v4048_v41, %v224_v58  ;;  %v889_v8 = vadd.f32 1.0, %v888_v55  ;;  %v265_v44 = vsel %vm3131_vm0, %v214_v54, %v3009_v57  ;;  %v4373_v55 = vld [vmem:[#allocation9_spill] sm:$0xff] }
 0x192   : > { %v1038_v1 = vmul.f32 -0.001358992, %v3334_v14  ;;  %v1335_v4 = vand.u32 2147483647, %v1334_v46  ;;  %v1337_v26 = vcvt.s32.f32 %v1330_v27  ;;  %vm901_vm1 = vcmp.eq.s32.totalorder %v899_v25, 0  ;;  %v3010_v46 = vld [vmem:[%s3104_s20 + $0x18] sm:$0xff] }
 0x193   : > { %v2135_v18 = vand.u32 3, %v2134_v60  ;;  %v903_v7 = vsel %vm901_vm1, %v889_v8, %v902_v62  ;;  %v905_v29 = vxor.u32 2147483648, %v889_v8  ;;  %v273_v61 = vsub.f32 0.0, %v265_v44  ;;  %v3011_v57 = vld [vmem:[%s3063_s15 + $0x38] sm:$0xff] }
 0x194   : > { %v1039_v42 = vadd.f32 0.041655596, %v1038_v1  ;;  %v1338_v3 = vmul.f32 %v1337_v26, %v1335_v4  ;;  %vm904_vm14 = vcmp.eq.s32.totalorder %v899_v25, 2  ;;  %v4076_v51 = vmul.f32 %v1512_v59, %v3954_v0 }
 0x195   : > { %vm2137_vm11 = vcmp.eq.s32.totalorder %v2135_v18, 0  ;;  %vm2140_vm5 = vcmp.eq.s32.totalorder %v2135_v18, 2  ;;  %v906_v34 = vsel %vm904_vm14, %v905_v29, %v3855_v48  ;;  %vm2136_vm12 = vcmp.lt.s32.totalorder %v2135_v18, 2 }
 0x196   : > { %v2139_v54 = vsel %vm2137_vm11, %v889_v8, %v902_v62  ;;  %v2142_v49 = vsel %vm2140_vm5, %v905_v29, %v3855_v48  ;;  %v1339_v15 = vxor.u32 2147483648, %v1338_v3  ;;  %v907_v63 = vsel %vm900_vm13, %v903_v7, %v906_v34  ;;  %v4109_v8 = vpop.permute.xlu1 %233 }
 0x197   : > { %v2143_v9 = vsel %vm2136_vm12, %v2139_v54, %v2142_v49  ;;  %v1040_v22 = vmul.f32 %v1039_v42, %v3334_v14  ;;  %v4079_v17 = vadd.f32 %v2789_v45, %v4041_v50  ;;  %v285_v33 = vmul.f32 1.442695, %v273_v61 }
 0x198   : > { %v1053_v30 = vand.u32 3, %v1036_v6  ;;  %v1340_v11 = vsel %vm1219_vm2, %v1339_v15, %v1338_v3  ;;  %v4084_v48 = vadd.f32 %v2790_v5, %v4063_v56  ;;  %v908_v25 = vsel %vm898_vm15, nan, %v907_v63  ;;  %v4114_v26 = vpop.permute.xlu0 %225 }
 0x199   : > { %v1041_v39 = vadd.f32 -0.4999988, %v1040_v22  ;;  %v4091_v0 = vsel %vm4058_vm7, %v3746_v24, %v1340_v11  ;;  %v4095_v27 = vsel %vm898_vm15, nan, %v2143_v9  ;;  %vm1052_vm4 = vweird.f32 %v3137_v21  ;;  %v230_v9 = vpop.permute.xlu2 %229  ;;  %v3012_v11 = vld [vmem:[%s3104_s20 + $0x20] sm:$0xff] }
 0x19a   : > { %v2289_v36 = vadd.s32 3, %v1036_v6  ;;  %v1345_v45 = vmul.f32 %v4091_v0, %v4091_v0  ;;  %v1056_v62 = vxor.u32 2147483648, %v4373_v55  ;;  %v1344_v28 = vsel %vm4058_vm7, 0, %v4038_v10 }
 0x19b   : > { %v1042_v59 = vmul.f32 %v1041_v39, %v3334_v14  ;;  %v4106_v58 = vmul.f32 %v3010_v46, %v908_v25  ;;  %2995 = vpow2.f32 %v285_v33  ;;  %vm1054_vm2 = vcmp.lt.s32.totalorder %v1053_v30, 2 }
 0x19c   : > { %v2290_v13 = vand.u32 3, %v2289_v36  ;;  %v1353_v37 = vmul.f32 -0.00019511016, %v1345_v45  ;;  %v2792_v6 = vmul.f32 %v4095_v27, %v228_v53  ;;  %v1346_v5 = vmul.f32 -0.001358992, %v1345_v45 }
 0x19d   : > { %v1043_v60 = vadd.f32 1.0, %v1042_v59  ;;  %vm1055_vm3 = vcmp.eq.s32.totalorder %v1053_v30, 0  ;;  %v2599_v14 = vadd.s32 3, %v1344_v28  ;;  %v268_v10 = vsel %vm3131_vm0, %v220_v16, %v3011_v57 }
 0x19e   : > { %vm2292_vm6 = vcmp.eq.s32.totalorder %v2290_v13, 0  ;;  %v1354_v38 = vadd.f32 0.008332121, %v1353_v37  ;;  %vm1058_vm15 = vcmp.eq.s32.totalorder %v1053_v30, 2  ;;  %vm2295_vm7 = vcmp.eq.s32.totalorder %v2290_v13, 2  ;;  %v240_v12 = vpop.permute.xlu1 %239 }
 0x19f   : > { %v1057_v44 = vsel %vm1055_vm3, %v1043_v60, %v1056_v62  ;;  %v1059_v1 = vxor.u32 2147483648, %v1043_v60  ;;  %v2294_v4 = vsel %vm2292_vm6, %v1043_v60, %v1056_v62  ;;  %v1347_v18 = vadd.f32 0.041655596, %v1346_v5 }
 0x1a0   : > { %v4116_v7 = vand.u32 3, %v1344_v28  ;;  %v1355_v29 = vmul.f32 %v1354_v38, %v1345_v45  ;;  %vm2291_vm13 = vcmp.lt.s32.totalorder %v2290_v13, 2  ;;  %v276_v54 = vsub.f32 0.0, %v268_v10  ;;  %v4374_v38 = vld [vmem:[#allocation8_spill] sm:$0xff] }
 0x1a1   : > { %v1060_v53 = vsel %vm1058_vm15, %v1059_v1, %v4373_v55  ;;  %v2297_v61 = vsel %vm2295_vm7, %v1059_v1, %v4373_v55  ;;  %v4120_v42 = vpop.eup %2995  ;;  %v1348_v34 = vmul.f32 %v1347_v18, %v1345_v45  ;;  %v2600_v22 = vand.u32 3, %v2599_v14  ;;  %v4150_v14 = vpop.permute.xlu0 %231 }
 0x1a2   : > { %v1061_v3 = vsel %vm1054_vm2, %v1057_v44, %v1060_v53  ;;  %v2298_v16 = vsel %vm2291_vm13, %v2294_v4, %v2297_v61  ;;  %v1356_v49 = vadd.f32 -0.16666654, %v1355_v29  ;;  %v4130_v33 = vadd.f32 %v2792_v6, %v4106_v58  ;;  %v4375_v29 = vld [vmem:[#allocation11_spill] sm:$0xff] }
 0x1a3   : > { %v1062_v15 = vsel %vm1052_vm4, nan, %v1061_v3  ;;  %v4127_v63 = vsel %vm1052_vm4, nan, %v2298_v16  ;;  %v1349_v39 = vadd.f32 -0.4999988, %v1348_v34  ;;  %vm1362_vm1 = vcmp.lt.s32.totalorder %v4116_v7, 2 }
 0x1a4   : > { %v4133_v25 = vmul.f32 %v3012_v11, %v1062_v15  ;;  %v2793_v30 = vmul.f32 %v4127_v63, %v230_v9  ;;  %v1357_v36 = vmul.f32 %v1356_v49, %v1345_v45  ;;  %v1498_v21 = vsel %vm3919_vm9, 0, %v3933_v31 }
 0x1a5   : > { %v1500_v59 = vmul.f32 -0.001358992, %v3964_v40  ;;  %v1350_v55 = vmul.f32 %v1349_v39, %v1345_v45  ;;  %vm1360_vm14 = vweird.f32 %v3746_v24  ;;  %vm1363_vm11 = vcmp.eq.s32.totalorder %v4116_v7, 0 }
 0x1a6   : > { %vm1366_vm5 = vcmp.eq.s32.totalorder %v4116_v7, 2  ;;  %v291_v62 = vmul.f32 1.442695, %v276_v54  ;;  %v1358_v28 = vadd.f32 1.0, %v1357_v36  ;;  %vm2601_vm12 = vcmp.lt.s32.totalorder %v2600_v22, 2 }
 0x1a7   : > { %v1501_v46 = vadd.f32 0.041655596, %v1500_v59  ;;  %v1515_v13 = vand.u32 3, %v1498_v21  ;;  %v4145_v37 = vadd.f32 %v2793_v30, %v4133_v25  ;;  %v1351_v6 = vadd.f32 1.0, %v1350_v55  ;;  %v236_v55 = vpop.permute.xlu2 %235 }
 0x1a8   : > { %vm2602_vm4 = vcmp.eq.s32.totalorder %v2600_v22, 0  ;;  %vm2605_vm9 = vcmp.eq.s32.totalorder %v2600_v22, 2  ;;  %v1359_v31 = vmul.f32 %v1358_v28, %v4091_v0  ;;  %v2754_v60 = vadd.s32 3, %v1498_v21  ;;  %v3013_v28 = vld [vmem:[%s3104_s20 + $0x30] sm:$0xff] }
 0x1a9   : > { %v1502_v45 = vmul.f32 %v1501_v46, %v3964_v40  ;;  %v2774_v5 = vmul.f32 %v4048_v41, %v240_v12  ;;  %v1367_v57 = vxor.u32 2147483648, %v1351_v6  ;;  %2997 = vpow2.f32 %v291_v62  ;;  %v4183_v62 = vpop.permute.xlu0 %237 }
 0x1aa   : > { %v1518_v10 = vxor.u32 2147483648, %v4076_v51  ;;  %v730_v44 = vmul.f32 -0.001358992, %v4374_v38  ;;  %v1364_v1 = vxor.u32 2147483648, %v1359_v31  ;;  %vm1516_vm2 = vcmp.lt.s32.totalorder %v1515_v13, 2 }
 0x1ab   : > { %v1503_v4 = vadd.f32 -0.4999988, %v1502_v45  ;;  %v2782_v18 = vsub.f32 %v4063_v56, %v2774_v5  ;;  %v728_v53 = vsel %vm3457_vm10, 0, %v4375_v29  ;;  %v1368_v41 = vsel %vm1366_vm5, %v1367_v57, %v1359_v31  ;;  %v4378_v5 = vld [vmem:[#allocation12_spill] sm:$0xff]  ;;  %v4379_v29 = vld [vmem:[#allocation7_spill] sm:$0xff] }
 0x1ac   : > { %vm1514_vm3 = vweird.f32 %v3604_v2  ;;  %vm1517_vm6 = vcmp.eq.s32.totalorder %v1515_v13, 0  ;;  %v2755_v61 = vand.u32 3, %v2754_v60  ;;  %v731_v3 = vadd.f32 0.041655596, %v730_v44  ;;  %v4377_v60 = vld [vmem:[#allocation3_spill] sm:$0xff] }
 0x1ad   : > { %v1365_v16 = vsel %vm1363_vm11, %v1351_v6, %v1364_v1  ;;  %v2604_v34 = vsel %vm2602_vm4, %v1351_v6, %v1364_v1  ;;  %v2607_v54 = vsel %vm2605_vm9, %v1367_v57, %v1359_v31  ;;  %v1504_v56 = vmul.f32 %v1503_v4, %v3964_v40  ;;  %v246_v31 = vpop.permute.xlu1 %245 }
 0x1ae   : > { %v1369_v49 = vsel %vm1362_vm1, %v1365_v16, %v1368_v41  ;;  %v2608_v15 = vsel %vm2601_vm12, %v2604_v34, %v2607_v54  ;;  %vm1520_vm10 = vcmp.eq.s32.totalorder %v1515_v13, 2  ;;  %v745_v9 = vand.u32 3, %v728_v53  ;;  %v4381_v34 = vld [vmem:[#allocation5_spill] sm:$0xff] }
 0x1af   : > { %v1370_v11 = vsel %vm1360_vm14, nan, %v1369_v49  ;;  %v4173_v30 = vsel %vm1360_vm14, nan, %v2608_v15  ;;  %v1505_v39 = vadd.f32 1.0, %v1504_v56  ;;  %v2806_v40 = vsel %vm3131_vm0, %v2782_v18, %v4084_v48  ;;  %v4178_v36 = vpop.eup %2997 }
 0x1b0   : > { %vm2756_vm15 = vcmp.lt.s32.totalorder %v2755_v61, 2  ;;  %vm2757_vm7 = vcmp.eq.s32.totalorder %v2755_v61, 0  ;;  %v2814_v7 = vmul.f32 %v4023_v52, %v2806_v40  ;;  %v732_v22 = vmul.f32 %v731_v3, %v4374_v38  ;;  %v3014_v3 = vld [vmem:[%s3104_s20 + $0x38] sm:$0xff] }
 0x1b1   : > { %v1519_v21 = vsel %vm1517_vm6, %v1505_v39, %v1518_v10  ;;  %v1521_v59 = vxor.u32 2147483648, %v1505_v39  ;;  %v2759_v24 = vsel %vm2757_vm7, %v1505_v39, %v1518_v10  ;;  %vm2760_vm13 = vcmp.eq.s32.totalorder %v2755_v61, 2 }
 0x1b2   : > { %v4186_v46 = vmul.f32 %v3013_v28, %v1370_v11  ;;  %v2795_v48 = vmul.f32 %v4173_v30, %v4109_v8  ;;  %v2822_v6 = vadd.f32 1e-08, %v2814_v7  ;;  %v733_v12 = vadd.f32 -0.4999988, %v732_v22  ;;  %v244_v11 = vpop.permute.xlu0 %243 }
 0x1b3   : > { %v1522_v52 = vsel %vm1520_vm10, %v1521_v59, %v4076_v51  ;;  %v2762_v45 = vsel %vm2760_vm13, %v1521_v59, %v4076_v51  ;;  %vm744_vm1 = vweird.f32 %v4377_v60  ;;  %vm746_vm14 = vcmp.lt.s32.totalorder %v745_v9, 2 }
 0x1b4   : > { %v748_v8 = vxor.u32 2147483648, %v4378_v5  ;;  %v1523_v57 = vsel %vm1516_vm2, %v1519_v21, %v1522_v52  ;;  %v2763_v10 = vsel %vm2756_vm15, %v2759_v24, %v2762_v45  ;;  %2830 = vst [vmem:[%s4194_s23 + $0x8] sm:$0xff] %v2822_v6  ;;  %v734_v44 = vmul.f32 %v733_v12, %v4374_v38  ;;  %v242_v24 = vpop.permute.xlu2 %241  ;;  %v4382_v45 = vld [vmem:[#allocation2_spill] sm:$0xff] }
 0x1b5   : > { %v1979_v1 = vadd.s32 3, %v728_v53  ;;  %v1524_v4 = vsel %vm1514_vm3, nan, %v1523_v57  ;;  %v2764_v51 = vsel %vm1514_vm3, nan, %v2763_v10  ;;  %v2777_v18 = vmul.f32 %v4127_v63, %v246_v31  ;;  %v3015_v31 = vld [vmem:[%s3104_s20 + $0x10] sm:$0xff]  ;;  %v252_v60 = vpop.permute.xlu1 %251 }
 0x1b6   : > { %v1190_v41 = vsel %vm3343_vm8, 0, %v4379_v29  ;;  %v735_v13 = vadd.f32 1.0, %v734_v44  ;;  %vm747_vm11 = vcmp.eq.s32.totalorder %v745_v9, 0  ;;  %vm750_vm5 = vcmp.eq.s32.totalorder %v745_v9, 2 }
 0x1b7   : > { %v1980_v61 = vand.u32 3, %v1979_v1  ;;  %v4214_v16 = vmul.f32 %v3014_v3, %v1524_v4  ;;  %v2796_v38 = vmul.f32 %v2764_v51, %v236_v55  ;;  %v2785_v53 = vsub.f32 %v4133_v25, %v2777_v18 }
 0x1b8   : > { %v1192_v54 = vmul.f32 -0.001358992, %v4381_v34  ;;  %v749_v2 = vsel %vm747_vm11, %v735_v13, %v748_v8  ;;  %v751_v56 = vxor.u32 2147483648, %v735_v13  ;;  %v4218_v63 = vand.u32 3, %v1190_v41 }
 0x1b9   : > { %vm1981_vm12 = vcmp.lt.s32.totalorder %v1980_v61, 2  ;;  %vm1982_vm4 = vcmp.eq.s32.totalorder %v1980_v61, 0  ;;  %vm1985_vm9 = vcmp.eq.s32.totalorder %v1980_v61, 2  ;;  %v2809_v49 = vsel %vm3131_vm0, %v2785_v53, %v4145_v37 }
 0x1ba   : > { %v1193_v15 = vadd.f32 0.041655596, %v1192_v54  ;;  %v752_v39 = vsel %vm750_vm5, %v751_v56, %v4378_v5  ;;  %v1984_v25 = vsel %vm1982_vm4, %v735_v13, %v748_v8  ;;  %v1987_v40 = vsel %vm1985_vm9, %v751_v56, %v4378_v5  ;;  %v4383_v5 = vld [vmem:[#allocation10_spill] sm:$0xff] }
 0x1bb   : > { %v2817_v7 = vmul.f32 %v4120_v42, %v2809_v49  ;;  %v4228_v22 = vadd.f32 %v2795_v48, %v4186_v46  ;;  %v753_v21 = vsel %vm746_vm14, %v749_v2, %v752_v39  ;;  %v1988_v59 = vsel %vm1981_vm12, %v1984_v25, %v1987_v40 }
 0x1bc   : > { %v1194_v37 = vmul.f32 %v1193_v15, %v4381_v34  ;;  %v2804_v55 = vadd.f32 %v2796_v38, %v4214_v16  ;;  %v754_v28 = vsel %vm744_vm1, nan, %v753_v21  ;;  %v1989_v6 = vsel %vm744_vm1, nan, %v1988_v59  ;;  %v248_v2 = vpop.permute.xlu2 %247 }
 0x1bd   : > { %v2825_v12 = vadd.f32 1e-08, %v2817_v7  ;;  %v2767_v42 = vmul.f32 %v3015_v31, %v754_v28  ;;  %v2791_v48 = vmul.f32 %v1989_v6, %v4114_v26  ;;  %v2775_v52 = vmul.f32 %v1989_v6, %v242_v24 }
 0x1be   : > { %v1195_v9 = vadd.f32 -0.4999988, %v1194_v37  ;;  %vm1206_vm8 = vweird.f32 %v4382_v45  ;;  %vm1208_vm2 = vcmp.lt.s32.totalorder %v4218_v63, 2  ;;  %v1210_v8 = vxor.u32 2147483648, %v4383_v5 }
 0x1bf   : > { %2833 = vst [vmem:[%s4194_s23 + $0x20] sm:$0xff] %v2825_v12  ;;  %v2444_v57 = vadd.s32 3, %v1190_v41  ;;  %v2773_v10 = vmul.f32 %v4016_v20, %v4183_v62  ;;  %v2799_v44 = vadd.f32 %v2791_v48, %v2767_v42  ;;  %v2783_v1 = vsub.f32 %v2767_v42, %v2775_v52  ;;  %v250_v62 = vpop.permute.xlu0 %249 }
 0x1c0   : > { %v1196_v4 = vmul.f32 %v1195_v9, %v4381_v34  ;;  %v2776_v26 = vmul.f32 %v4095_v27, %v244_v11  ;;  %vm1209_vm3 = vcmp.eq.s32.totalorder %v4218_v63, 0  ;;  %vm1212_vm6 = vcmp.eq.s32.totalorder %v4218_v63, 2 }
 0x1c1   : > { %v2445_v18 = vand.u32 3, %v2444_v57  ;;  %v2781_v29 = vsub.f32 %v4041_v50, %v2773_v10  ;;  %v2807_v0 = vsel %vm3131_vm0, %v2783_v1, %v2799_v44  ;;  %v2780_v13 = vmul.f32 %v2764_v51, %v252_v60 }
 0x1c2   : > { %v1197_v41 = vadd.f32 1.0, %v1196_v4  ;;  %v2784_v20 = vsub.f32 %v4106_v58, %v2776_v26  ;;  %v2815_v61 = vmul.f32 %v3960_v23, %v2807_v0  ;;  %v2779_v23 = vmul.f32 %v4173_v30, %v250_v62 }
 0x1c3   : > { %vm2446_vm10 = vcmp.lt.s32.totalorder %v2445_v18, 2  ;;  %vm2447_vm15 = vcmp.eq.s32.totalorder %v2445_v18, 0  ;;  %vm2450_vm7 = vcmp.eq.s32.totalorder %v2445_v18, 2  ;;  %v2805_v50 = vsel %vm3131_vm0, %v2781_v29, %v4079_v17 }
 0x1c4   : > { %v1211_v27 = vsel %vm1209_vm3, %v1197_v41, %v1210_v8  ;;  %v1213_v3 = vxor.u32 2147483648, %v1197_v41  ;;  %v2449_v38 = vsel %vm2447_vm15, %v1197_v41, %v1210_v8  ;;  %v2823_v53 = vadd.f32 1e-08, %v2815_v61 }
 0x1c5   : > { %v2813_v34 = vmul.f32 %v3968_v32, %v2805_v50  ;;  %v2808_v58 = vsel %vm3131_vm0, %v2784_v20, %v4130_v33  ;;  %v2788_v56 = vsub.f32 %v4214_v16, %v2780_v13  ;;  %v2787_v49 = vsub.f32 %v4186_v46, %v2779_v23  ;;  %v3016_v16 = vld [vmem:[%s3104_s20 + $0x28] sm:$0xff] }
 0x1c6   : > { %v1214_v51 = vsel %vm1212_vm6, %v1213_v3, %v4383_v5  ;;  %v2452_v54 = vsel %vm2450_vm7, %v1213_v3, %v4383_v5  ;;  %v2816_v17 = vmul.f32 %v3979_v43, %v2808_v58  ;;  %2831 = vst [vmem:[%s4194_s23 + $0x10] sm:$0xff] %v2823_v53 }
 0x1c7   : > { %v1215_v32 = vsel %vm1208_vm2, %v1211_v27, %v1214_v51  ;;  %v2453_v33 = vsel %vm2446_vm10, %v2449_v38, %v2452_v54  ;;  %v2821_v30 = vadd.f32 1e-08, %v2813_v34  ;;  %v2812_v43 = vsel %vm3131_vm0, %v2788_v56, %v2804_v55 }
 0x1c8   : > { %v1216_v15 = vsel %vm1206_vm8, nan, %v1215_v32  ;;  %v2454_v11 = vsel %vm1206_vm8, nan, %v2453_v33  ;;  %v2824_v39 = vadd.f32 1e-08, %v2816_v17  ;;  %v2811_v46 = vsel %vm3131_vm0, %v2787_v49, %v4228_v22 }
 0x1c9   : > { %v2770_v63 = vmul.f32 %v3016_v16, %v1216_v15  ;;  %v2794_v25 = vmul.f32 %v2454_v11, %v4150_v14  ;;  %v2778_v40 = vmul.f32 %v2454_v11, %v248_v2  ;;  %2829 = vst [vmem:[%s4194_s23] sm:$0xff] %v2821_v30  ;;  %v2819_v7 = vmul.f32 %v3993_v35, %v2811_v46 }
 0x1ca   : > { %2832 = vst [vmem:[%s4194_s23 + $0x18] sm:$0xff] %v2824_v39  ;;  %v2820_v21 = vmul.f32 %v4178_v36, %v2812_v43 }
 0x1cb   : > { %v2802_v59 = vadd.f32 %v2794_v25, %v2770_v63  ;;  %v2786_v24 = vsub.f32 %v2770_v63, %v2778_v40  ;;  %v2827_v37 = vadd.f32 1e-08, %v2819_v7 }
 0x1cc   : > { %v2828_v55 = vadd.f32 1e-08, %v2820_v21 }
 0x1cd   : > { %v2810_v28 = vsel %vm3131_vm0, %v2786_v24, %v2802_v59  ;;  %2835 = vst [vmem:[%s4194_s23 + $0x30] sm:$0xff] %v2827_v37 }
 0x1ce   : > { %v2818_v14 = vmul.f32 %v3975_v47, %v2810_v28  ;;  %2836 = vst [vmem:[%s4194_s23 + $0x38] sm:$0xff] %v2828_v55 }
 0x1d0   : > { %v2826_v6 = vadd.f32 1e-08, %v2818_v14 }
 0x1d2   : > { %2834 = vst [vmem:[%s4194_s23 + $0x28] sm:$0xff] %v2826_v6 }
 0x1d3 PF: > { %s12_s9 = sadd.s32 1, %s3023_s9  }
 0x1d4   : > { %p9_p4 = scmp.ge.s32.totalorder %s12_s9, 4  }
 0x1d6   :  { %11 = sbr.rel (!%p9_p4) target bundleno = 1 (0x1), region = 61 }

// kernel: darpe_forward.2
= control target key start
LH: loop header
LB: loop body
LE: loop exit
PB: predicated region body
PF: predicated region fallthrough
CT: control target
= control target key end

     0   :  { %s1150_s21 = smov 0   ;;  %s1152_s22 = smov 0   ;;  %s1614_s0 = inlined_call_operand.vmem [shape: f32[64,256], index: 0, kind: input, shape index: {}]   ;;  %s1615_s1 = inlined_call_operand.vmem [shape: f32[32,256], index: 1, kind: input, shape index: {}]   ;;  %s1616_s2 = inlined_call_operand.vmem [shape: bf16[32,32], index: 2, kind: input, shape index: {}]   ;;  %s1617_s3 = inlined_call_operand.vmem [shape: f32[32,1], index: 3, kind: input, shape index: {}]   ;;  %s1618_s4 = inlined_call_operand.vmem [shape: bf16[32,32], index: 4, kind: input, shape index: {}]   ;;  %s1619_s5 = inlined_call_operand.vmem [shape: f32[32,1], index: 5, kind: input, shape index: {}]   ;;  %s1620_s6 = inlined_call_operand.vmem [shape: f32[64,256], index: 6, kind: output, shape index: {}]  }
   0x1   :  { %s1154_s23 = smov 0  }
   0x2 LB: > { %s25_s24 = sadd.s32 1, %s1107_s22  ;;  %p973_p0 = scmp.ge.s32.totalorder %s1111_s23, 1  ;;  %s1111_s23 = sphi %s1154_s23, %s16_s23   ;;  %s1107_s22 = sphi %s1152_s22, %s1652_s22   ;;  %s1103_s21 = sphi %s1150_s21, %s1651_s21  }
   0x3   : > { %p26_p1 = scmp.ge.s32.totalorder %s25_s24, 2  ;;  %p246_p2 = scmp.lt.s32.totalorder %s1111_s23, 3 }
   0x5   : > { %s1654_s24 = smov (%p26_p1, %s25_s24), 0  ;;  %p247_p3 = pnand %p973_p0, %p246_p2 }
   0x6   : > { %s974_s25 = sshll.u32 (!%p247_p3), %s1103_s21, 2 }
   0x7   : > { %250 = sbr.rel (%p247_p3) target bundleno = 421 (0x1a5), region = 44  ;;  %p293_p4 = scmp.lt.s32.totalorder (!%p247_p3), %s974_s25, 7 }
   0xc   : > { %v340_v0 = vld [vmem:[%s1617_s3 + $0x10] sm:$0xff]  ;;  %v338_v1 = vld [vmem:[%s1617_s3] sm:$0xff]  ;;  %v1113_v2 = vmov 0   ;;  %s1656_s25 = smov (!%p293_p4, %s974_s25), 7  ;;  %v341_v3 = vld [vmem:[%s1617_s3 + $0x18] sm:$0xff]  ;;  %vm1621_vm0 = vcmask 261120  }
   0xd   : > { %1039 = vset.pattern.permute.xlu1 %v1113_v2  ;;  %1038 = vset.pattern.permute.xlu0 %v1113_v2  ;;  %s1006_s30 = sshll.u32 %s1656_s25, 4  ;;  %v339_v4 = vld [vmem:[%s1617_s3 + $0x8] sm:$0xff]  ;;  %v1008_v17 = vld [vmem:[%s1616_s2] sm:$0xff]  ;;  %v747_v18 = vld [vmem:[%s1619_s5 + $0x10] sm:$0xff]  ;;  %v1622_v61 = vmov 1.0  }
   0xe   : > { %354 = vperm.xlu0 %1038, %v340_v0   ;;  %344 = vperm.xlu1 %1039, %v338_v1   ;;  %s300_s9 = scalar_lea.vmem %s1614_s0, %s1006_s30  ;;  %v748_v19 = vld [vmem:[%s1619_s5 + $0x18] sm:$0xff]  ;;  %v1009_v20 = vld [vmem:[%s1616_s2 + $0x8] sm:$0xff]  ;;  %s1574_s15 = scalar_lea.vmem %s1620_s6, %s1006_s30 }
   0xf   : > { %1040 = vset.pattern.permute.xlu2 %v1113_v2  ;;  %v326_v5 = vld [vmem:[%s300_s9 + $0x20] sm:$0xff]  ;;  %v328_v6 = vld [vmem:[%s300_s9 + $0x30] sm:$0xff]  ;;  %v327_v7 = vld [vmem:[%s300_s9 + $0x28] sm:$0xff] }
  0x10   : > { %v332_v8 = vpack.c.bf16 %v328_v6, %v326_v5  ;;  %v329_v9 = vld [vmem:[%s300_s9 + $0x38] sm:$0xff]  ;;  %v322_v10 = vld [vmem:[%s300_s9] sm:$0xff]  ;;  %v324_v11 = vld [vmem:[%s300_s9 + $0x10] sm:$0xff] }
  0x11   : > { %v333_v12 = vpack.c.bf16 %v329_v9, %v327_v7  ;;  %v323_v13 = vld [vmem:[%s300_s9 + $0x8] sm:$0xff]  ;;  %v325_v14 = vld [vmem:[%s300_s9 + $0x18] sm:$0xff]  ;;  %v330_v15 = vpack.c.bf16 %v324_v11, %v322_v10 }
  0x12   : > { %385 = vmatpush.bf16.msra.mxu0 %v332_v8  ;;  %v331_v16 = vpack.c.bf16 %v325_v14, %v323_v13 }
  0x13   : > { %404 = vmatpush.bf16.msra.mxu1 %v333_v12 }
  0x16   : > { %359 = vperm.xlu0 %1038, %v341_v3   ;;  %349 = vperm.xlu1 %1039, %v339_v4  }
  0x17   : > { %386 = vmatpush.bf16.msra.mxu0 %v330_v15  ;;  %405 = vmatpush.bf16.msra.mxu1 %v331_v16 }
  0x1a   : > { %988 = vmatmul.msk.bf16.vlgmr.msra.gmra.mxu0 %vm1621_vm0, %v1008_v17  ;;  %990 = vmatmul.msk.bf16.vlgmr.msra.gmra.mxu1 %vm1621_vm0, %v1008_v17 }
  0x1e   : > { %761 = vperm.xlu0 %1038, %v747_v18   ;;  %766 = vperm.xlu1 %1039, %v748_v19  }
  0x2a   : > { %989 = vmatmul.msk.bf16.gmra.mxu0 %vm1621_vm0, %v1009_v20  ;;  %991 = vmatmul.msk.bf16.gmra.mxu1 %vm1621_vm0, %v1009_v20 }
  0x80   : > { %v345_v21 = vpop.permute.xlu1 %344  ;;  %v355_v43 = vpop.permute.xlu0 %354 }
  0x88   : > { %v350_v30 = vpop.permute.xlu1 %349  ;;  %v360_v6 = vpop.permute.xlu0 %359 }
  0x97   : > { %v388_v22 = vpop.f32.mrf.mxu0  ;;  %v407_v24 = vpop.f32.mrf.mxu1 }
  0x98   : > { %v1204_v23 = vadd.f32 %v388_v22, %v345_v21  ;;  %v1206_v25 = vadd.f32 %v407_v24, %v345_v21 }
  0x9a   : > { %v425_v26 = vmul.f32 0.70710677, %v1204_v23  ;;  %v1210_v27 = vmul.f32 0.70710677, %v1206_v25 }
  0x9c   : > { %v449_v28 = vand.u32 2147483647, %v425_v26  ;;  %v450_v29 = vand.u32 2147483647, %v1210_v27  ;;  %vm433_vm1 = vcmp.lt.f32.partialorder %v425_v26, 0.0 }
  0x9d   : > { %v1239_v62 = vsel %vm433_vm1, -1.0, %v1622_v61 }
  0x9e   : > { %v457_v31 = vmul.f32 0.3275911, %v449_v28  ;;  %v458_v32 = vmul.f32 0.3275911, %v450_v29  ;;  %v665_v39 = vsub.f32 0.0, %v449_v28  ;;  %v666_v40 = vsub.f32 0.0, %v450_v29 }
  0x9f   : > { %v390_v33 = vpop.f32.mrf.mxu0  ;;  %v409_v36 = vpop.f32.mrf.mxu1 }
  0xa0   : > { %v1213_v34 = vadd.f32 1.0, %v457_v31  ;;  %v391_v35 = vadd.f32 %v390_v33, %v350_v30  ;;  %v1215_v37 = vadd.f32 1.0, %v458_v32  ;;  %v1217_v38 = vadd.f32 %v409_v36, %v350_v30 }
  0xa1   : > { %v673_v45 = vmul.f32 %v665_v39, %v449_v28  ;;  %v674_v47 = vmul.f32 %v666_v40, %v450_v29 }
  0xa2   : > { %v427_v41 = vmul.f32 0.70710677, %v391_v35  ;;  %1041 = vrcp.f32 %v1213_v34  ;;  %v1221_v42 = vmul.f32 0.70710677, %v1217_v38  ;;  %v1249_v4 = vmul.f32 0.5, %v391_v35 }
  0xa3   : > { %1043 = vrcp.f32 %v1215_v37  ;;  %v681_v56 = vmul.f32 1.442695, %v673_v45  ;;  %v683_v60 = vmul.f32 1.442695, %v674_v47  ;;  %v482_v9 = vand.u32 2147483647, %v1213_v34 }
  0xa4   : > { %v451_v44 = vand.u32 2147483647, %v427_v41  ;;  %v452_v46 = vand.u32 2147483647, %v1221_v42  ;;  %vm435_vm2 = vcmp.lt.f32.partialorder %v427_v41, 0.0  ;;  %v484_v10 = vand.u32 2147483648, %v1213_v34 }
  0xa5   : > { %v1258_v11 = vsel %vm435_vm2, -1.0, %v1622_v61  ;;  %v497_v45 = vand.u32 2147483647, %v1215_v37  ;;  %vm478_vm4 = vweird.f32 %v1213_v34  ;;  %vm1318_vm5 = vcmp.eq.f32.partialorder %v482_v9, 8.507059e+37 }
  0xa6   : > { %v459_v48 = vmul.f32 0.3275911, %v451_v44  ;;  %v460_v50 = vmul.f32 0.3275911, %v452_v46  ;;  %v667_v53 = vsub.f32 0.0, %v451_v44  ;;  %v668_v63 = vsub.f32 0.0, %v452_v46 }
  0xa7   : > { %v393_v49 = vpop.f32.mrf.mxu0  ;;  %v412_v51 = vpop.f32.mrf.mxu1  ;;  %v1282_v40 = vor.u32 1.1754944e-38, %v484_v10 }
  0xa8   : > { %v1225_v52 = vadd.f32 1.0, %v459_v48  ;;  %v1227_v54 = vadd.f32 %v393_v49, %v355_v43  ;;  %v1229_v55 = vpop.eup %1041  ;;  %v1231_v57 = vadd.f32 1.0, %v460_v50  ;;  %v1233_v58 = vadd.f32 %v412_v51, %v355_v43 }
  0xa9   : > { %v1235_v59 = vpop.eup %1043  ;;  %v474_v0 = vmul.f32 %v1229_v55, %v1213_v34  ;;  %v675_v1 = vmul.f32 %v667_v53, %v451_v44  ;;  %v676_v12 = vmul.f32 %v668_v63, %v452_v46  ;;  %vm479_vm3 = vweird.f32 %v1229_v55 }
  0xaa   : > { %1045 = vrcp.f32 %v1225_v52  ;;  %v1245_v2 = vmul.f32 0.70710677, %v1227_v54  ;;  %v489_v3 = vmul.f32 %v1235_v59, %v1215_v37  ;;  %v1252_v5 = vmul.f32 0.70710677, %v1233_v58  ;;  %vm1352_vm13 = vmor %vm478_vm4, %vm479_vm3 }
  0xab   : > { %1047 = vrcp.f32 %v1231_v57  ;;  %v475_v17 = vsub.f32 1.0, %v474_v0  ;;  %v685_v18 = vmul.f32 1.442695, %v675_v1  ;;  %v1289_v46 = vmul.f32 1.442695, %v676_v12 }
  0xac   : > { %1049 = vpow2.f32 %v681_v56  ;;  %v453_v7 = vand.u32 2147483647, %v1245_v2  ;;  %v454_v13 = vand.u32 2147483647, %v1252_v5  ;;  %v490_v22 = vsub.f32 1.0, %v489_v3 }
  0xad   : > { %1051 = vpow2.f32 %v683_v60  ;;  %v476_v43 = vmul.f32 %v1229_v55, %v475_v17  ;;  %v512_v3 = vand.u32 2147483647, %v1225_v52  ;;  %vm508_vm9 = vweird.f32 %v1225_v52 }
  0xae   : > { %v461_v19 = vmul.f32 0.3275911, %v453_v7  ;;  %v669_v20 = vsub.f32 0.0, %v453_v7  ;;  %v462_v26 = vmul.f32 0.3275911, %v454_v13  ;;  %v670_v28 = vsub.f32 0.0, %v454_v13 }
  0xaf   : > { %v395_v8 = vpop.f32.mrf.mxu0  ;;  %v414_v15 = vpop.f32.mrf.mxu1  ;;  %v1294_v49 = vmul.f32 %v1235_v59, %v490_v22  ;;  %v1306_v1 = vadd.f32 %v1229_v55, %v476_v43  ;;  %vm493_vm4 = vweird.f32 %v1215_v37 }
  0xb0   : > { %v1261_v14 = vadd.f32 %v395_v8, %v360_v6  ;;  %v1263_v16 = vpop.eup %1045  ;;  %v1269_v29 = vadd.f32 1.0, %v461_v19  ;;  %v677_v30 = vmul.f32 %v669_v20, %v453_v7  ;;  %v1274_v32 = vadd.f32 %v414_v15, %v360_v6 }
  0xb1   : > { %v1265_v21 = vpop.eup %1047  ;;  %v504_v24 = vmul.f32 %v1263_v16, %v1225_v52  ;;  %v1280_v36 = vadd.f32 1.0, %v462_v26  ;;  %v678_v39 = vmul.f32 %v670_v28, %v454_v13 }
  0xb2   : > { %v1272_v31 = vmul.f32 0.70710677, %v1261_v14  ;;  %v1276_v33 = vpop.eup %1049  ;;  %v519_v35 = vmul.f32 %v1265_v21, %v1231_v57  ;;  %1053 = vrcp.f32 %v1269_v29  ;;  %v689_v47 = vmul.f32 1.442695, %v677_v30 }
  0xb3   : > { %v1284_v41 = vpop.eup %1051  ;;  %v505_v44 = vsub.f32 1.0, %v504_v24  ;;  %1055 = vrcp.f32 %v1280_v36  ;;  %v691_v50 = vmul.f32 1.442695, %v678_v39  ;;  %v1297_v51 = vmul.f32 0.70710677, %v1274_v32 }
  0xb4   : > { %v455_v48 = vand.u32 2147483647, %v1272_v31  ;;  %1057 = vpow2.f32 %v685_v18  ;;  %v520_v53 = vsub.f32 1.0, %v519_v35  ;;  %v542_v8 = vand.u32 2147483647, %v1269_v29 }
  0xb5   : > { %v1302_v63 = vmul.f32 %v1263_v16, %v505_v44  ;;  %v456_v0 = vand.u32 2147483647, %v1297_v51  ;;  %1059 = vpow2.f32 %v689_v47  ;;  %v544_v15 = vand.u32 2147483648, %v1269_v29 }
  0xb6   : > { %v463_v56 = vmul.f32 0.3275911, %v455_v48  ;;  %v671_v60 = vsub.f32 0.0, %v455_v48  ;;  %1061 = vpow2.f32 %v691_v50  ;;  %v1314_v18 = vmul.f32 %v1265_v21, %v520_v53 }
  0xb7   : > { %v464_v12 = vmul.f32 0.3275911, %v456_v0  ;;  %v672_v13 = vsub.f32 0.0, %v456_v0  ;;  %vm538_vm6 = vweird.f32 %v1269_v29  ;;  %vm1328_vm7 = vcmp.eq.f32.partialorder %v542_v8, 8.507059e+37 }
  0xb8   : > { %v1309_v6 = vadd.f32 1.0, %v463_v56  ;;  %v679_v7 = vmul.f32 %v671_v60, %v455_v48  ;;  %v1054_v10 = vpop.eup %1053  ;;  %vm553_vm8 = vweird.f32 %v1280_v36  ;;  %v545_v44 = vor.u32 1.1754944e-38, %v544_v15 }
  0xb9   : > { %v1056_v17 = vpop.eup %1055  ;;  %v534_v19 = vmul.f32 %v1054_v10, %v1269_v29  ;;  %v1325_v28 = vadd.f32 1.0, %v464_v12  ;;  %v680_v30 = vmul.f32 %v672_v13, %v456_v0  ;;  %vm539_vm10 = vweird.f32 %v1054_v10 }
  0xba   : > { %1063 = vrcp.f32 %v1309_v6  ;;  %v693_v20 = vmul.f32 1.442695, %v679_v7  ;;  %v1322_v24 = vpop.eup %1057  ;;  %v549_v26 = vmul.f32 %v1056_v17, %v1280_v36  ;;  %v574_v43 = vand.u32 2147483648, %v1309_v6  ;;  %vm540_vm14 = vmor %vm538_vm6, %vm539_vm10 }
  0xbb   : > { %v535_v35 = vsub.f32 1.0, %v534_v19  ;;  %1065 = vrcp.f32 %v1325_v28  ;;  %v572_v47 = vand.u32 2147483647, %v1309_v6  ;;  %v1337_v48 = vpop.eup %1059  ;;  %v557_v53 = vand.u32 2147483647, %v1280_v36 }
  0xbc   : > { %v550_v9 = vsub.f32 1.0, %v549_v26  ;;  %1067 = vpow2.f32 %v693_v20  ;;  %v1340_v56 = vpop.eup %1061  ;;  %v1342_v60 = vmul.f32 1.442695, %v680_v30  ;;  %vm568_vm11 = vweird.f32 %v1309_v6 }
  0xbd   : > { %v536_v50 = vmul.f32 %v1054_v10, %v535_v35  ;;  %vm554_vm12 = vweird.f32 %v1056_v17  ;;  %v559_v7 = vand.u32 2147483648, %v1280_v36  ;;  %v575_v13 = vor.u32 1.1754944e-38, %v574_v43 }
  0xbe   : > { %v551_v0 = vmul.f32 %v1056_v17, %v550_v9  ;;  %v587_v15 = vand.u32 2147483647, %v1325_v28  ;;  %v589_v19 = vand.u32 2147483648, %v1325_v28  ;;  %vm1360_vm1 = vcmp.eq.f32.partialorder %v572_v47, 8.507059e+37  ;;  %vm555_vm0 = vmor %vm553_vm8, %vm554_vm12 }
  0xbf   : > { %v537_v12 = vadd.f32 %v1054_v10, %v536_v50  ;;  %vm1364_vm2 = vcmp.eq.f32.partialorder %v557_v53, 8.507059e+37  ;;  %vm583_vm3 = vweird.f32 %v1325_v28  ;;  %v560_v29 = vor.u32 1.1754944e-38, %v559_v7 }
  0xc0   : > { %v1064_v8 = vpop.eup %1063  ;;  %v552_v35 = vadd.f32 %v1056_v17, %v551_v0  ;;  %v590_v9 = vor.u32 1.1754944e-38, %v589_v19  ;;  %v481_v47 = vsel %vm1352_vm13, %v1229_v55, %v1306_v1  ;;  %vm1394_vm8 = vcmp.eq.f32.partialorder %v587_v15, 8.507059e+37 }
  0xc1   : > { %v564_v26 = vmul.f32 %v1064_v8, %v1309_v6  ;;  %vm569_vm15 = vweird.f32 %v1064_v8  ;;  %v541_v34 = vsel %vm540_vm14, %v1054_v10, %v537_v12  ;;  %v1066_v50 = vpop.eup %1065  ;;  %v1384_v10 = vsel %vm1318_vm5, %v1282_v40, %v481_v47 }
  0xc2   : > { %v1379_v0 = vsel %vm1328_vm7, %v545_v44, %v541_v34  ;;  %v556_v61 = vsel %vm555_vm0, %v1056_v17, %v552_v35  ;;  %v1386_v36 = vpop.eup %1067  ;;  %v579_v7 = vmul.f32 %v1066_v50, %v1325_v28  ;;  %vm584_vm6 = vweird.f32 %v1066_v50  ;;  %vm570_vm10 = vmor %vm568_vm11, %vm569_vm15 }
  0xc3   : > { %v565_v53 = vsub.f32 1.0, %v564_v26  ;;  %v597_v12 = vmul.f32 1.0614054, %v1379_v0  ;;  %v1392_v55 = vsel %vm1364_vm2, %v560_v29, %v556_v61  ;;  %v507_v40 = vadd.f32 %v1263_v16, %v1302_v63  ;;  %vm585_vm11 = vmor %vm583_vm3, %vm584_vm6 }
  0xc4   : > { %v598_v22 = vmul.f32 1.0614054, %v1392_v55  ;;  %vm509_vm0 = vweird.f32 %v1263_v16  ;;  %v580_v39 = vsub.f32 1.0, %v579_v7  ;;  %vm1410_vm7 = vcmp.eq.f32.partialorder %v512_v3, 8.507059e+37 }
  0xc5   : > { %v566_v17 = vmul.f32 %v1064_v8, %v565_v53  ;;  %v605_v44 = vadd.f32 -1.4531521, %v597_v12  ;;  %vm1404_vm5 = vmor %vm508_vm9, %vm509_vm0  ;;  %v514_v19 = vand.u32 2147483648, %v1225_v52  ;;  %v593_v35 = vmul.f32 1.0614054, %v1384_v10 }
  0xc6   : > { %v606_v63 = vadd.f32 -1.4531521, %v598_v22  ;;  %v511_v26 = vsel %vm1404_vm5, %v1263_v16, %v507_v40  ;;  %vm523_vm9 = vweird.f32 %v1231_v57  ;;  %v581_v43 = vmul.f32 %v1066_v50, %v580_v39 }
  0xc7   : > { %v567_v20 = vadd.f32 %v1064_v8, %v566_v17  ;;  %v613_v3 = vmul.f32 %v605_v44, %v1379_v0  ;;  %v515_v34 = vor.u32 1.1754944e-38, %v514_v19  ;;  %v492_v52 = vadd.f32 %v1235_v59, %v1294_v49 }
  0xc8   : > { %v614_v47 = vmul.f32 %v606_v63, %v1392_v55  ;;  %v601_v53 = vadd.f32 -1.4531521, %v593_v35  ;;  %vm494_vm12 = vweird.f32 %v1235_v59  ;;  %v582_v6 = vadd.f32 %v1066_v50, %v581_v43 }
  0xc9   : > { %v571_v29 = vsel %vm570_vm10, %v1064_v8, %v567_v20  ;;  %v621_v7 = vadd.f32 1.4214138, %v613_v3  ;;  %v1437_v12 = vsel %vm1410_vm7, %v515_v34, %v511_v26  ;;  %vm1444_vm13 = vmor %vm493_vm4, %vm494_vm12  ;;  %vm1454_vm14 = vcmp.eq.f32.partialorder %v497_v45, 8.507059e+37 }
  0xca   : > { %v1430_v16 = vsel %vm1360_vm1, %v575_v13, %v571_v29  ;;  %v622_v8 = vadd.f32 1.4214138, %v614_v47  ;;  %v595_v17 = vmul.f32 1.0614054, %v1437_v12  ;;  %v609_v22 = vmul.f32 %v601_v53, %v1384_v10 }
  0xcb   : > { %v599_v49 = vmul.f32 1.0614054, %v1430_v16  ;;  %v629_v28 = vmul.f32 %v621_v7, %v1379_v0  ;;  %v586_v30 = vsel %vm585_vm11, %v1066_v50, %v582_v6  ;;  %v496_v40 = vsel %vm1444_vm13, %v1235_v59, %v492_v52 }
  0xcc   : > { %v1460_v61 = vsel %vm1394_vm8, %v590_v9, %v586_v30  ;;  %v630_v15 = vmul.f32 %v622_v8, %v1392_v55  ;;  %v603_v19 = vadd.f32 -1.4531521, %v595_v17  ;;  %v617_v63 = vadd.f32 1.4214138, %v609_v22 }
  0xcd   : > { %v607_v44 = vadd.f32 -1.4531521, %v599_v49  ;;  %v637_v20 = vadd.f32 -0.28449672, %v629_v28  ;;  %v600_v50 = vmul.f32 1.0614054, %v1460_v61  ;;  %v522_v59 = vadd.f32 %v1265_v21, %v1314_v18 }
  0xce   : > { %vm437_vm15 = vcmp.lt.f32.partialorder %v1245_v2, 0.0  ;;  %v638_v26 = vadd.f32 -0.28449672, %v630_v15  ;;  %v611_v35 = vmul.f32 %v603_v19, %v1437_v12  ;;  %v499_v9 = vand.u32 2147483648, %v1215_v37 }
  0xcf   : > { %v615_v45 = vmul.f32 %v607_v44, %v1430_v16  ;;  %v645_v1 = vmul.f32 %v637_v20, %v1379_v0  ;;  %v608_v3 = vadd.f32 -1.4531521, %v600_v50  ;;  %v625_v43 = vmul.f32 %v617_v63, %v1384_v10 }
  0xd0   : > { %vm524_vm1 = vweird.f32 %v1265_v21  ;;  %v646_v52 = vmul.f32 %v638_v26, %v1392_v55  ;;  %v619_v18 = vadd.f32 1.4214138, %v611_v35  ;;  %v500_v29 = vor.u32 1.1754944e-38, %v499_v9 }
  0xd1   : > { %v623_v34 = vadd.f32 1.4214138, %v615_v45  ;;  %vm1476_vm2 = vmor %vm523_vm9, %vm524_vm1  ;;  %v653_v53 = vadd.f32 0.2548296, %v645_v1  ;;  %v616_v37 = vmul.f32 %v608_v3, %v1460_v61  ;;  %v633_v7 = vadd.f32 -0.28449672, %v625_v43 }
  0xd2   : > { %v526_v6 = vsel %vm1476_vm2, %v1265_v21, %v522_v59  ;;  %vm438_vm3 = vcmp.lt.f32.partialorder %v1252_v5, 0.0  ;;  %v654_v8 = vadd.f32 0.2548296, %v646_v52  ;;  %v627_v17 = vmul.f32 %v619_v18, %v1437_v12 }
  0xd3   : > { %v631_v49 = vmul.f32 %v623_v34, %v1430_v16  ;;  %v1489_v22 = vsel %vm1454_vm14, %v500_v29, %v496_v40  ;;  %v661_v13 = vmul.f32 %v653_v53, %v1379_v0  ;;  %v624_v28 = vadd.f32 1.4214138, %v616_v37 }
  0xd4   : > { %v641_v30 = vmul.f32 %v633_v7, %v1384_v10  ;;  %v527_v44 = vand.u32 2147483647, %v1231_v57  ;;  %v662_v21 = vmul.f32 %v654_v8, %v1392_v55  ;;  %v635_v19 = vadd.f32 -0.28449672, %v627_v17 }
  0xd5   : > { %v639_v15 = vadd.f32 -0.28449672, %v631_v49  ;;  %v529_v20 = vand.u32 2147483648, %v1231_v57  ;;  %v701_v50 = vmul.f32 %v1337_v48, %v661_v13  ;;  %v632_v63 = vmul.f32 %v624_v28, %v1460_v61 }
  0xd6   : > { %v649_v39 = vadd.f32 0.2548296, %v641_v30  ;;  %vm528_vm4 = vcmp.eq.f32.partialorder %v527_v44, 8.507059e+37  ;;  %v702_v0 = vmul.f32 %v1340_v56, %v662_v21  ;;  %v643_v59 = vmul.f32 %v635_v19, %v1437_v12 }
  0xd7   : > { %v647_v40 = vmul.f32 %v639_v15, %v1430_v16  ;;  %v530_v45 = vor.u32 1.1754944e-38, %v529_v20  ;;  %v709_v26 = vsub.f32 1.0, %v701_v50  ;;  %v640_v35 = vadd.f32 -0.28449672, %v632_v63 }
  0xd8   : > { %v657_v55 = vmul.f32 %v649_v39, %v1384_v10  ;;  %v594_v9 = vmul.f32 1.0614054, %v1489_v22  ;;  %1069 = vpow2.f32 %v1342_v60  ;;  %v651_v48 = vadd.f32 0.2548296, %v643_v59 }
  0xd9   : > { %v655_v57 = vadd.f32 0.2548296, %v647_v40  ;;  %v1504_v1 = vsel %vm528_vm4, %v530_v45, %v526_v6  ;;  %v1646_v3 = vmov 1.0   ;;  %v648_v56 = vmul.f32 %v640_v35, %v1460_v61 }
  0xda   : > { %v445_v43 = vsel %vm437_vm15, -1.0, %v1646_v3  ;;  %v697_v34 = vmul.f32 %v1276_v33, %v657_v55  ;;  %v596_v52 = vmul.f32 1.0614054, %v1504_v1  ;;  %vm439_vm6 = vcmp.lt.f32.partialorder %v1272_v31, 0.0 }
  0xdb   : > { %v663_v10 = vmul.f32 %v655_v57, %v1430_v16  ;;  %v659_v60 = vmul.f32 %v651_v48, %v1437_v12  ;;  %v602_v18 = vadd.f32 -1.4531521, %v594_v9  ;;  %v717_v29 = vmul.f32 %v709_v26, %v445_v43 }
  0xdc   : > { %v656_v47 = vadd.f32 0.2548296, %v648_v56  ;;  %v710_v53 = vsub.f32 1.0, %v702_v0  ;;  %v604_v37 = vadd.f32 -1.4531521, %v596_v52  ;;  %v705_v6 = vsub.f32 1.0, %v697_v34 }
  0xdd   : > { %v703_v2 = vmul.f32 %v1386_v36, %v663_v10  ;;  %v699_v7 = vmul.f32 %v1322_v24, %v659_v60  ;;  %v610_v33 = vmul.f32 %v602_v18, %v1489_v22  ;;  %v447_v49 = vsel %vm439_vm6, -1.0, %v1646_v3 }
  0xde   : > { %v446_v31 = vsel %vm438_vm3, -1.0, %v1646_v3  ;;  %v664_v16 = vmul.f32 %v656_v47, %v1460_v61  ;;  %v612_v12 = vmul.f32 %v604_v37, %v1504_v1  ;;  %v1070_v8 = vpop.eup %1069  ;;  %vm440_vm8 = vcmp.lt.f32.partialorder %v1297_v51, 0.0 }
  0xdf   : > { %v711_v17 = vsub.f32 1.0, %v703_v2  ;;  %v707_v36 = vsub.f32 1.0, %v699_v7  ;;  %v618_v13 = vadd.f32 1.4214138, %v610_v33  ;;  %v725_v24 = vadd.f32 1.0, %v717_v29 }
  0xe0   : > { %v704_v28 = vmul.f32 %v1070_v8, %v664_v16  ;;  %v718_v30 = vmul.f32 %v710_v53, %v446_v31  ;;  %v620_v44 = vadd.f32 1.4214138, %v612_v12  ;;  %v713_v21 = vmul.f32 %v705_v6, %v1239_v62 }
  0xe1   : > { %v719_v15 = vmul.f32 %v711_v17, %v447_v49  ;;  %v715_v5 = vmul.f32 %v707_v36, %v1258_v11  ;;  %v626_v19 = vmul.f32 %v618_v13, %v1489_v22  ;;  %v421_v61 = vmul.f32 0.5, %v1227_v54 }
  0xe2   : > { %v423_v20 = vmul.f32 0.5, %v1261_v14  ;;  %v712_v50 = vsub.f32 1.0, %v704_v28  ;;  %v628_v63 = vmul.f32 %v620_v44, %v1504_v1  ;;  %v448_v40 = vsel %vm440_vm8, -1.0, %v1646_v3  ;;  %v831_v28 = vld [vmem:[%s1615_s1] sm:$0xff] }
  0xe3   : > { %v727_v39 = vadd.f32 1.0, %v719_v15  ;;  %v723_v0 = vadd.f32 1.0, %v715_v5  ;;  %v634_v59 = vadd.f32 -0.28449672, %v626_v19  ;;  %1071 = vpow2.f32 %v1289_v46  ;;  %v762_v19 = vpop.permute.xlu0 %761 }
  0xe4   : > { %v720_v62 = vmul.f32 %v712_v50, %v448_v40  ;;  %v726_v11 = vadd.f32 1.0, %v718_v30  ;;  %v636_v45 = vadd.f32 -0.28449672, %v628_v63  ;;  %v733_v26 = vmul.f32 %v725_v24, %v421_v61  ;;  %v833_v50 = vld [vmem:[%s1615_s1 + $0x10] sm:$0xff] }
  0xe5   : > { %v735_v35 = vmul.f32 %v727_v39, %v423_v20  ;;  %v721_v54 = vadd.f32 1.0, %v713_v21  ;;  %v642_v14 = vmul.f32 %v634_v59, %v1489_v22  ;;  %v422_v55 = vmul.f32 0.5, %v1233_v58  ;;  %v832_v59 = vld [vmem:[%s1615_s1 + $0x8] sm:$0xff] }
  0xe6   : > { %v424_v9 = vmul.f32 0.5, %v1274_v32  ;;  %v728_v57 = vadd.f32 1.0, %v720_v62  ;;  %v644_v51 = vmul.f32 %v636_v45, %v1504_v1  ;;  %v417_v48 = vmul.f32 0.5, %v1204_v23 }
  0xe7   : > { %v743_v43 = vpack.c.bf16 %v735_v35, %v733_v26  ;;  %v731_v46 = vmul.f32 %v723_v0, %v1249_v4  ;;  %v650_v56 = vadd.f32 0.2548296, %v642_v14  ;;  %v734_v34 = vmul.f32 %v726_v11, %v422_v55  ;;  %v745_v4 = vld [vmem:[%s1619_s5] sm:$0xff]  ;;  %v767_v35 = vpop.permute.xlu1 %766 }
  0xe8   : > { %v736_v52 = vmul.f32 %v728_v57, %v424_v9  ;;  %v652_v10 = vadd.f32 0.2548296, %v644_v51  ;;  %v729_v60 = vmul.f32 %v721_v54, %v417_v48  ;;  %vm434_vm0 = vcmp.lt.f32.partialorder %v1210_v27, 0.0  ;;  %751 = vperm.xlu2 %1040, %v745_v4   ;;  %v835_v55 = vld [vmem:[%s1615_s1 + $0x20] sm:$0xff] }
  0xe9   : > { %791 = vmatpush.bf16.msra.mxu2 %v743_v43  ;;  %v658_v18 = vmul.f32 %v650_v56, %v1489_v22  ;;  %v1072_v29 = vpop.eup %1071  ;;  %vm436_vm5 = vcmp.lt.f32.partialorder %v1221_v42, 0.0  ;;  %v1010_v22 = vld [vmem:[%s1618_s4] sm:$0xff]  ;;  %v442_v27 = vsel %vm434_vm0, -1.0, %v1646_v3  ;;  %vm1647_vm7 = vcmask 261120   ;;  %v746_v42 = vld [vmem:[%s1619_s5 + $0x8] sm:$0xff]  ;;  %v834_v43 = vld [vmem:[%s1615_s1 + $0x18] sm:$0xff] }
  0xea   : > { %v744_v58 = vpack.c.bf16 %v736_v52, %v734_v34  ;;  %v660_v32 = vmul.f32 %v652_v10, %v1504_v1  ;;  %v741_v47 = vpack.c.bf16 %v731_v46, %v729_v60  ;;  %v418_v33 = vmul.f32 0.5, %v1206_v25  ;;  %vm1648_vm9 = vmmov %vm1647_vm7  ;;  %v837_v60 = vld [vmem:[%s1615_s1 + $0x30] sm:$0xff] }
  0xeb   : > { %v698_v23 = vmul.f32 %v1284_v41, %v658_v18  ;;  %v444_v41 = vsel %vm436_vm5, -1.0, %v1646_v3  ;;  %v420_v49 = vmul.f32 0.5, %v1217_v38  ;;  %v1011_v3 = vld [vmem:[%s1618_s4 + $0x8] sm:$0xff]  ;;  %vm1649_vm10 = vmmov %vm1647_vm7 }
  0xec   : > { %810 = vmatpush.bf16.msra.mxu3 %v744_v58  ;;  %v700_v53 = vmul.f32 %v1072_v29, %v660_v32  ;;  %vm1650_vm12 = vmmov %vm1647_vm7  ;;  %v836_v32 = vld [vmem:[%s1615_s1 + $0x28] sm:$0xff] }
  0xed   : > { %792 = vmatpush.bf16.msra.mxu2 %v741_v47  ;;  %v706_v1 = vsub.f32 1.0, %v698_v23 }
  0xee   : > { %v708_v37 = vsub.f32 1.0, %v700_v53 }
  0xef   : > { %v714_v2 = vmul.f32 %v706_v1, %v442_v27  ;;  %v838_v1 = vld [vmem:[%s1615_s1 + $0x38] sm:$0xff] }
  0xf0   : > { %v716_v7 = vmul.f32 %v708_v37, %v444_v41  ;;  %1000 = vmatmul.msk.bf16.vlgmr.msra.gmra.mxu2 %vm1647_vm7, %v1010_v22  ;;  %756 = vperm.xlu2 %1040, %v746_v42  }
  0xf1   : > { %v722_v6 = vadd.f32 1.0, %v714_v2 }
  0xf2   : > { %v724_v31 = vadd.f32 1.0, %v716_v7 }
  0xf3   : > { %v730_v16 = vmul.f32 %v722_v6, %v418_v33 }
  0xf4   : > { %v732_v12 = vmul.f32 %v724_v31, %v420_v49 }
  0xf6   : > { %v742_v8 = vpack.c.bf16 %v732_v12, %v730_v16 }
  0xf8   : > { %811 = vmatpush.bf16.msra.mxu3 %v742_v8 }
  0xfb   : > { %1002 = vmatmul.msk.bf16.vlgmr.msra.gmra.mxu3 %vm1648_vm9, %v1010_v22 }
 0x100   : > { %1001 = vmatmul.msk.bf16.gmra.mxu2 %vm1649_vm10, %v1011_v3 }
 0x10b   : > { %1003 = vmatmul.msk.bf16.gmra.mxu3 %vm1650_vm12, %v1011_v3 }
 0x142   : > { %v752_v25 = vpop.permute.xlu2 %751 }
 0x14a   : > { %v757_v36 = vpop.permute.xlu2 %756 }
 0x173   : > { %v794_v17 = vpop.f32.mrf.mxu2 }
 0x174   : > { %v795_v38 = vadd.f32 %v794_v17, %v752_v25 }
 0x176   : > { %1073 = vtanh.f32 %v795_v38 }
 0x17b   : > { %v796_v13 = vpop.f32.mrf.mxu2 }
 0x17c   : > { %v1074_v24 = vpop.eup %1073  ;;  %v797_v30 = vadd.f32 %v796_v13, %v757_v36 }
 0x17d   : > { %v839_v44 = vadd.f32 1.0, %v1074_v24 }
 0x17e   : > { %v813_v15 = vpop.f32.mrf.mxu3  ;;  %1075 = vtanh.f32 %v797_v30 }
 0x17f   : > { %v847_v21 = vmul.f32 %v839_v44, %v831_v28  ;;  %v814_v5 = vadd.f32 %v813_v15, %v752_v25 }
 0x181   : > { %855 = vst [vmem:[%s1574_s15] sm:$0xff] %v847_v21  ;;  %1077 = vtanh.f32 %v814_v5 }
 0x183   : > { %v799_v61 = vpop.f32.mrf.mxu2 }
 0x184   : > { %v1076_v20 = vpop.eup %1075  ;;  %v800_v63 = vadd.f32 %v799_v61, %v762_v19 }
 0x185   : > { %v841_v39 = vadd.f32 1.0, %v1076_v20 }
 0x186   : > { %v815_v40 = vpop.f32.mrf.mxu3  ;;  %1079 = vtanh.f32 %v800_v63 }
 0x187   : > { %v1078_v0 = vpop.eup %1077  ;;  %v849_v62 = vmul.f32 %v841_v39, %v833_v50  ;;  %v816_v11 = vadd.f32 %v815_v40, %v757_v36 }
 0x188   : > { %v840_v45 = vadd.f32 1.0, %v1078_v0 }
 0x189   : > { %857 = vst [vmem:[%s1574_s15 + $0x10] sm:$0xff] %v849_v62  ;;  %1081 = vtanh.f32 %v816_v11 }
 0x18a   : > { %v848_v26 = vmul.f32 %v840_v45, %v832_v59 }
 0x18b   : > { %v801_v54 = vpop.f32.mrf.mxu2 }
 0x18c   : > { %v1080_v14 = vpop.eup %1079  ;;  %856 = vst [vmem:[%s1574_s15 + $0x8] sm:$0xff] %v848_v26  ;;  %v802_v9 = vadd.f32 %v801_v54, %v767_v35 }
 0x18d   : > { %v843_v57 = vadd.f32 1.0, %v1080_v14 }
 0x18e   : > { %v818_v51 = vpop.f32.mrf.mxu3  ;;  %1083 = vtanh.f32 %v802_v9 }
 0x18f   : > { %v1082_v48 = vpop.eup %1081  ;;  %v851_v46 = vmul.f32 %v843_v57, %v835_v55  ;;  %v819_v56 = vadd.f32 %v818_v51, %v762_v19 }
 0x190   : > { %v842_v34 = vadd.f32 1.0, %v1082_v48 }
 0x191   : > { %859 = vst [vmem:[%s1574_s15 + $0x20] sm:$0xff] %v851_v46  ;;  %1085 = vtanh.f32 %v819_v56 }
 0x192   : > { %v850_v52 = vmul.f32 %v842_v34, %v834_v43 }
 0x194   : > { %v1084_v10 = vpop.eup %1083  ;;  %858 = vst [vmem:[%s1574_s15 + $0x18] sm:$0xff] %v850_v52 }
 0x195   : > { %v845_v18 = vadd.f32 1.0, %v1084_v10 }
 0x196   : > { %v820_v29 = vpop.f32.mrf.mxu3 }
 0x197   : > { %v1086_v58 = vpop.eup %1085  ;;  %v853_v47 = vmul.f32 %v845_v18, %v837_v60  ;;  %v821_v23 = vadd.f32 %v820_v29, %v767_v35 }
 0x198   : > { %v844_v4 = vadd.f32 1.0, %v1086_v58 }
 0x199   : > { %861 = vst [vmem:[%s1574_s15 + $0x30] sm:$0xff] %v853_v47  ;;  %1087 = vtanh.f32 %v821_v23 }
 0x19a   : > { %v852_v53 = vmul.f32 %v844_v4, %v836_v32 }
 0x19c   : > { %860 = vst [vmem:[%s1574_s15 + $0x28] sm:$0xff] %v852_v53 }
 0x19f   : > { %v1088_v22 = vpop.eup %1087 }
 0x1a0   : > { %v846_v27 = vadd.f32 1.0, %v1088_v22 }
 0x1a2   : > { %v854_v37 = vmul.f32 %v846_v27, %v838_v1 }
 0x1a4   : > { %862 = vst [vmem:[%s1574_s15 + $0x38] sm:$0xff] %v854_v37 }
 0x1a5 PF: > { %s16_s23 = sadd.s32 1, %s1111_s23   ;;  %s1651_s21 = smov %s1107_s22 }
 0x1a6   : > { %p13_p5 = scmp.ge.s32.totalorder %s16_s23, 4   ;;  %s1652_s22 = smov %s1654_s24 }
 0x1a8   :  { %15 = sbr.rel (!%p13_p5) target bundleno = 2 (0x2), region = 77 }

</bundles_post_ra>
